<compile_context>
chip_gen: v7x
topology: tpu7x:2x2x1
jax: 0.10.0
libtpu: 0.0.40
codegen_flags: <defaults>
</compile_context>

<pallas_src>
import functools

import jax
import jax.numpy as jnp
from jax.experimental import pallas as pl
from jax.experimental.pallas import tpu as pltpu

EPS = 1e-5  # PyTorch nn.LayerNorm default


def _layernorm(v, g, b):
    mu = jnp.mean(v, axis=-1, keepdims=True)
    var = jnp.mean((v - mu) ** 2, axis=-1, keepdims=True)
    return (v - mu) * jax.lax.rsqrt(var + EPS) * g + b


def transformer_block_kernel(
    x_ref, c_ref,
    wc1_ref, bc1_ref, wc2_ref, bc2_ref,
    g1_ref, b1_ref, g2_ref, b2_ref,
    wqkv_ref, bqkv_ref, wo_ref, bo_ref,
    w1_ref, bm1_ref, w2_ref, bm2_ref,
    o_ref,
    *, bb, seq, q_heads, kv_heads, head_dim):
    """One grid step = bb batch elements, flattened to (bb*seq, D) rows."""
    f32 = jnp.float32
    bf16 = jnp.bfloat16

    x = x_ref[...]                            # (M, D) f32, M = bb*seq
    M, D = x.shape
    hd = head_dim
    kv_dim = kv_heads * hd
    group = q_heads // kv_heads

    c_bf = c_ref[...].astype(bf16)            # reused for both c_proj halves

    # ---- c_proj, first half -> c0, c1, c2 ----
    cp1 = jnp.dot(c_bf, wc1_ref[...], preferred_element_type=f32) + bc1_ref[...]
    c0 = cp1[:, 0 * D:1 * D]
    c1 = cp1[:, 1 * D:2 * D]
    c2 = cp1[:, 2 * D:3 * D]

    # ---- attention branch: x1 = x + c0 * attn(c1 * norm1(x) + c2) ----
    h = c1 * _layernorm(x, g1_ref[...], b1_ref[...]) + c2

    # fused q|k|v projection: one wide MXU matmul, bf16 in / f32 accumulate
    qkv = jnp.dot(h.astype(bf16), wqkv_ref[...],
                  preferred_element_type=f32) + bqkv_ref[...]   # (M, D+2*kv_dim)

    scale = 1.0 / (hd ** 0.5)
    q = qkv[:, :D] * scale                      # scale folded into q once
    k = qkv[:, D:D + kv_dim]
    v = qkv[:, D + kv_dim:]

    # grouped-query attention: heads + batch become a leading batch axis,
    # queries of a kv group are stacked head-major (m = gq*seq + t) so k/v are
    # never duplicated and each K/V block is reused across group*seq rows.
    qg = q.reshape(bb, seq, q_heads, hd)
    qg = jnp.transpose(qg, (0, 2, 1, 3)).reshape(bb * kv_heads, group * seq, hd)
    kg = k.reshape(bb, seq, kv_heads, hd)
    kg = jnp.transpose(kg, (0, 2, 1, 3)).reshape(bb * kv_heads, seq, hd)
    vg = v.reshape(bb, seq, kv_heads, hd)
    vg = jnp.transpose(vg, (0, 2, 1, 3)).reshape(bb * kv_heads, seq, hd)

    s = jnp.einsum("bmd,bnd->bmn", qg.astype(bf16), kg.astype(bf16),
                   preferred_element_type=f32)                  # (bb*kv, g*T, T)
    s = s - jnp.max(s, axis=-1, keepdims=True)
    p = jnp.exp(s)
    p = p * pl.reciprocal(jnp.sum(p, axis=-1, keepdims=True), approx=True)
    ctx = jnp.einsum("bmn,bnd->bmd", p.astype(bf16), vg.astype(bf16),
                     preferred_element_type=f32)                # (bb*kv, g*T, hd)

    # heads back onto the lane axis (one relayout), then a single wo matmul
    ctx = ctx.reshape(bb, q_heads, seq, hd)
    ctx = jnp.transpose(ctx, (0, 2, 1, 3)).reshape(M, D)
    attn = jnp.dot(ctx.astype(bf16), wo_ref[...],
                   preferred_element_type=f32) + bo_ref[...]

    x1 = x + c0 * attn                          # residual (dropout = identity)

    # ---- c_proj, second half -> c3, c4, c5 (kept out of attention live range) ----
    cp2 = jnp.dot(c_bf, wc2_ref[...], preferred_element_type=f32) + bc2_ref[...]
    c3 = cp2[:, 0 * D:1 * D]
    c4 = cp2[:, 1 * D:2 * D]
    c5 = cp2[:, 2 * D:3 * D]

    # ---- MLP branch: out = x1 + c3 * mlp(c4 * norm2(x1) + c5) ----
    m = c4 * _layernorm(x1, g2_ref[...], b2_ref[...]) + c5
    hid = jnp.dot(m.astype(bf16), w1_ref[...],
                  preferred_element_type=f32) + bm1_ref[...]
    hid = jax.nn.gelu(hid, approximate=True)
    mlp = jnp.dot(hid.astype(bf16), w2_ref[...],
                  preferred_element_type=f32) + bm2_ref[...]

    o_ref[...] = x1 + c3 * mlp


def transformer_block(x, c, params, *, q_heads, kv_heads):
    B, T, D = x.shape
    head_dim = D // q_heads
    bf16 = jnp.bfloat16

    # Collapse batch & tokens so each grid step feeds the MXU >=128 rows where
    # possible (v5e full 128-row tile; half of v6e/v7x's 256-row array). bb must
    # divide B so the attention within a block stays per-batch-element.
    bb = min(B, max(1, pl.cdiv(128, T)))
    while B % bb:
        bb -= 1
    rows = bb * T

    x2 = x.reshape(B * T, D)
    c2 = c.reshape(B * T, D)

    # ---- wrapper-side weight prep (done once by XLA) ----
    wqkv = jnp.concatenate([params["wq"], params["wk"], params["wv"]],
                           axis=1).astype(bf16)                 # (D, D+2*kv_dim)
    bqkv = jnp.concatenate([params["bq"], params["bk"], params["bv"]], axis=1)

    plist = [
        params["wc"][:, :3 * D].astype(bf16), params["bc"][:, :3 * D],   # c_proj half 1
        params["wc"][:, 3 * D:].astype(bf16), params["bc"][:, 3 * D:],   # c_proj half 2
        params["g1"], params["b1"], params["g2"], params["b2"],
        wqkv, bqkv, params["wo"].astype(bf16), params["bo"],
        params["w1"].astype(bf16), params["bm1"],
        params["w2"].astype(bf16), params["bm2"],
    ]

    kernel = functools.partial(transformer_block_kernel, bb=bb, seq=T,
                               q_heads=q_heads, kv_heads=kv_heads,
                               head_dim=head_dim)

    def wspec(a):
        nd = a.ndim
        # constant block index across the grid -> DMA'd once, stays resident
        return pl.BlockSpec(a.shape, lambda i, _nd=nd: (0,) * _nd)

    in_specs = (
        [pl.BlockSpec((rows, D), lambda i: (i, 0)),   # x (flattened B*T rows)
         pl.BlockSpec((rows, D), lambda i: (i, 0))]   # c
        + [wspec(p) for p in plist]
    )
    out_spec = pl.BlockSpec((rows, D), lambda i: (i, 0))

    out = pl.pallas_call(
        kernel,
        out_shape=jax.ShapeDtypeStruct((B * T, D), jnp.float32),
        grid_spec=pltpu.PrefetchScalarGridSpec(
            num_scalar_prefetch=0,
            grid=(B // bb,),
            in_specs=in_specs,
            out_specs=out_spec,
        ),
        compiler_params=pltpu.CompilerParams(
            dimension_semantics=("parallel",),
            vmem_limit_bytes=48 * 1024 * 1024,   # fits v7x (64 MiB), ample on v5e/v6e
        ),
    )(x2, c2, *plist)
    return out.reshape(B, T, D)


def reference(x, c, p, *, q_heads, kv_heads):
    """Plain-JAX reference of the same forward pass (HIGHEST precision, f32)."""
    hp = jax.lax.Precision.HIGHEST
    B, T, D = x.shape
    head_dim = D // q_heads

    cp = jnp.dot(c, p["wc"], precision=hp) + p["bc"][0]
    cs = jnp.split(cp, 6, axis=-1)

    def ln(v, g, b):
        mu = v.mean(-1, keepdims=True)
        var = ((v - mu) ** 2).mean(-1, keepdims=True)
        return (v - mu) / jnp.sqrt(var + EPS) * g + b

    h = cs[1] * ln(x, p["g1"][0], p["b1"][0]) + cs[2]
    q = jnp.dot(h, p["wq"], precision=hp) + p["bq"][0]
    k = jnp.dot(h, p["wk"], precision=hp) + p["bk"][0]
    v = jnp.dot(h, p["wv"], precision=hp) + p["bv"][0]

    qh = q.reshape(B, T, q_heads, head_dim).transpose(0, 2, 1, 3)
    kh = k.reshape(B, T, kv_heads, head_dim).transpose(0, 2, 1, 3)
    vh = v.reshape(B, T, kv_heads, head_dim).transpose(0, 2, 1, 3)
    rep = q_heads // kv_heads
    kh = jnp.repeat(kh, rep, axis=1)
    vh = jnp.repeat(vh, rep, axis=1)
    s = jnp.einsum("bhqd,bhkd->bhqk", qh, kh, precision=hp) / jnp.sqrt(
        jnp.float32(head_dim))
    pa = jax.nn.softmax(s, axis=-1)
    ao = jnp.einsum("bhqk,bhkd->bhqd", pa, vh, precision=hp)
    ao = ao.transpose(0, 2, 1, 3).reshape(B, T, D)
    ao = jnp.dot(ao, p["wo"], precision=hp) + p["bo"][0]

    x1 = x + cs[0] * ao
    m = cs[4] * ln(x1, p["g2"][0], p["b2"][0]) + cs[5]
    hid = jax.nn.gelu(jnp.dot(m, p["w1"], precision=hp) + p["bm1"][0],
                      approximate=True)
    mlp = jnp.dot(hid, p["w2"], precision=hp) + p["bm2"][0]
    return x1 + cs[3] * mlp


if __name__ == "__main__":
    B, T, D = 2, 16, 128
    q_heads, kv_heads, mlp_mult = 4, 2, 4
    head_dim = D // q_heads
    kv_dim = kv_heads * head_dim
    H = D * mlp_mult

    key = jax.random.PRNGKey(0)
    ks = jax.random.split(key, 20)
    w = 0.02  # weight scale

    def rnd(k, shape, scale):
        return jax.random.normal(k, shape, jnp.float32) * scale

    x = jax.random.normal(ks[0], (B, T, D), jnp.float32)
    c = jax.random.normal(ks[1], (B, T, D), jnp.float32)

    params = {
        # c_proj: Linear(D, 6D)
        "wc": rnd(ks[2], (D, 6 * D), w), "bc": rnd(ks[3], (1, 6 * D), w),
        # LayerNorms
        "g1": 1.0 + rnd(ks[4], (1, D), 0.1), "b1": rnd(ks[5], (1, D), 0.1),
        "g2": 1.0 + rnd(ks[6], (1, D), 0.1), "b2": rnd(ks[7], (1, D), 0.1),
        # attention projections (GQA)
        "wq": rnd(ks[8], (D, D), w), "bq": rnd(ks[9], (1, D), w),
        "wk": rnd(ks[10], (D, kv_dim), w), "bk": rnd(ks[11], (1, kv_dim), w),
        "wv": rnd(ks[12], (D, kv_dim), w), "bv": rnd(ks[13], (1, kv_dim), w),
        "wo": rnd(ks[14], (D, D), w), "bo": rnd(ks[15], (1, D), w),
        # MLP
        "w1": rnd(ks[16], (D, H), w), "bm1": rnd(ks[17], (1, H), w),
        "w2": rnd(ks[18], (H, D), w), "bm2": rnd(ks[19], (1, D), w),
    }

    out = transformer_block(x, c, params, q_heads=q_heads, kv_heads=kv_heads)
    out = jax.block_until_ready(out)

    ref = reference(x, c, params, q_heads=q_heads, kv_heads=kv_heads)
    ref = jax.block_until_ready(ref)

    max_err = float(jnp.max(jnp.abs(out - ref)))
    if not (jnp.allclose(out, ref, atol=5e-3, rtol=5e-3) and max_err < 5e-3):
        raise AssertionError(
            f"Pallas kernel output does not match JAX reference (max abs err {max_err:.3e})")

    print("KERNEL_OK")
</pallas_src>

<mosaic_0001>
module attributes {stable_mosaic.version = 11 : i64} {
  func.func @transformer_block_kernel(%arg0: i32, %arg1: memref<32x128xf32, #tpu.memory_space<vmem>>, %arg2: memref<32x128xf32, #tpu.memory_space<vmem>>, %arg3: memref<128x384xbf16, #tpu.memory_space<vmem>>, %arg4: memref<1x384xf32, #tpu.memory_space<vmem>>, %arg5: memref<128x384xbf16, #tpu.memory_space<vmem>>, %arg6: memref<1x384xf32, #tpu.memory_space<vmem>>, %arg7: memref<1x128xf32, #tpu.memory_space<vmem>>, %arg8: memref<1x128xf32, #tpu.memory_space<vmem>>, %arg9: memref<1x128xf32, #tpu.memory_space<vmem>>, %arg10: memref<1x128xf32, #tpu.memory_space<vmem>>, %arg11: memref<128x256xbf16, #tpu.memory_space<vmem>>, %arg12: memref<1x256xf32, #tpu.memory_space<vmem>>, %arg13: memref<128x128xbf16, #tpu.memory_space<vmem>>, %arg14: memref<1x128xf32, #tpu.memory_space<vmem>>, %arg15: memref<128x512xbf16, #tpu.memory_space<vmem>>, %arg16: memref<1x512xf32, #tpu.memory_space<vmem>>, %arg17: memref<512x128xbf16, #tpu.memory_space<vmem>>, %arg18: memref<1x128xf32, #tpu.memory_space<vmem>>, %arg19: memref<32x128xf32, #tpu.memory_space<vmem>>) attributes {dimension_semantics = [#tpu.dimension_semantics<parallel>], iteration_bounds = array<i64: 1>, scalar_prefetch = 0 : i64, scratch_operands = 0 : i64, tpu.core_type = #tpu.core_type<tc>, window_params = [{transform_indices = @transform_0, window_bounds = array<i64: 32, 128>}, {transform_indices = @transform_1, window_bounds = array<i64: 32, 128>}, {pipeline_mode = #tpu.pipeline_mode<synchronous>, transform_indices = @transform_2, window_bounds = array<i64: 128, 384>}, {pipeline_mode = #tpu.pipeline_mode<synchronous>, transform_indices = @transform_3, window_bounds = array<i64: 1, 384>}, {pipeline_mode = #tpu.pipeline_mode<synchronous>, transform_indices = @transform_4, window_bounds = array<i64: 128, 384>}, {pipeline_mode = #tpu.pipeline_mode<synchronous>, transform_indices = @transform_5, window_bounds = array<i64: 1, 384>}, {pipeline_mode = #tpu.pipeline_mode<synchronous>, transform_indices = @transform_6, window_bounds = array<i64: 1, 128>}, {pipeline_mode = #tpu.pipeline_mode<synchronous>, transform_indices = @transform_7, window_bounds = array<i64: 1, 128>}, {pipeline_mode = #tpu.pipeline_mode<synchronous>, transform_indices = @transform_8, window_bounds = array<i64: 1, 128>}, {pipeline_mode = #tpu.pipeline_mode<synchronous>, transform_indices = @transform_9, window_bounds = array<i64: 1, 128>}, {pipeline_mode = #tpu.pipeline_mode<synchronous>, transform_indices = @transform_10, window_bounds = array<i64: 128, 256>}, {pipeline_mode = #tpu.pipeline_mode<synchronous>, transform_indices = @transform_11, window_bounds = array<i64: 1, 256>}, {pipeline_mode = #tpu.pipeline_mode<synchronous>, transform_indices = @transform_12, window_bounds = array<i64: 128, 128>}, {pipeline_mode = #tpu.pipeline_mode<synchronous>, transform_indices = @transform_13, window_bounds = array<i64: 1, 128>}, {pipeline_mode = #tpu.pipeline_mode<synchronous>, transform_indices = @transform_14, window_bounds = array<i64: 128, 512>}, {pipeline_mode = #tpu.pipeline_mode<synchronous>, transform_indices = @transform_15, window_bounds = array<i64: 1, 512>}, {pipeline_mode = #tpu.pipeline_mode<synchronous>, transform_indices = @transform_16, window_bounds = array<i64: 512, 128>}, {pipeline_mode = #tpu.pipeline_mode<synchronous>, transform_indices = @transform_17, window_bounds = array<i64: 1, 128>}, {transform_indices = @transform_18, window_bounds = array<i64: 32, 128>}]} {
    %c0 = arith.constant 0 : index
    %c0_0 = arith.constant 0 : index
    %0 = vector.load %arg1[%c0, %c0_0] : memref<32x128xf32, #tpu.memory_space<vmem>>, vector<32x128xf32>
    %c0_1 = arith.constant 0 : index
    %c0_2 = arith.constant 0 : index
    %1 = vector.load %arg2[%c0_1, %c0_2] : memref<32x128xf32, #tpu.memory_space<vmem>>, vector<32x128xf32>
    %2 = arith.truncf %1 : vector<32x128xf32> to vector<32x128xbf16>
    %c0_3 = arith.constant 0 : index
    %c0_4 = arith.constant 0 : index
    %3 = vector.load %arg3[%c0_3, %c0_4] : memref<128x384xbf16, #tpu.memory_space<vmem>>, vector<128x384xbf16>
    %cst = arith.constant dense<0.000000e+00> : vector<32x384xf32>
    %4 = tpu.matmul %2, %3, %cst {dimension_numbers = #tpu.dot_dimension_numbers<[1], [0], [0], [1], [0, 0, 1, 1], [], []>} : vector<32x128xbf16>, vector<128x384xbf16>, vector<32x384xf32> -> vector<32x384xf32>
    %c0_5 = arith.constant 0 : index
    %c0_6 = arith.constant 0 : index
    %5 = vector.load %arg4[%c0_5, %c0_6] : memref<1x384xf32, #tpu.memory_space<vmem>>, vector<1x384xf32>
    %6 = vector.broadcast %5 : vector<1x384xf32> to vector<32x384xf32>
    %7 = arith.addf %4, %6 : vector<32x384xf32>
    %8 = vector.extract_strided_slice %7 {offsets = [0, 0], sizes = [32, 128], strides = [1, 1]} : vector<32x384xf32> to vector<32x128xf32>
    %9 = vector.extract_strided_slice %7 {offsets = [0, 128], sizes = [32, 128], strides = [1, 1]} : vector<32x384xf32> to vector<32x128xf32>
    %10 = vector.extract_strided_slice %7 {offsets = [0, 256], sizes = [32, 128], strides = [1, 1]} : vector<32x384xf32> to vector<32x128xf32>
    %c0_7 = arith.constant 0 : index
    %c0_8 = arith.constant 0 : index
    %11 = vector.load %arg7[%c0_7, %c0_8] : memref<1x128xf32, #tpu.memory_space<vmem>>, vector<1x128xf32>
    %c0_9 = arith.constant 0 : index
    %c0_10 = arith.constant 0 : index
    %12 = vector.load %arg8[%c0_9, %c0_10] : memref<1x128xf32, #tpu.memory_space<vmem>>, vector<1x128xf32>
    %cst_11 = arith.constant dense<0.000000e+00> : vector<32xf32>
    %13 = vector.multi_reduction <add>, %0, %cst_11 [1] : vector<32x128xf32> to vector<32xf32>
    %14 = vector.shape_cast %13 : vector<32xf32> to vector<32x1xf32>
    %cst_12 = arith.constant 1.280000e+02 : f32
    %15 = vector.broadcast %cst_12 : f32 to vector<32x1xf32>
    %16 = arith.divf %14, %15 : vector<32x1xf32>
    %17 = vector.broadcast %16 : vector<32x1xf32> to vector<32x128xf32>
    %18 = arith.subf %0, %17 : vector<32x128xf32>
    %19 = arith.mulf %18, %18 : vector<32x128xf32>
    %cst_13 = arith.constant dense<0.000000e+00> : vector<32xf32>
    %20 = vector.multi_reduction <add>, %19, %cst_13 [1] : vector<32x128xf32> to vector<32xf32>
    %21 = vector.shape_cast %20 : vector<32xf32> to vector<32x1xf32>
    %cst_14 = arith.constant 1.280000e+02 : f32
    %22 = vector.broadcast %cst_14 : f32 to vector<32x1xf32>
    %23 = arith.divf %21, %22 : vector<32x1xf32>
    %24 = vector.broadcast %16 : vector<32x1xf32> to vector<32x128xf32>
    %25 = arith.subf %0, %24 : vector<32x128xf32>
    %cst_15 = arith.constant 9.99999974E-6 : f32
    %26 = vector.broadcast %cst_15 : f32 to vector<32x1xf32>
    %27 = arith.addf %23, %26 : vector<32x1xf32>
    %28 = math.rsqrt %27 : vector<32x1xf32>
    %29 = vector.broadcast %28 : vector<32x1xf32> to vector<32x128xf32>
    %30 = arith.mulf %25, %29 : vector<32x128xf32>
    %31 = vector.broadcast %11 : vector<1x128xf32> to vector<32x128xf32>
    %32 = arith.mulf %30, %31 : vector<32x128xf32>
    %33 = vector.broadcast %12 : vector<1x128xf32> to vector<32x128xf32>
    %34 = arith.addf %32, %33 : vector<32x128xf32>
    %35 = arith.mulf %9, %34 : vector<32x128xf32>
    %36 = arith.addf %35, %10 : vector<32x128xf32>
    %37 = arith.truncf %36 : vector<32x128xf32> to vector<32x128xbf16>
    %c0_16 = arith.constant 0 : index
    %c0_17 = arith.constant 0 : index
    %38 = vector.load %arg11[%c0_16, %c0_17] : memref<128x256xbf16, #tpu.memory_space<vmem>>, vector<128x256xbf16>
    %cst_18 = arith.constant dense<0.000000e+00> : vector<32x256xf32>
    %39 = tpu.matmul %37, %38, %cst_18 {dimension_numbers = #tpu.dot_dimension_numbers<[1], [0], [0], [1], [0, 0, 1, 1], [], []>} : vector<32x128xbf16>, vector<128x256xbf16>, vector<32x256xf32> -> vector<32x256xf32>
    %c0_19 = arith.constant 0 : index
    %c0_20 = arith.constant 0 : index
    %40 = vector.load %arg12[%c0_19, %c0_20] : memref<1x256xf32, #tpu.memory_space<vmem>>, vector<1x256xf32>
    %41 = vector.broadcast %40 : vector<1x256xf32> to vector<32x256xf32>
    %42 = arith.addf %39, %41 : vector<32x256xf32>
    %43 = vector.extract_strided_slice %42 {offsets = [0, 0], sizes = [32, 128], strides = [1, 1]} : vector<32x256xf32> to vector<32x128xf32>
    %cst_21 = arith.constant 0.176776692 : f32
    %44 = vector.broadcast %cst_21 : f32 to vector<32x128xf32>
    %45 = arith.mulf %43, %44 : vector<32x128xf32>
    %46 = vector.extract_strided_slice %42 {offsets = [0, 128], sizes = [32, 64], strides = [1, 1]} : vector<32x256xf32> to vector<32x64xf32>
    %47 = vector.extract_strided_slice %42 {offsets = [0, 192], sizes = [32, 64], strides = [1, 1]} : vector<32x256xf32> to vector<32x64xf32>
    %48 = vector.shape_cast %45 : vector<32x128xf32> to vector<2x16x4x32xf32>
    %49 = tpu.transpose %48, [0, 2, 1, 3] : vector<2x16x4x32xf32> -> vector<2x4x16x32xf32>
    %50 = vector.shape_cast %49 : vector<2x4x16x32xf32> to vector<4x32x32xf32>
    %51 = vector.shape_cast %46 : vector<32x64xf32> to vector<2x16x2x32xf32>
    %52 = tpu.transpose %51, [0, 2, 1, 3] : vector<2x16x2x32xf32> -> vector<2x2x16x32xf32>
    %53 = vector.shape_cast %52 : vector<2x2x16x32xf32> to vector<4x16x32xf32>
    %54 = vector.shape_cast %47 : vector<32x64xf32> to vector<2x16x2x32xf32>
    %55 = tpu.transpose %54, [0, 2, 1, 3] : vector<2x16x2x32xf32> -> vector<2x2x16x32xf32>
    %56 = vector.shape_cast %55 : vector<2x2x16x32xf32> to vector<4x16x32xf32>
    %57 = arith.truncf %50 : vector<4x32x32xf32> to vector<4x32x32xbf16>
    %58 = arith.truncf %53 : vector<4x16x32xf32> to vector<4x16x32xbf16>
    "tpu.trace_start"() <{level = 10 : i32, message = "bmd,bnd->bmn"}> : () -> ()
    %cst_22 = arith.constant dense<0.000000e+00> : vector<4x32x16xf32>
    %59 = tpu.matmul %57, %58, %cst_22 {dimension_numbers = #tpu.dot_dimension_numbers<[2], [2], [1], [1], [0, 0, 0, 1, 1, 1], [0], [0]>} : vector<4x32x32xbf16>, vector<4x16x32xbf16>, vector<4x32x16xf32> -> vector<4x32x16xf32>
    "tpu.trace_stop"() : () -> ()
    %cst_23 = arith.constant dense<0xFF800000> : vector<4x32xf32>
    %60 = vector.multi_reduction <maximumf>, %59, %cst_23 [2] : vector<4x32x16xf32> to vector<4x32xf32>
    %61 = vector.shape_cast %60 : vector<4x32xf32> to vector<4x32x1xf32>
    %62 = vector.broadcast %61 : vector<4x32x1xf32> to vector<4x32x16xf32>
    %63 = arith.subf %59, %62 : vector<4x32x16xf32>
    %64 = math.exp %63 : vector<4x32x16xf32>
    %cst_24 = arith.constant dense<0.000000e+00> : vector<4x32xf32>
    %65 = vector.multi_reduction <add>, %64, %cst_24 [2] : vector<4x32x16xf32> to vector<4x32xf32>
    %66 = vector.shape_cast %65 : vector<4x32xf32> to vector<4x32x1xf32>
    %67 = tpu.reciprocal %66 {approx = true} : vector<4x32x1xf32> -> vector<4x32x1xf32>
    %68 = vector.broadcast %67 : vector<4x32x1xf32> to vector<4x32x16xf32>
    %69 = arith.mulf %64, %68 : vector<4x32x16xf32>
    %70 = arith.truncf %69 : vector<4x32x16xf32> to vector<4x32x16xbf16>
    %71 = arith.truncf %56 : vector<4x16x32xf32> to vector<4x16x32xbf16>
    "tpu.trace_start"() <{level = 10 : i32, message = "bmn,bnd->bmd"}> : () -> ()
    %cst_25 = arith.constant dense<0.000000e+00> : vector<4x32x32xf32>
    %72 = tpu.matmul %70, %71, %cst_25 {dimension_numbers = #tpu.dot_dimension_numbers<[2], [1], [1], [2], [0, 0, 0, 1, 1, 2], [0], [0]>} : vector<4x32x16xbf16>, vector<4x16x32xbf16>, vector<4x32x32xf32> -> vector<4x32x32xf32>
    "tpu.trace_stop"() : () -> ()
    %73 = vector.shape_cast %72 : vector<4x32x32xf32> to vector<2x4x16x32xf32>
    %74 = tpu.transpose %73, [0, 2, 1, 3] : vector<2x4x16x32xf32> -> vector<2x16x4x32xf32>
    %75 = vector.shape_cast %74 : vector<2x16x4x32xf32> to vector<32x128xf32>
    %76 = arith.truncf %75 : vector<32x128xf32> to vector<32x128xbf16>
    %c0_26 = arith.constant 0 : index
    %c0_27 = arith.constant 0 : index
    %77 = vector.load %arg13[%c0_26, %c0_27] : memref<128x128xbf16, #tpu.memory_space<vmem>>, vector<128x128xbf16>
    %cst_28 = arith.constant dense<0.000000e+00> : vector<32x128xf32>
    %78 = tpu.matmul %76, %77, %cst_28 {dimension_numbers = #tpu.dot_dimension_numbers<[1], [0], [0], [1], [0, 0, 1, 1], [], []>} : vector<32x128xbf16>, vector<128x128xbf16>, vector<32x128xf32> -> vector<32x128xf32>
    %c0_29 = arith.constant 0 : index
    %c0_30 = arith.constant 0 : index
    %79 = vector.load %arg14[%c0_29, %c0_30] : memref<1x128xf32, #tpu.memory_space<vmem>>, vector<1x128xf32>
    %80 = vector.broadcast %79 : vector<1x128xf32> to vector<32x128xf32>
    %81 = arith.addf %78, %80 : vector<32x128xf32>
    %82 = arith.mulf %8, %81 : vector<32x128xf32>
    %83 = arith.addf %0, %82 : vector<32x128xf32>
    %c0_31 = arith.constant 0 : index
    %c0_32 = arith.constant 0 : index
    %84 = vector.load %arg5[%c0_31, %c0_32] : memref<128x384xbf16, #tpu.memory_space<vmem>>, vector<128x384xbf16>
    %cst_33 = arith.constant dense<0.000000e+00> : vector<32x384xf32>
    %85 = tpu.matmul %2, %84, %cst_33 {dimension_numbers = #tpu.dot_dimension_numbers<[1], [0], [0], [1], [0, 0, 1, 1], [], []>} : vector<32x128xbf16>, vector<128x384xbf16>, vector<32x384xf32> -> vector<32x384xf32>
    %c0_34 = arith.constant 0 : index
    %c0_35 = arith.constant 0 : index
    %86 = vector.load %arg6[%c0_34, %c0_35] : memref<1x384xf32, #tpu.memory_space<vmem>>, vector<1x384xf32>
    %87 = vector.broadcast %86 : vector<1x384xf32> to vector<32x384xf32>
    %88 = arith.addf %85, %87 : vector<32x384xf32>
    %89 = vector.extract_strided_slice %88 {offsets = [0, 0], sizes = [32, 128], strides = [1, 1]} : vector<32x384xf32> to vector<32x128xf32>
    %90 = vector.extract_strided_slice %88 {offsets = [0, 128], sizes = [32, 128], strides = [1, 1]} : vector<32x384xf32> to vector<32x128xf32>
    %91 = vector.extract_strided_slice %88 {offsets = [0, 256], sizes = [32, 128], strides = [1, 1]} : vector<32x384xf32> to vector<32x128xf32>
    %c0_36 = arith.constant 0 : index
    %c0_37 = arith.constant 0 : index
    %92 = vector.load %arg9[%c0_36, %c0_37] : memref<1x128xf32, #tpu.memory_space<vmem>>, vector<1x128xf32>
    %c0_38 = arith.constant 0 : index
    %c0_39 = arith.constant 0 : index
    %93 = vector.load %arg10[%c0_38, %c0_39] : memref<1x128xf32, #tpu.memory_space<vmem>>, vector<1x128xf32>
    %cst_40 = arith.constant dense<0.000000e+00> : vector<32xf32>
    %94 = vector.multi_reduction <add>, %83, %cst_40 [1] : vector<32x128xf32> to vector<32xf32>
    %95 = vector.shape_cast %94 : vector<32xf32> to vector<32x1xf32>
    %cst_41 = arith.constant 1.280000e+02 : f32
    %96 = vector.broadcast %cst_41 : f32 to vector<32x1xf32>
    %97 = arith.divf %95, %96 : vector<32x1xf32>
    %98 = vector.broadcast %97 : vector<32x1xf32> to vector<32x128xf32>
    %99 = arith.subf %83, %98 : vector<32x128xf32>
    %100 = arith.mulf %99, %99 : vector<32x128xf32>
    %cst_42 = arith.constant dense<0.000000e+00> : vector<32xf32>
    %101 = vector.multi_reduction <add>, %100, %cst_42 [1] : vector<32x128xf32> to vector<32xf32>
    %102 = vector.shape_cast %101 : vector<32xf32> to vector<32x1xf32>
    %cst_43 = arith.constant 1.280000e+02 : f32
    %103 = vector.broadcast %cst_43 : f32 to vector<32x1xf32>
    %104 = arith.divf %102, %103 : vector<32x1xf32>
    %105 = vector.broadcast %97 : vector<32x1xf32> to vector<32x128xf32>
    %106 = arith.subf %83, %105 : vector<32x128xf32>
    %cst_44 = arith.constant 9.99999974E-6 : f32
    %107 = vector.broadcast %cst_44 : f32 to vector<32x1xf32>
    %108 = arith.addf %104, %107 : vector<32x1xf32>
    %109 = math.rsqrt %108 : vector<32x1xf32>
    %110 = vector.broadcast %109 : vector<32x1xf32> to vector<32x128xf32>
    %111 = arith.mulf %106, %110 : vector<32x128xf32>
    %112 = vector.broadcast %92 : vector<1x128xf32> to vector<32x128xf32>
    %113 = arith.mulf %111, %112 : vector<32x128xf32>
    %114 = vector.broadcast %93 : vector<1x128xf32> to vector<32x128xf32>
    %115 = arith.addf %113, %114 : vector<32x128xf32>
    %116 = arith.mulf %90, %115 : vector<32x128xf32>
    %117 = arith.addf %116, %91 : vector<32x128xf32>
    %118 = arith.truncf %117 : vector<32x128xf32> to vector<32x128xbf16>
    %c0_45 = arith.constant 0 : index
    %c0_46 = arith.constant 0 : index
    %119 = vector.load %arg15[%c0_45, %c0_46] : memref<128x512xbf16, #tpu.memory_space<vmem>>, vector<128x512xbf16>
    %cst_47 = arith.constant dense<0.000000e+00> : vector<32x512xf32>
    %120 = tpu.matmul %118, %119, %cst_47 {dimension_numbers = #tpu.dot_dimension_numbers<[1], [0], [0], [1], [0, 0, 1, 1], [], []>} : vector<32x128xbf16>, vector<128x512xbf16>, vector<32x512xf32> -> vector<32x512xf32>
    %c0_48 = arith.constant 0 : index
    %c0_49 = arith.constant 0 : index
    %121 = vector.load %arg16[%c0_48, %c0_49] : memref<1x512xf32, #tpu.memory_space<vmem>>, vector<1x512xf32>
    %122 = vector.broadcast %121 : vector<1x512xf32> to vector<32x512xf32>
    %123 = arith.addf %120, %122 : vector<32x512xf32>
    %124 = arith.mulf %123, %123 : vector<32x512xf32>
    %125 = arith.mulf %123, %124 : vector<32x512xf32>
    %cst_50 = arith.constant 4.471500e-02 : f32
    %126 = vector.broadcast %cst_50 : f32 to vector<32x512xf32>
    %127 = arith.mulf %126, %125 : vector<32x512xf32>
    %128 = arith.addf %123, %127 : vector<32x512xf32>
    %cst_51 = arith.constant 0.797884583 : f32
    %129 = vector.broadcast %cst_51 : f32 to vector<32x512xf32>
    %130 = arith.mulf %129, %128 : vector<32x512xf32>
    %131 = math.tanh %130 : vector<32x512xf32>
    %cst_52 = arith.constant 1.000000e+00 : f32
    %132 = vector.broadcast %cst_52 : f32 to vector<32x512xf32>
    %133 = arith.addf %132, %131 : vector<32x512xf32>
    %cst_53 = arith.constant 5.000000e-01 : f32
    %134 = vector.broadcast %cst_53 : f32 to vector<32x512xf32>
    %135 = arith.mulf %134, %133 : vector<32x512xf32>
    %136 = arith.mulf %123, %135 : vector<32x512xf32>
    %137 = arith.truncf %136 : vector<32x512xf32> to vector<32x512xbf16>
    %c0_54 = arith.constant 0 : index
    %c0_55 = arith.constant 0 : index
    %138 = vector.load %arg17[%c0_54, %c0_55] : memref<512x128xbf16, #tpu.memory_space<vmem>>, vector<512x128xbf16>
    %cst_56 = arith.constant dense<0.000000e+00> : vector<32x128xf32>
    %139 = tpu.matmul %137, %138, %cst_56 {dimension_numbers = #tpu.dot_dimension_numbers<[1], [0], [0], [1], [0, 0, 1, 1], [], []>} : vector<32x512xbf16>, vector<512x128xbf16>, vector<32x128xf32> -> vector<32x128xf32>
    %c0_57 = arith.constant 0 : index
    %c0_58 = arith.constant 0 : index
    %140 = vector.load %arg18[%c0_57, %c0_58] : memref<1x128xf32, #tpu.memory_space<vmem>>, vector<1x128xf32>
    %141 = vector.broadcast %140 : vector<1x128xf32> to vector<32x128xf32>
    %142 = arith.addf %139, %141 : vector<32x128xf32>
    %143 = arith.mulf %89, %142 : vector<32x128xf32>
    %144 = arith.addf %83, %143 : vector<32x128xf32>
    %c0_59 = arith.constant 0 : index
    %c0_60 = arith.constant 0 : index
    %145 = vector.load %arg19[%c0_59, %c0_60] : memref<32x128xf32, #tpu.memory_space<vmem>>, vector<32x128xf32>
    tpu.vector_store %arg19[%c0_59, %c0_60], %144 {strides = array<i32>} : memref<32x128xf32, #tpu.memory_space<vmem>>, vector<32x128xf32>,
    return
  }
  func.func @transform_0(%arg0: i32) -> (i32, i32) {
    %c0_i32 = arith.constant 0 : i32
    %c0_i32_0 = arith.constant 0 : i32
    return %arg0, %c0_i32 : i32, i32
  }
  func.func @transform_1(%arg0: i32) -> (i32, i32) {
    %c0_i32 = arith.constant 0 : i32
    %c0_i32_0 = arith.constant 0 : i32
    return %arg0, %c0_i32 : i32, i32
  }
  func.func @transform_2(%arg0: i32) -> (i32, i32) {
    %c0_i32 = arith.constant 0 : i32
    %c0_i32_0 = arith.constant 0 : i32
    %c0_i32_1 = arith.constant 0 : i32
    return %c0_i32, %c0_i32_0 : i32, i32
  }
  func.func @transform_3(%arg0: i32) -> (i32, i32) {
    %c0_i32 = arith.constant 0 : i32
    %c0_i32_0 = arith.constant 0 : i32
    %c0_i32_1 = arith.constant 0 : i32
    return %c0_i32, %c0_i32_0 : i32, i32
  }
  func.func @transform_4(%arg0: i32) -> (i32, i32) {
    %c0_i32 = arith.constant 0 : i32
    %c0_i32_0 = arith.constant 0 : i32
    %c0_i32_1 = arith.constant 0 : i32
    return %c0_i32, %c0_i32_0 : i32, i32
  }
  func.func @transform_5(%arg0: i32) -> (i32, i32) {
    %c0_i32 = arith.constant 0 : i32
    %c0_i32_0 = arith.constant 0 : i32
    %c0_i32_1 = arith.constant 0 : i32
    return %c0_i32, %c0_i32_0 : i32, i32
  }
  func.func @transform_6(%arg0: i32) -> (i32, i32) {
    %c0_i32 = arith.constant 0 : i32
    %c0_i32_0 = arith.constant 0 : i32
    %c0_i32_1 = arith.constant 0 : i32
    return %c0_i32, %c0_i32_0 : i32, i32
  }
  func.func @transform_7(%arg0: i32) -> (i32, i32) {
    %c0_i32 = arith.constant 0 : i32
    %c0_i32_0 = arith.constant 0 : i32
    %c0_i32_1 = arith.constant 0 : i32
    return %c0_i32, %c0_i32_0 : i32, i32
  }
  func.func @transform_8(%arg0: i32) -> (i32, i32) {
    %c0_i32 = arith.constant 0 : i32
    %c0_i32_0 = arith.constant 0 : i32
    %c0_i32_1 = arith.constant 0 : i32
    return %c0_i32, %c0_i32_0 : i32, i32
  }
  func.func @transform_9(%arg0: i32) -> (i32, i32) {
    %c0_i32 = arith.constant 0 : i32
    %c0_i32_0 = arith.constant 0 : i32
    %c0_i32_1 = arith.constant 0 : i32
    return %c0_i32, %c0_i32_0 : i32, i32
  }
  func.func @transform_10(%arg0: i32) -> (i32, i32) {
    %c0_i32 = arith.constant 0 : i32
    %c0_i32_0 = arith.constant 0 : i32
    %c0_i32_1 = arith.constant 0 : i32
    return %c0_i32, %c0_i32_0 : i32, i32
  }
  func.func @transform_11(%arg0: i32) -> (i32, i32) {
    %c0_i32 = arith.constant 0 : i32
    %c0_i32_0 = arith.constant 0 : i32
    %c0_i32_1 = arith.constant 0 : i32
    return %c0_i32, %c0_i32_0 : i32, i32
  }
  func.func @transform_12(%arg0: i32) -> (i32, i32) {
    %c0_i32 = arith.constant 0 : i32
    %c0_i32_0 = arith.constant 0 : i32
    %c0_i32_1 = arith.constant 0 : i32
    return %c0_i32, %c0_i32_0 : i32, i32
  }
  func.func @transform_13(%arg0: i32) -> (i32, i32) {
    %c0_i32 = arith.constant 0 : i32
    %c0_i32_0 = arith.constant 0 : i32
    %c0_i32_1 = arith.constant 0 : i32
    return %c0_i32, %c0_i32_0 : i32, i32
  }
  func.func @transform_14(%arg0: i32) -> (i32, i32) {
    %c0_i32 = arith.constant 0 : i32
    %c0_i32_0 = arith.constant 0 : i32
    %c0_i32_1 = arith.constant 0 : i32
    return %c0_i32, %c0_i32_0 : i32, i32
  }
  func.func @transform_15(%arg0: i32) -> (i32, i32) {
    %c0_i32 = arith.constant 0 : i32
    %c0_i32_0 = arith.constant 0 : i32
    %c0_i32_1 = arith.constant 0 : i32
    return %c0_i32, %c0_i32_0 : i32, i32
  }
  func.func @transform_16(%arg0: i32) -> (i32, i32) {
    %c0_i32 = arith.constant 0 : i32
    %c0_i32_0 = arith.constant 0 : i32
    %c0_i32_1 = arith.constant 0 : i32
    return %c0_i32, %c0_i32_0 : i32, i32
  }
  func.func @transform_17(%arg0: i32) -> (i32, i32) {
    %c0_i32 = arith.constant 0 : i32
    %c0_i32_0 = arith.constant 0 : i32
    %c0_i32_1 = arith.constant 0 : i32
    return %c0_i32, %c0_i32_0 : i32, i32
  }
  func.func @transform_18(%arg0: i32) -> (i32, i32) {
    %c0_i32 = arith.constant 0 : i32
    %c0_i32_0 = arith.constant 0 : i32
    return %arg0, %c0_i32 : i32, i32
  }
}

</mosaic_0001>

<bundles_post_ra>
// kernel: tpu_custom_call.1
= control target key start
LH: loop header
LB: loop body
LE: loop exit
PB: predicated region body
PF: predicated region fallthrough
CT: control target
= control target key end

     0   :  { %s7108_s0 = inlined_call_operand.hbm [shape: f32[32,128], index: 0, kind: input, shape index: {}]   ;;  %s7109_s1 = inlined_call_operand.hbm [shape: f32[32,128], index: 1, kind: input, shape index: {}]   ;;  %s7110_s2 = inlined_call_operand.hbm [shape: bf16[128,384], index: 2, kind: input, shape index: {}]   ;;  %s7111_s3 = inlined_call_operand.vmem [shape: f32[1,384], index: 3, kind: input, shape index: {}]   ;;  %s7112_s4 = inlined_call_operand.hbm [shape: bf16[128,384], index: 4, kind: input, shape index: {}]   ;;  %s7113_s5 = inlined_call_operand.vmem [shape: f32[1,384], index: 5, kind: input, shape index: {}]   ;;  %s7114_s6 = inlined_call_operand.vmem [shape: f32[1,128], index: 6, kind: input, shape index: {}]   ;;  %s7115_s7 = inlined_call_operand.vmem [shape: f32[1,128], index: 7, kind: input, shape index: {}]   ;;  %s7116_s8 = inlined_call_operand.vmem [shape: f32[1,128], index: 8, kind: input, shape index: {}]   ;;  %s7117_s9 = inlined_call_operand.vmem [shape: f32[1,128], index: 9, kind: input, shape index: {}]   ;;  %s7118_s10 = inlined_call_operand.hbm [shape: bf16[128,256], index: 10, kind: input, shape index: {}]   ;;  %s7119_s11 = inlined_call_operand.vmem [shape: f32[1,256], index: 11, kind: input, shape index: {}]   ;;  %s7120_s12 = inlined_call_operand.hbm [shape: bf16[128,128], index: 12, kind: input, shape index: {}]   ;;  %s7121_s13 = inlined_call_operand.vmem [shape: f32[1,128], index: 13, kind: input, shape index: {}]   ;;  %s7122_s14 = inlined_call_operand.hbm [shape: bf16[128,512], index: 14, kind: input, shape index: {}]   ;;  %s7123_s15 = inlined_call_operand.vmem [shape: f32[1,512], index: 15, kind: input, shape index: {}]   ;;  %s7124_s16 = inlined_call_operand.hbm [shape: bf16[512,128], index: 16, kind: input, shape index: {}]   ;;  %s7125_s17 = inlined_call_operand.vmem [shape: f32[1,128], index: 17, kind: input, shape index: {}]   ;;  %s7126_s18 = inlined_call_operand.hbm [shape: f32[32,128], index: 18, kind: output, shape index: {}]  }
   0x1   :  { %7142 = sst [smem:[#allocation23_spill]] %s7108_s0 }
   0x2   :  { %7143 = sst [smem:[#allocation24_spill]] %s7109_s1 }
   0x3   :  { %7144 = sst [smem:[#allocation25_spill]] %s7110_s2 }
   0x4   :  { %7145 = sst [smem:[#allocation26_spill]] %s7125_s17 }
   0x5   :  { %7146 = sst [smem:[#allocation27_spill]] %s7126_s18 }
   0x6   :  { %23 = vsyncpa [#allocation3], 0 }
   0x7   :  { %24 = vsyncpa [#allocation6], 0 }
   0x8   :  { %25 = vsyncpa [#allocation9], 0 }
   0x9   :  { %26 = vsyncpa [#allocation12], 0 }
   0xa   :  { %27 = vsyncpa [#allocation15], 0 }
   0xb   :  { %28 = vsyncpa [#allocation4], 0  ;;  %s5831_s27 = smov [#allocation5]   ;;  %s7147_s0 = sld [smem:[#allocation24_spill]] }
   0xc   :  { %s46_s28 = sshll.u32 %s5831_s27, 4  ;;  %s47_s28 = int_to_ptr.vmem [resolvable:$true] %s46_s28 }
  0x11   :  { %s5621_s19 = scalar_lea.hbm %s7147_s0, 512 }
  0x12   :  { %p5622_p0 = scmp.ne.s32.totalorder %s7147_s0, %s5621_s19  ;;  %p5625_p1 = scmp.lt.u32.totalorder %s5621_s19, %s7147_s0 }
  0x14   :  { %p5627_p2 = pnand %p5625_p1, %p5622_p0 }
  0x16   :  { %5630 = shalt.err (!%p5627_p2)
}
  0x17   :  { %s5631_s2 = scalar_lea.vmem %s47_s28, 512  ;;  %p5636_p4 = scmp.lt.s32.totalorder %s47_s28, %s47_s28 }
  0x18   :  { %p5632_p3 = scmp.ne.s32.totalorder %s47_s28, %s5631_s2  ;;  %p5637_p5 = scmp.lt.s32.totalorder %s5631_s2, %s5631_s2 }
  0x1a   :  { %p5638_p6 = por %p5637_p5, %p5636_p4 }
  0x1c   :  { %p5639_p7 = pnand %p5638_p6, %p5632_p3 }
  0x1e   :  { %5642 = shalt.err (!%p5639_p7)
}
  0x1f   :  { %s7133_s23 = smov 128   ;;  %s5833_s24 = smov 8  }
  0x20   :  { %52 = dma.hbm_to_vmem [thread:$0]  %s7147_s0, 512, %s47_s28, [#allocation6], %s7133_s23, %s7133_s23, %s5833_s24  }
  0x21   :  { %s5834_s27 = smov [#allocation8]   ;;  %s5835_s30 = smov [#allocation11]  }
  0x22   :  { %s72_s29 = sshll.u32 %s5834_s27, 4  ;;  %s108_s19 = sshll.u32 %s5835_s30, 4  ;;  %s73_s29 = int_to_ptr.vmem [resolvable:$true] %s72_s29  ;;  %s109_s19 = int_to_ptr.vmem [resolvable:$true] %s108_s19 }
  0x23   :  { %s5643_s21 = scalar_lea.hbm %s7112_s4, 3072 }
  0x24   :  { %p5644_p8 = scmp.ne.s32.totalorder %s7112_s4, %s5643_s21  ;;  %p5647_p9 = scmp.lt.u32.totalorder %s5643_s21, %s7112_s4 }
  0x26   :  { %p5649_p10 = pnand %p5647_p9, %p5644_p8 }
  0x28   :  { %5652 = shalt.err (!%p5649_p10)
}
  0x29   :  { %s5653_s28 = scalar_lea.vmem %s73_s29, 3072  ;;  %p5658_p12 = scmp.lt.s32.totalorder %s73_s29, %s73_s29 }
  0x2a   :  { %p5654_p11 = scmp.ne.s32.totalorder %s73_s29, %s5653_s28  ;;  %p5659_p13 = scmp.lt.s32.totalorder %s5653_s28, %s5653_s28 }
  0x2c   :  { %p5660_p0 = por %p5659_p13, %p5658_p12 }
  0x2e   :  { %p5661_p1 = pnand %p5660_p0, %p5654_p11 }
  0x30   :  { %5664 = shalt.err (!%p5661_p1)
}
  0x31   :  { %s7131_s0 = smov 192   ;;  %s7132_s25 = smov 12  }
  0x32   :  { %78 = dma.hbm_to_vmem [thread:$0]  %s7112_s4, 3072, %s73_s29, [#allocation9], %s7131_s0, %s7131_s0, %s7132_s25  }
  0x33   :  { %s5665_s30 = scalar_lea.hbm %s7120_s12, 1024 }
  0x34   :  { %p5666_p2 = scmp.ne.s32.totalorder %s7120_s12, %s5665_s30  ;;  %p5669_p3 = scmp.lt.u32.totalorder %s5665_s30, %s7120_s12 }
  0x36   :  { %p5671_p4 = pnand %p5669_p3, %p5666_p2 }
  0x38   :  { %5674 = shalt.err (!%p5671_p4)
}
  0x39   :  { %s5675_s2 = scalar_lea.vmem %s109_s19, 1024  ;;  %p5680_p6 = scmp.lt.s32.totalorder %s109_s19, %s109_s19 }
  0x3a   :  { %p5676_p5 = scmp.ne.s32.totalorder %s109_s19, %s5675_s2  ;;  %p5681_p7 = scmp.lt.s32.totalorder %s5675_s2, %s5675_s2 }
  0x3c   :  { %p5682_p8 = por %p5681_p7, %p5680_p6 }
  0x3e   :  { %p5683_p9 = pnand %p5682_p8, %p5676_p5 }
  0x40   :  { %5686 = shalt.err (!%p5683_p9)
}
  0x41   :  { %s7135_s4 = smov 64   ;;  %s7137_s29 = smov 4  }
  0x42   :  { %114 = dma.hbm_to_vmem [thread:$0]  %s7120_s12, 1024, %s109_s19, [#allocation12], %s7135_s4, %s7135_s4, %s7137_s29  }
  0x43   :  { %s5840_s27 = smov [#allocation2]   ;;  %s5841_s18 = smov [#allocation7]  }
  0x44   :  { %s34_s17 = sshll.u32 %s5840_s27, 4  ;;  %s58_s30 = sshll.u32 %s5841_s18, 4  ;;  %s35_s17 = int_to_ptr.vmem [resolvable:$true] %s34_s17  ;;  %s59_s30 = int_to_ptr.vmem [resolvable:$true] %s58_s30 }
  0x45   :  { %s7148_s21 = sld [smem:[#allocation23_spill]] }
  0x4b   :  { %s5687_s22 = scalar_lea.hbm %s7148_s21, 512 }
  0x4c   :  { %p5688_p10 = scmp.ne.s32.totalorder %s7148_s21, %s5687_s22  ;;  %p5691_p11 = scmp.lt.u32.totalorder %s5687_s22, %s7148_s21 }
  0x4e   :  { %p5693_p12 = pnand %p5691_p11, %p5688_p10 }
  0x50   :  { %5696 = shalt.err (!%p5693_p12)
}
  0x51   :  { %s5697_s12 = scalar_lea.vmem %s35_s17, 512  ;;  %p5702_p0 = scmp.lt.s32.totalorder %s35_s17, %s35_s17 }
  0x52   :  { %p5698_p13 = scmp.ne.s32.totalorder %s35_s17, %s5697_s12  ;;  %p5703_p1 = scmp.lt.s32.totalorder %s5697_s12, %s5697_s12 }
  0x54   :  { %p5704_p2 = por %p5703_p1, %p5702_p0 }
  0x56   :  { %p5705_p3 = pnand %p5704_p2, %p5698_p13 }
  0x58   :  { %5708 = shalt.err (!%p5705_p3)
}
  0x59   :  { %s7149_s19 = smov 128   ;;  %s7150_s25 = sld [smem:[#allocation25_spill]] }
  0x5a   :  { %40 = dma.hbm_to_vmem [thread:$0]  %s7148_s21, 512, %s35_s17, [#allocation3], %s7149_s19, %s7149_s19, %s5833_s24  }
  0x5f   :  { %s5709_s27 = scalar_lea.hbm %s7150_s25, 3072 }
  0x60   :  { %p5710_p4 = scmp.ne.s32.totalorder %s7150_s25, %s5709_s27  ;;  %p5713_p5 = scmp.lt.u32.totalorder %s5709_s27, %s7150_s25 }
  0x62   :  { %p5715_p6 = pnand %p5713_p5, %p5710_p4 }
  0x64   :  { %5718 = shalt.err (!%p5715_p6)
}
  0x65   :  { %s5719_s2 = scalar_lea.vmem %s59_s30, 3072  ;;  %p5724_p8 = scmp.lt.s32.totalorder %s59_s30, %s59_s30 }
  0x66   :  { %p5720_p7 = scmp.ne.s32.totalorder %s59_s30, %s5719_s2  ;;  %p5725_p9 = scmp.lt.s32.totalorder %s5719_s2, %s5719_s2 }
  0x68   :  { %p5726_p10 = por %p5725_p9, %p5724_p8 }
  0x6a   :  { %p5727_p11 = pnand %p5726_p10, %p5720_p7 }
  0x6c   :  { %5730 = shalt.err (!%p5727_p11)
}
  0x6d   :  { %s7151_s17 = smov 12   ;;  %s7152_s21 = smov 192  }
  0x6e   :  { %64 = dma.hbm_to_vmem [thread:$0]  %s7150_s25, 3072, %s59_s30, [#allocation6], %s7152_s21, %s7152_s21, %s7151_s17  }
  0x6f   :  { %s5842_s26 = smov [#allocation10]   ;;  %s5843_s23 = smov [#allocation13]  }
  0x70   :  { %s94_s0 = sshll.u32 %s5842_s26, 4  ;;  %s122_s27 = sshll.u32 %s5843_s23, 4  ;;  %s95_s0 = int_to_ptr.vmem [resolvable:$true] %s94_s0  ;;  %s123_s27 = int_to_ptr.vmem [resolvable:$true] %s122_s27 }
  0x71   :  { %s5731_s20 = scalar_lea.hbm %s7118_s10, 2048 }
  0x72   :  { %p5732_p12 = scmp.ne.s32.totalorder %s7118_s10, %s5731_s20  ;;  %p5735_p13 = scmp.lt.u32.totalorder %s5731_s20, %s7118_s10 }
  0x74   :  { %p5737_p0 = pnand %p5735_p13, %p5732_p12 }
  0x76   :  { %5740 = shalt.err (!%p5737_p0)
}
  0x77   :  { %s5741_s30 = scalar_lea.vmem %s95_s0, 2048  ;;  %p5746_p2 = scmp.lt.s32.totalorder %s95_s0, %s95_s0 }
  0x78   :  { %p5742_p1 = scmp.ne.s32.totalorder %s95_s0, %s5741_s30  ;;  %p5747_p3 = scmp.lt.s32.totalorder %s5741_s30, %s5741_s30 }
  0x7a   :  { %p5748_p4 = por %p5747_p3, %p5746_p2 }
  0x7c   :  { %p5749_p5 = pnand %p5748_p4, %p5742_p1 }
  0x7e   :  { %5752 = shalt.err (!%p5749_p5)
}
  0x7f   :  { %100 = dma.hbm_to_vmem [thread:$0]  %s7118_s10, 2048, %s95_s0, [#allocation9], %s7149_s19, %s7149_s19, %s5833_s24  }
  0x80   :  { %s5753_s29 = scalar_lea.hbm %s7122_s14, 4096 }
  0x81   :  { %p5754_p6 = scmp.ne.s32.totalorder %s7122_s14, %s5753_s29  ;;  %p5757_p7 = scmp.lt.u32.totalorder %s5753_s29, %s7122_s14 }
  0x83   :  { %p5759_p8 = pnand %p5757_p7, %p5754_p6 }
  0x85   :  { %5762 = shalt.err (!%p5759_p8)
}
  0x86   :  { %s5763_s18 = scalar_lea.vmem %s123_s27, 4096  ;;  %p5768_p10 = scmp.lt.s32.totalorder %s123_s27, %s123_s27 }
  0x87   :  { %p5764_p9 = scmp.ne.s32.totalorder %s123_s27, %s5763_s18  ;;  %p5769_p11 = scmp.lt.s32.totalorder %s5763_s18, %s5763_s18 }
  0x89   :  { %p5770_p12 = por %p5769_p11, %p5768_p10 }
  0x8b   :  { %p5771_p13 = pnand %p5770_p12, %p5764_p9 }
  0x8d   :  { %5774 = shalt.err (!%p5771_p13)
}
  0x8e   :  { %s5844_s10 = smov 256   ;;  %s5845_s0 = smov 16  }
  0x8f   :  { %128 = dma.hbm_to_vmem [thread:$0]  %s7122_s14, 4096, %s123_s27, [#allocation12], %s5844_s10, %s5844_s10, %s5845_s0  }
  0x90   :  { %s5846_s22 = smov [#allocation14]   ;;  %s5775_s17 = scalar_lea.hbm %s7124_s16, 4096 }
  0x91   :  { %s136_s2 = sshll.u32 %s5846_s22, 4  ;;  %p5776_p0 = scmp.ne.s32.totalorder %s7124_s16, %s5775_s17  ;;  %s137_s2 = int_to_ptr.vmem [resolvable:$true] %s136_s2 }
  0x92   :  { %p5779_p1 = scmp.lt.u32.totalorder %s5775_s17, %s7124_s16 }
  0x94   :  { %p5781_p2 = pnand %p5779_p1, %p5776_p0 }
  0x96   :  { %5784 = shalt.err (!%p5781_p2)
}
  0x97   :  { %s5785_s28 = scalar_lea.vmem %s137_s2, 4096  ;;  %p5790_p4 = scmp.lt.s32.totalorder %s137_s2, %s137_s2 }
  0x98   :  { %p5786_p3 = scmp.ne.s32.totalorder %s137_s2, %s5785_s28  ;;  %p5791_p5 = scmp.lt.s32.totalorder %s5785_s28, %s5785_s28 }
  0x9a   :  { %p5792_p6 = por %p5791_p5, %p5790_p4 }
  0x9c   :  { %p5793_p7 = pnand %p5792_p6, %p5786_p3 }
  0x9e   :  { %5796 = shalt.err (!%p5793_p7)
}
  0x9f   :  { %s7153_s14 = smov 4   ;;  %s7154_s27 = smov 64  }
  0xa0   :  { %142 = dma.hbm_to_vmem [thread:$0]  %s7124_s16, 4096, %s137_s2, [#allocation15], %s7154_s27, %s7154_s27, %s7153_s14  }
  0xa1   :  { %5819 = dma.done.wait [#allocation3], 512  }
  0xa2   :  { %5820 = vsyncadd [#allocation3], 4294966784 }
  0xa3   :  { %5821 = dma.done.wait [#allocation6], 3584  }
  0xa4   :  { %5822 = vsyncadd [#allocation6], 4294963712 }
  0xa5   :  { %5823 = dma.done.wait [#allocation9], 5120  }
  0xa6   :  { %5824 = vsyncadd [#allocation9], 4294962176 }
  0xa7   :  { %5825 = dma.done.wait [#allocation12], 5120  }
  0xa8   :  { %5826 = vsyncadd [#allocation12], 4294962176 }
  0xa9   :  { %5827 = dma.done.wait [#allocation15], 4096  }
  0xaa   :  { %5828 = vsyncadd [#allocation15], 4294963200  ;;  %v7138_v0 = vmov 0   ;;  %v6067_v1 = vld [vmem:[#allocation2] sm:$0xff]  ;;  %v6069_v2 = vld [vmem:[#allocation2 + $0x10] sm:$0xff]  ;;  %s5848_s20 = smov 96  }
  0xab   :  { %389 = vmatprep.mubr.bf16.mxu0 %v7138_v0  ;;  %v6071_v3 = vld [vmem:[#allocation2 + $0x8] sm:$0xff]  ;;  %461 = vadd.xlane.f32.xlu0 %v6067_v1  ;;  %v6075_v4 = vld [vmem:[#allocation2 + $0x18] sm:$0xff]  ;;  %v5329_v5 = vld [vmem:[#allocation7 + $0x4] ss:$12 sps:$4 sm:$0xff]   ;;  %vm2265_vm0 = vcmask 261120   ;;  %vm2498_vm1 = vcmask 130048  }
  0xac   :  { %465 = vadd.xlane.f32.xlu1 %v6069_v2  ;;  %v5331_v6 = vld [vmem:[#allocation7] ss:$12 sps:$4 sm:$0xff]   ;;  %v5332_v7 = vld [vmem:[#allocation7 + $0x1c] ss:$12 sps:$4 sm:$0xff]   ;;  %357 = vmatprep.subr.bf16.mxu0 %v5329_v5  ;;  %v5334_v9 = vld [vmem:[#allocation7 + $0x18] ss:$12 sps:$4 sm:$0xff]  }
  0xad   :  { %v5335_v8 = vld [vmem:[#allocation7 + $0x8] ss:$12 sps:$4 sm:$0xff]   ;;  %358 = vmatpush1.bf16.msra.mxu0 %v5331_v6  ;;  %v5339_v11 = vld [vmem:[#allocation7 + $0x20] ss:$12 sps:$4 sm:$0xff]   ;;  %v5343_v12 = vld [vmem:[#allocation7 + $0x38] ss:$12 sps:$4 sm:$0xff]  }
  0xae   :  { %5164 = vmatprep.subr.bf16.mxu1 %v5335_v8  ;;  %v5336_v10 = vld [vmem:[#allocation7 + $0x34] ss:$12 sps:$4 sm:$0xff]   ;;  %359 = vmatprep.subr.bf16.mxu0 %v5332_v7  ;;  %v5338_v13 = vld [vmem:[#allocation7 + $0x30] ss:$12 sps:$4 sm:$0xff]   ;;  %v5340_v14 = vld [vmem:[#allocation7 + $0x4c] ss:$12 sps:$4 sm:$0xff]  }
  0xaf   :  { %463 = vadd.xlane.f32.xlu0 %v6071_v3  ;;  %5165 = vmatpush3.bf16.msra.mxu1 %v5335_v8  ;;  %v5347_v15 = vld [vmem:[#allocation7 + $0x50] ss:$12 sps:$4 sm:$0xff]   ;;  %v5342_v16 = vld [vmem:[#allocation7 + $0x48] ss:$12 sps:$4 sm:$0xff]   ;;  %v5346_v19 = vld [vmem:[#allocation7 + $0x60] ss:$12 sps:$4 sm:$0xff]  }
  0xb0   :  { %467 = vadd.xlane.f32.xlu1 %v6075_v4  ;;  %5166 = vmatprep.subr.bf16.mxu1 %v5339_v11  ;;  %v5344_v17 = vld [vmem:[#allocation7 + $0x64] ss:$12 sps:$4 sm:$0xff]   ;;  %v5351_v18 = vld [vmem:[#allocation7 + $0x68] ss:$12 sps:$4 sm:$0xff]   ;;  %v5355_v24 = vld [vmem:[#allocation7 + $0x80] ss:$12 sps:$4 sm:$0xff]  }
  0xb1   :  { %360 = vmatpush1.bf16.msra.mxu0 %v5334_v9  ;;  %v5348_v20 = vld [vmem:[#allocation7 + $0x7c] ss:$12 sps:$4 sm:$0xff]   ;;  %v174_v21 = vld [vmem:[#allocation5] sm:$0xff]  ;;  %v5356_v29 = vld [vmem:[#allocation7 + $0xac] ss:$12 sps:$4 sm:$0xff]   ;;  %vm3503_vm2 = vcmask 523264  }
  0xb2   :  { %361 = vmatprep.subr.bf16.mxu0 %v5336_v10  ;;  %v175_v22 = vld [vmem:[#allocation5 + $0x8] sm:$0xff]  ;;  %v5350_v23 = vld [vmem:[#allocation7 + $0x78] ss:$12 sps:$4 sm:$0xff]   ;;  %v5352_v26 = vld [vmem:[#allocation7 + $0x94] ss:$12 sps:$4 sm:$0xff]   ;;  %vm3508_vm3 = vcmask 785408  }
  0xb3   :  { %5167 = vmatpush3.bf16.msra.mxu1 %v5339_v11  ;;  %v6079_v25 = vpack.c.bf16 %v175_v22, %v174_v21  ;;  %v5359_v27 = vld [vmem:[#allocation7 + $0x98] ss:$12 sps:$4 sm:$0xff]   ;;  %v5354_v28 = vld [vmem:[#allocation7 + $0x90] ss:$12 sps:$4 sm:$0xff]   ;;  %v5358_v31 = vld [vmem:[#allocation7 + $0xa8] ss:$12 sps:$4 sm:$0xff]  }
  0xb4   :  { %5168 = vmatprep.subr.bf16.mxu1 %v5343_v12  ;;  %v5360_v30 = vld [vmem:[#allocation7 + $0xb0] ss:$12 sps:$4 sm:$0xff]   ;;  %v5363_v34 = vld [vmem:[#allocation10 + $0x4] ss:$8 sps:$4 sm:$0xff]   ;;  %v5361_v35 = vld [vmem:[#allocation10] ss:$8 sps:$4 sm:$0xff]  }
  0xb5   :  { %362 = vmatpush1.bf16.msra.mxu0 %v5338_v13  ;;  %5180 = vmatprep.mubr.bf16.mxu1 %v6079_v25  ;;  %v176_v32 = vld [vmem:[#allocation5 + $0x10] sm:$0xff]  ;;  %v177_v33 = vld [vmem:[#allocation5 + $0x18] sm:$0xff]  ;;  %v5369_v55 = vld [vmem:[#allocation10 + $0x24] ss:$8 sps:$4 sm:$0xff]   ;;  %s7157_s29 = sld [smem:[#allocation26_spill]]  ;;  %s5853_s12 = smov [#allocation16]  }
  0xb6   :  { %363 = vmatprep.subr.bf16.mxu0 %v5340_v14  ;;  %v6082_v36 = vpack.c.bf16 %v177_v33, %v176_v32  ;;  %v5366_v53 = vld [vmem:[#allocation10 + $0x14] ss:$8 sps:$4 sm:$0xff]   ;;  %v5364_v54 = vld [vmem:[#allocation10 + $0x10] ss:$8 sps:$4 sm:$0xff]   ;;  %v5367_v56 = vld [vmem:[#allocation10 + $0x20] ss:$8 sps:$4 sm:$0xff]  }
  0xb7   :  { %5169 = vmatpush3.bf16.msra.mxu1 %v5343_v12  ;;  %v5372_v57 = vld [vmem:[#allocation10 + $0x34] ss:$8 sps:$4 sm:$0xff]   ;;  %v5370_v58 = vld [vmem:[#allocation10 + $0x30] ss:$8 sps:$4 sm:$0xff]   ;;  %v5375_v59 = vld [vmem:[#allocation10 + $0x44] ss:$8 sps:$4 sm:$0xff]  }
  0xb8   :  { %5170 = vmatprep.subr.bf16.mxu1 %v5347_v15  ;;  %v5373_v60 = vld [vmem:[#allocation10 + $0x40] ss:$8 sps:$4 sm:$0xff]   ;;  %v5378_v61 = vld [vmem:[#allocation10 + $0x54] ss:$8 sps:$4 sm:$0xff]   ;;  %v5376_v62 = vld [vmem:[#allocation10 + $0x50] ss:$8 sps:$4 sm:$0xff]  }
  0xb9   :  { %364 = vmatpush1.bf16.msra.mxu0 %v5342_v16  ;;  %v5381_v63 = vld [vmem:[#allocation10 + $0x64] ss:$8 sps:$4 sm:$0xff]   ;;  %v212_v7 = vld [vmem:[%s7111_s3] sm:$0x7]  ;;  %s4848_s28 = sshll.u32 %s5853_s12, 4  ;;  %s4849_s28 = int_to_ptr.vmem [resolvable:$true] %s4848_s28 }
  0xba   :  { %365 = vmatprep.subr.bf16.mxu0 %v5344_v17  ;;  %s5797_s14 = scalar_lea.vmem %s4849_s28, 512  ;;  %p5802_p9 = scmp.lt.s32.totalorder %s4849_s28, %s4849_s28 }
  0xbb   :  { %5171 = vmatpush3.bf16.msra.mxu1 %v5347_v15  ;;  %p5798_p8 = scmp.ne.s32.totalorder %s4849_s28, %s5797_s14  ;;  %p5803_p10 = scmp.lt.s32.totalorder %s5797_s14, %s5797_s14 }
  0xbc   :  { %5172 = vmatprep.subr.bf16.mxu1 %v5351_v18 }
  0xbd   :  { %366 = vmatpush1.bf16.msra.mxu0 %v5346_v19  ;;  %p5804_p11 = por %p5803_p10, %p5802_p9 }
  0xbe   :  { %367 = vmatprep.subr.bf16.mxu0 %v5348_v20 }
  0xbf   :  { %5173 = vmatpush3.bf16.msra.mxu1 %v5351_v18  ;;  %p5805_p12 = pnand %p5804_p11, %p5798_p8 }
  0xc0   :  { %5174 = vmatprep.subr.bf16.mxu1 %v5355_v24 }
  0xc1   :  { %368 = vmatpush1.bf16.msra.mxu0 %v5350_v23 }
  0xc2   :  { %369 = vmatprep.subr.bf16.mxu0 %v5352_v26 }
  0xc3   :  { %5175 = vmatpush3.bf16.msra.mxu1 %v5355_v24 }
  0xc4   :  { %5176 = vmatprep.subr.bf16.mxu1 %v5359_v27 }
  0xc5   :  { %370 = vmatpush1.bf16.msra.mxu0 %v5354_v28 }
  0xc6   :  { %371 = vmatprep.subr.bf16.mxu0 %v5356_v29 }
  0xc7   :  { %5177 = vmatpush3.bf16.msra.mxu1 %v5359_v27 }
  0xc8   :  { %5178 = vmatprep.subr.bf16.mxu1 %v5360_v30 }
  0xc9   :  { %372 = vmatpush1.bf16.msra.mxu0 %v5358_v31 }
  0xca   :  { %644 = vmatprep.subr.bf16.mxu0 %v5363_v34 }
  0xcb   :  { %5179 = vmatpush3.bf16.msra.mxu1 %v5360_v30 }
  0xcc   :  { %390 = vmatmul.mubr.bf16.vlgmr.msra.gmra.mrb[0].mxu0 %v6079_v25 }
  0xcd   :  { %399 = vmatprep.mubr.bf16.mxu0 %v7138_v0  ;;  %645 = vmatpush1.bf16.msra.mxu0 %v5361_v35 }
  0xce   :  { %5181 = vmatmul.mubr.bf16.vlgmr.msra.gmra.mrb[0].mxu1 %v6082_v36  ;;  %646 = vmatprep.subr.bf16.mxu0 %v5366_v53 }
  0xd1   :  { %647 = vmatpush1.bf16.msra.mxu0 %v5364_v54 }
  0xd2   :  { %648 = vmatprep.subr.bf16.mxu0 %v5369_v55 }
  0xd4   :  { %400 = vmatmul.mubr.bf16.gmra.mrb[4].mxu0 %v6082_v36 }
  0xd5   :  { %676 = vmatprep.mubr.bf16.mxu0 %v7138_v0  ;;  %649 = vmatpush1.bf16.msra.mxu0 %v5367_v56 }
  0xd6   :  { %650 = vmatprep.subr.bf16.mxu0 %v5372_v57 }
  0xd9   :  { %651 = vmatpush1.bf16.msra.mxu0 %v5370_v58 }
  0xda   :  { %652 = vmatprep.subr.bf16.mxu0 %v5375_v59 }
  0xdd   :  { %653 = vmatpush1.bf16.msra.mxu0 %v5373_v60 }
  0xde   :  { %654 = vmatprep.subr.bf16.mxu0 %v5378_v61 }
  0xe1   :  { %655 = vmatpush1.bf16.msra.mxu0 %v5376_v62 }
  0xe2   :  { %656 = vmatprep.subr.bf16.mxu0 %v5381_v63 }
 0x138   :  { %v462_v37 = vpop.xlane.xlu0 %461 }
 0x139   :  { %v466_v38 = vpop.xlane.xlu1 %465  ;;  %v470_v39 = vmul.f32 0.0078125, %v462_v37 }
 0x13a   :  { %v472_v40 = vmul.f32 0.0078125, %v466_v38 }
 0x13b   :  { %v6090_v41 = vsub.f32 %v6067_v1, %v470_v39  ;;  %v5379_v1 = vld [vmem:[#allocation10 + $0x60] ss:$8 sps:$4 sm:$0xff]  }
 0x13c   :  { %v6093_v42 = vsub.f32 %v6069_v2, %v472_v40  ;;  %v464_v43 = vpop.xlane.xlu0 %463  ;;  %657 = vmatpush1.bf16.msra.mxu0 %v5379_v1  ;;  %v5384_v2 = vld [vmem:[#allocation10 + $0x74] ss:$8 sps:$4 sm:$0xff]  }
 0x13d   :  { %v468_v44 = vpop.xlane.xlu1 %467  ;;  %v471_v45 = vmul.f32 0.0078125, %v464_v43  ;;  %v478_v46 = vmul.f32 %v6090_v41, %v6090_v41  ;;  %658 = vmatprep.subr.bf16.mxu0 %v5384_v2 }
 0x13e   :  { %v473_v47 = vmul.f32 0.0078125, %v468_v44  ;;  %v480_v50 = vmul.f32 %v6093_v42, %v6093_v42 }
 0x13f   :  { %v6098_v48 = vsub.f32 %v6071_v3, %v471_v45  ;;  %482 = vadd.xlane.f32.xlu0 %v478_v46  ;;  %v5382_v3 = vld [vmem:[#allocation10 + $0x70] ss:$8 sps:$4 sm:$0xff]   ;;  %v4888_v45 = vld [vmem:[%s7114_s6] ss:$0 sm:$0xff] }
 0x140   :  { %v6101_v49 = vsub.f32 %v6075_v4, %v473_v47  ;;  %659 = vmatpush1.bf16.msra.mxu0 %v5382_v3  ;;  %v214_v4 = vlaneseq }
 0x141   :  { %v479_v51 = vmul.f32 %v6098_v48, %v6098_v48 }
 0x142   :  { %v481_v52 = vmul.f32 %v6101_v49, %v6101_v49  ;;  %v6109_v5 = vshrl.u32 %v214_v4, 7 }
 0x143   :  { %486 = vadd.xlane.f32.xlu0 %v480_v50  ;;  %484 = vadd.xlane.f32.xlu1 %v479_v51  ;;  %v4889_v50 = vld [vmem:[%s7115_s7] ss:$0 sm:$0xff] }
 0x144   :  { %v6112_v6 = vsub.s32 0, %v6109_v5  ;;  %v6127_v38 = vsub.s32 1, %v6109_v5  ;;  %v6130_v40 = vsub.s32 2, %v6109_v5 }
 0x146   :  { %v217_v8 = vrot.slane %v212_v7, %v6112_v6  ;;  %v221_v43 = vrot.slane %v212_v7, %v6127_v38  ;;  %v225_v47 = vrot.slane %v212_v7, %v6130_v40 }
 0x147   :  { %488 = vadd.xlane.f32.xlu1 %v481_v52 }
 0x19f   :  { %v391_v9 = vpop.f32.mrb[0].mxu0 }
 0x1a0   :  { %v6118_v10 = vadd.f32 %v391_v9, %v217_v8  ;;  %v393_v11 = vpop.f32.mrb[1].mxu0 }
 0x1a1   :  { %v5182_v12 = vpop.f32.mrb[0].mxu1  ;;  %v395_v13 = vpop.f32.mrb[2].mxu0  ;;  %v394_v51 = vadd.f32 %v393_v11, %v221_v43 }
 0x1a2   :  { %v444_v14 = vpop.f32.mrb[1].mxu1  ;;  %v6120_v15 = vadd.f32 %v395_v13, %v217_v8  ;;  %v397_v16 = vpop.f32.mrb[3].mxu0  ;;  %v453_v13 = vadd.f32 %v5182_v12, %v225_v47 }
 0x1a3   :  { %v5183_v17 = vpop.f32.mrb[2].mxu1  ;;  %v445_v57 = vadd.f32 %v444_v14, %v225_v47  ;;  %v398_v63 = vadd.f32 %v397_v16, %v221_v43 }
 0x1a4   :  { %v447_v18 = vpop.f32.mrb[3].mxu1 }
 0x1a7   :  { %v401_v19 = vpop.f32.mrb[4].mxu0 }
 0x1a8   :  { %v6122_v20 = vadd.f32 %v401_v19, %v217_v8  ;;  %v403_v21 = vpop.f32.mrb[5].mxu0 }
 0x1a9   :  { %v405_v22 = vpop.f32.mrb[6].mxu0 }
 0x1aa   :  { %v6124_v23 = vadd.f32 %v405_v22, %v217_v8  ;;  %v407_v24 = vpop.f32.mrb[7].mxu0  ;;  %v448_v8 = vadd.f32 %v447_v18, %v225_v47  ;;  %v456_v22 = vadd.f32 %v5183_v17, %v225_v47 }
 0x1ab   :  { %v408_v9 = vadd.f32 %v407_v24, %v221_v43 }
 0x1cc   :  { %v483_v26 = vpop.xlane.xlu0 %482 }
 0x1cd   :  { %v490_v27 = vmul.f32 0.0078125, %v483_v26 }
 0x1cf   :  { %v494_v28 = vadd.f32 1e-05, %v490_v27 }
 0x1d0   :  { %v485_v29 = vpop.xlane.xlu1 %484  ;;  %v487_v30 = vpop.xlane.xlu0 %486 }
 0x1d1   :  { %5505 = vrsqrt.f32 %v494_v28  ;;  %v491_v31 = vmul.f32 0.0078125, %v485_v29  ;;  %v492_v32 = vmul.f32 0.0078125, %v487_v30 }
 0x1d3   :  { %v495_v33 = vadd.f32 1e-05, %v491_v31  ;;  %v496_v34 = vadd.f32 1e-05, %v492_v32 }
 0x1d4   :  { %v489_v35 = vpop.xlane.xlu1 %488 }
 0x1d5   :  { %5507 = vrsqrt.f32 %v495_v33  ;;  %v493_v37 = vmul.f32 0.0078125, %v489_v35 }
 0x1d6   :  { %5509 = vrsqrt.f32 %v496_v34 }
 0x1d7   :  { %v497_v39 = vadd.f32 1e-05, %v493_v37 }
 0x1d9   :  { %5511 = vrsqrt.f32 %v497_v39 }
 0x1db   :  { %v5506_v44 = vpop.eup %5505 }
 0x1dc   :  { %v502_v46 = vmul.f32 %v5506_v44, %v6090_v41  ;;  %v404_v41 = vadd.f32 %v403_v21, %v221_v43 }
 0x1de   :  { %v512_v52 = vmul.f32 %v4888_v45, %v502_v46 }
 0x1df   :  { %v5508_v53 = vpop.eup %5507 }
 0x1e0   :  { %v5510_v54 = vpop.eup %5509  ;;  %v522_v55 = vadd.f32 %v4889_v50, %v512_v52  ;;  %v503_v56 = vmul.f32 %v5508_v53, %v6098_v48  ;;  %v5850_v53 = vmov 1983009808  }
 0x1e1   :  { %v504_v58 = vmul.f32 %v5510_v54, %v6093_v42  ;;  %v744_v54 = vunpack.c.l.s4 %v5850_v53 }
 0x1e2   :  { %v526_v59 = vmul.f32 %v522_v55, %v394_v51  ;;  %v513_v60 = vmul.f32 %v4888_v45, %v503_v56  ;;  %v5851_v56 = vmov 1934713408  }
 0x1e3   :  { %v5512_v61 = vpop.eup %5511  ;;  %v514_v62 = vmul.f32 %v4888_v45, %v504_v58  ;;  %v745_v55 = vunpack.c.0.s8 %v744_v54 }
 0x1e4   :  { %v523_v1 = vadd.f32 %v4889_v50, %v513_v60  ;;  %v530_v2 = vadd.f32 %v526_v59, %v445_v57  ;;  %v505_v3 = vmul.f32 %v5512_v61, %v6101_v49  ;;  %v552_v49 = vld [vmem:[%s7119_s11] sm:$0x3]  ;;  %s5849_s11 = smov 32   ;;  %v776_v57 = vunpack.c.l.s4 %v5851_v56 }
 0x1e5   :  { %v524_v4 = vadd.f32 %v4889_v50, %v514_v62  ;;  %v557_v18 = vrot.slane %v552_v49, %v6112_v6  ;;  %v561_v12 = vrot.slane %v552_v49, %v6127_v38  ;;  %v6199_v58 = vsub.s32 %v745_v55, %v6109_v5 }
 0x1e6   :  { %v527_v7 = vmul.f32 %v523_v1, %v398_v63  ;;  %v515_v11 = vmul.f32 %v4888_v45, %v505_v3  ;;  %v777_v59 = vunpack.c.0.s8 %v776_v57  ;;  %v7140_v60 = vmov 0.0  }
 0x1e7   :  { %v528_v48 = vmul.f32 %v524_v4, %v404_v41 }
 0x1e8   :  { %v531_v14 = vadd.f32 %v527_v7, %v448_v8  ;;  %v525_v19 = vadd.f32 %v4889_v50, %v515_v11  ;;  %v6210_v1 = vsub.s32 %v777_v59, %v6109_v5 }
 0x1e9   :  { %v532_v42 = vadd.f32 %v528_v48, %v453_v13 }
 0x1ea   :  { %v534_v26 = vpack.c.bf16 %v531_v14, %v530_v2  ;;  %v529_v27 = vmul.f32 %v525_v19, %v408_v9 }
 0x1ec   :  { %v533_v21 = vadd.f32 %v529_v27, %v456_v22  ;;  %677 = vmatmul.mubr.bf16.vlgmr.msra.gmra.mrb[8].mxu0 %v534_v26 }
 0x1ed   :  { %686 = vmatprep.mubr.bf16.mxu0 %v7138_v0 }
 0x1ee   :  { %v535_v16 = vpack.c.bf16 %v533_v21, %v532_v42 }
 0x1f4   :  { %687 = vmatmul.mubr.bf16.gmra.mrb[12].mxu0 %v535_v16 }
 0x2bf   :  { %v678_v24 = vpop.f32.mrb[8].mxu0 }
 0x2c0   :  { %v679_v28 = vadd.f32 %v678_v24, %v557_v18  ;;  %v680_v29 = vpop.f32.mrb[9].mxu0 }
 0x2c1   :  { %v6150_v17 = vadd.f32 %v680_v29, %v561_v12  ;;  %v682_v30 = vpop.f32.mrb[10].mxu0 }
 0x2c2   :  { %v6152_v31 = vmul.f32 0.17677669, %v679_v28  ;;  %v684_v32 = vpop.f32.mrb[11].mxu0  ;;  %v683_v33 = vadd.f32 %v682_v30, %v557_v18 }
 0x2c3   :  { %1289 = vrot.lane.b32.xlu0 %v6150_v17, %s5848_s20  ;;  %v6158_v34 = vadd.f32 %v684_v32, %v561_v12  ;;  %v1301_v61 = vcombine.high %v6150_v17, %v7140_v60  ;;  %v1308_v2 = vrot.slane %v6150_v17, %v6199_v58 }
 0x2c4   :  { %705 = vrot.lane.b32.xlu1 %v6152_v31, %s5848_s20  ;;  %v6164_v43 = vmul.f32 0.17677669, %v683_v33 }
 0x2c5   :  { %v1367_v41 = vcombine.high %v6158_v34, %v7140_v60  ;;  %v1315_v8 = vrot.slane %v1301_v61, %v6199_v58  ;;  %v1374_v9 = vrot.slane %v6158_v34, %v6199_v58 }
 0x2c7   :  { %717 = vrot.lane.b32.xlu0 %v6152_v31, %s7154_s27  ;;  %v688_v35 = vpop.f32.mrb[12].mxu0  ;;  %v1381_v14 = vrot.slane %v1367_v41, %v6199_v58 }
 0x2c8   :  { %1291 = vrot.lane.b32.xlu1 %v6158_v34, %s5848_s20  ;;  %v690_v37 = vpop.f32.mrb[13].mxu0  ;;  %v689_v45 = vadd.f32 %v688_v35, %v557_v18 }
 0x2c9   :  { %v692_v39 = vpop.f32.mrb[14].mxu0  ;;  %v6170_v46 = vadd.f32 %v690_v37, %v561_v12 }
 0x2ca   :  { %v694_v44 = vpop.f32.mrb[15].mxu0  ;;  %v6176_v47 = vmul.f32 0.17677669, %v689_v45  ;;  %v693_v50 = vadd.f32 %v692_v39, %v557_v18 }
 0x2cb   :  { %729 = vrot.lane.b32.xlu0 %v6152_v31, %s5849_s11  ;;  %v6182_v51 = vadd.f32 %v694_v44, %v561_v12  ;;  %v1433_v62 = vcombine.high %v6170_v46, %v7140_v60  ;;  %v6227_v22 = vrot.slane %v6170_v46, %v6199_v58 }
 0x2cc   :  { %707 = vrot.lane.b32.xlu1 %v6164_v43, %s5848_s20  ;;  %v6188_v52 = vmul.f32 0.17677669, %v693_v50 }
 0x2cd   :  { %v1499_v19 = vcombine.high %v6182_v51, %v7140_v60  ;;  %v6230_v26 = vrot.slane %v1433_v62, %v6199_v58  ;;  %v6234_v27 = vrot.slane %v6182_v51, %v6199_v58 }
 0x2cf   :  { %1293 = vrot.lane.b32.xlu0 %v6170_v46, %s5848_s20 }
 0x2d0   :  { %719 = vrot.lane.b32.xlu1 %v6164_v43, %s7154_s27 }
 0x2d3   :  { %709 = vrot.lane.b32.xlu0 %v6176_v47, %s5848_s20 }
 0x2d4   :  { %731 = vrot.lane.b32.xlu1 %v6164_v43, %s5849_s11 }
 0x2d7   :  { %721 = vrot.lane.b32.xlu0 %v6176_v47, %s7154_s27 }
 0x2d8   :  { %1295 = vrot.lane.b32.xlu1 %v6182_v51, %s5848_s20 }
 0x2db   :  { %733 = vrot.lane.b32.xlu0 %v6176_v47, %s5849_s11 }
 0x2dc   :  { %711 = vrot.lane.b32.xlu1 %v6188_v52, %s5848_s20 }
 0x2e0   :  { %723 = vrot.lane.b32.xlu1 %v6188_v52, %s7154_s27 }
 0x2e4   :  { %735 = vrot.lane.b32.xlu1 %v6188_v52, %s5849_s11 }
 0x335   :  { %v6207_v63 = vpop.permute.xlu0 %1289 }
 0x336   :  { %v1316_v3 = vcombine.high %v6207_v63, %v7140_v60  ;;  %v1323_v4 = vrot.slane %v6207_v63, %v6199_v58  ;;  %v706_v7 = vpop.permute.xlu1 %705 }
 0x338   :  { %v1330_v11 = vrot.slane %v1316_v3, %v6199_v58  ;;  %v1331_v13 = vcombine.low %v1308_v2, %v1323_v4  ;;  %v1332_v48 = vcombine.high %v1308_v2, %v1323_v4 }
 0x339   :  { %v718_v42 = vpop.permute.xlu0 %717 }
 0x33a   :  { %v1339_v21 = vrot.slane %v1331_v13, %v6210_v1  ;;  %v1346_v16 = vrot.slane %v1332_v48, %v6210_v1  ;;  %v1347_v49 = vcombine.low %v1315_v8, %v1330_v11  ;;  %v1348_v18 = vcombine.high %v1315_v8, %v1330_v11  ;;  %v6238_v12 = vpop.permute.xlu1 %1291 }
 0x33b   :  { %v741_v24 = vcombine.low %v6152_v31, %v718_v42  ;;  %v742_v28 = vcombine.high %v6152_v31, %v718_v42  ;;  %v1382_v29 = vcombine.high %v6238_v12, %v7140_v60  ;;  %v1389_v30 = vrot.slane %v6238_v12, %v6199_v58 }
 0x33c   :  { %v1355_v32 = vrot.slane %v1347_v49, %v6210_v1  ;;  %v1362_v33 = vrot.slane %v1348_v18, %v6210_v1  ;;  %v1565_v35 = vcombine.low %v1339_v21, %v1346_v16  ;;  %v4914_v37 = vcombine.high %v1339_v21, %v1346_v16 }
 0x33d   :  { %v749_v39 = vrot.slane %v741_v24, %v6199_v58  ;;  %v1396_v44 = vrot.slane %v1382_v29, %v6199_v58  ;;  %v1397_v45 = vcombine.low %v1374_v9, %v1389_v30  ;;  %v730_v50 = vpop.permute.xlu0 %729  ;;  %v6251_v31 = vrot.slane %v1499_v19, %v6199_v58 }
 0x33e   :  { %v6254_v53 = vrot.slane %v1565_v35, %v6199_v58  ;;  %v6257_v54 = vrot.slane %v4914_v37, %v6199_v58  ;;  %v1581_v55 = vcombine.low %v1355_v32, %v1362_v33  ;;  %v4915_v56 = vcombine.high %v1355_v32, %v1362_v33  ;;  %v6259_v57 = vpop.permute.xlu1 %707 }
 0x33f   :  { %v1398_v59 = vcombine.high %v1374_v9, %v1389_v30  ;;  %v1405_v61 = vrot.slane %v1397_v45, %v6210_v1  ;;  %v1413_v41 = vcombine.low %v1381_v14, %v1396_v44  ;;  %v1414_v62 = vcombine.high %v1381_v14, %v1396_v44 }
 0x340   :  { %v6263_v2 = vrot.slane %v1581_v55, %v6199_v58  ;;  %v756_v3 = vrot.slane %v742_v28, %v6199_v58  ;;  %v757_v4 = vcombine.low %v706_v7, %v730_v50  ;;  %v758_v8 = vcombine.high %v706_v7, %v730_v50 }
 0x341   :  { %v6267_v11 = vrot.slane %v4915_v56, %v6199_v58  ;;  %v1412_v13 = vrot.slane %v1398_v59, %v6210_v1  ;;  %v1421_v48 = vrot.slane %v1413_v41, %v6210_v1  ;;  %v1428_v9 = vrot.slane %v1414_v62, %v6210_v1  ;;  %v6272_v19 = vpop.permute.xlu0 %1293 }
 0x342   :  { %v765_v14 = vrot.slane %v757_v4, %v6199_v58  ;;  %v772_v42 = vrot.slane %v758_v8, %v6199_v58  ;;  %v1448_v21 = vcombine.high %v6272_v19, %v7140_v60  ;;  %v720_v16 = vpop.permute.xlu1 %719  ;;  %v1597_v7 = vcombine.low %v6254_v53, %v6257_v54 }
 0x343   :  { %v1615_v49 = vcombine.low %v1405_v61, %v1412_v13  ;;  %v4916_v18 = vcombine.high %v1405_v61, %v1412_v13  ;;  %v1631_v24 = vcombine.low %v1421_v48, %v1428_v9  ;;  %v1455_v28 = vrot.slane %v6272_v19, %v6199_v58 }
 0x344   :  { %v773_v29 = vcombine.low %v749_v39, %v765_v14  ;;  %v774_v30 = vcombine.high %v749_v39, %v765_v14  ;;  %v789_v32 = vcombine.low %v756_v3, %v772_v42  ;;  %v790_v33 = vcombine.high %v756_v3, %v772_v42 }
 0x345   :  { %v6283_v35 = vrot.slane %v1615_v49, %v6199_v58  ;;  %v6286_v37 = vrot.slane %v4916_v18, %v6199_v58  ;;  %v6289_v44 = vrot.slane %v1631_v24, %v6199_v58  ;;  %v4917_v45 = vcombine.high %v1421_v48, %v1428_v9  ;;  %v6291_v50 = vpop.permute.xlu0 %709 }
 0x346   :  { %v781_v55 = vrot.slane %v773_v29, %v6210_v1  ;;  %v788_v56 = vrot.slane %v774_v30, %v6210_v1  ;;  %v797_v39 = vrot.slane %v789_v32, %v6210_v1  ;;  %v804_v59 = vrot.slane %v790_v33, %v6210_v1  ;;  %v732_v61 = vpop.permute.xlu1 %731 }
 0x347   :  { %v1462_v41 = vrot.slane %v1448_v21, %v6199_v58  ;;  %v1463_v62 = vcombine.low %v6227_v22, %v1455_v28  ;;  %v1464_v3 = vcombine.high %v6227_v22, %v1455_v28  ;;  %v809_v4 = vcombine.low %v6164_v43, %v720_v16 }
 0x348   :  { %v1013_v8 = vcombine.low %v781_v55, %v788_v56  ;;  %v4906_v13 = vcombine.high %v781_v55, %v788_v56  ;;  %v1029_v48 = vcombine.low %v797_v39, %v804_v59  ;;  %v4907_v9 = vcombine.high %v797_v39, %v804_v59 }
 0x349   :  { %v1471_v14 = vrot.slane %v1463_v62, %v6210_v1  ;;  %v1478_v42 = vrot.slane %v1464_v3, %v6210_v1  ;;  %v1479_v49 = vcombine.low %v6230_v26, %v1462_v41  ;;  %v1480_v18 = vcombine.high %v6230_v26, %v1462_v41  ;;  %v722_v55 = vpop.permute.xlu0 %721 }
 0x34a   :  { %v6306_v21 = vrot.slane %v4917_v45, %v6199_v58  ;;  %v6309_v24 = vrot.slane %v1013_v8, %v6199_v58  ;;  %v6312_v22 = vrot.slane %v4906_v13, %v6199_v58  ;;  %v6315_v28 = vrot.slane %v1029_v48, %v6199_v58  ;;  %v6317_v29 = vpop.permute.xlu1 %1295 }
 0x34b   :  { %v1487_v30 = vrot.slane %v1479_v49, %v6210_v1  ;;  %v1494_v32 = vrot.slane %v1480_v18, %v6210_v1  ;;  %v1665_v33 = vcombine.low %v1471_v14, %v1478_v42  ;;  %v4918_v26 = vcombine.high %v1471_v14, %v1478_v42 }
 0x34c   :  { %v6322_v45 = vrot.slane %v4907_v9, %v6199_v58  ;;  %v810_v56 = vcombine.high %v6164_v43, %v720_v16  ;;  %v825_v39 = vcombine.low %v6259_v57, %v732_v61  ;;  %v826_v59 = vcombine.high %v6259_v57, %v732_v61 }
 0x34d   :  { %v6328_v41 = vrot.slane %v1665_v33, %v6199_v58  ;;  %v1681_v62 = vcombine.low %v1487_v30, %v1494_v32  ;;  %v4919_v3 = vcombine.high %v1487_v30, %v1494_v32  ;;  %v817_v8 = vrot.slane %v809_v4, %v6199_v58 }
 0x34e   :  { %v824_v13 = vrot.slane %v810_v56, %v6199_v58  ;;  %v833_v48 = vrot.slane %v825_v39, %v6199_v58  ;;  %v840_v9 = vrot.slane %v826_v59, %v6199_v58  ;;  %v877_v14 = vcombine.low %v6176_v47, %v722_v55  ;;  %v6335_v43 = vpop.permute.xlu1 %711 }
 0x34f   :  { %v6338_v16 = vrot.slane %v4918_v26, %v6199_v58  ;;  %v6341_v57 = vrot.slane %v1681_v62, %v6199_v58  ;;  %v6344_v61 = vrot.slane %v4919_v3, %v6199_v58  ;;  %v1514_v4 = vcombine.high %v6317_v29, %v7140_v60  ;;  %v734_v60 = vpop.permute.xlu0 %733 }
 0x350   :  { %v841_v42 = vcombine.low %v817_v8, %v833_v48  ;;  %v842_v49 = vcombine.high %v817_v8, %v833_v48  ;;  %v857_v18 = vcombine.low %v824_v13, %v840_v9  ;;  %v858_v30 = vcombine.high %v824_v13, %v840_v9 }
 0x351   :  { %v878_v32 = vcombine.high %v6176_v47, %v722_v55  ;;  %v885_v33 = vrot.slane %v877_v14, %v6199_v58  ;;  %v1521_v26 = vrot.slane %v6317_v29, %v6199_v58  ;;  %v1528_v56 = vrot.slane %v1514_v4, %v6199_v58 }
 0x352   :  { %v849_v39 = vrot.slane %v841_v42, %v6210_v1  ;;  %v856_v59 = vrot.slane %v842_v49, %v6210_v1  ;;  %v865_v62 = vrot.slane %v857_v18, %v6210_v1  ;;  %v872_v3 = vrot.slane %v858_v30, %v6210_v1  ;;  %v724_v0 = vpop.permute.xlu1 %723 }
 0x353   :  { %v1529_v8 = vcombine.low %v6234_v27, %v1521_v26  ;;  %v1530_v13 = vcombine.high %v6234_v27, %v1521_v26  ;;  %v1545_v47 = vcombine.low %v6251_v31, %v1528_v56  ;;  %v1546_v55 = vcombine.high %v6251_v31, %v1528_v56 }
 0x354   :  { %v1081_v48 = vcombine.low %v849_v39, %v856_v59  ;;  %v4908_v9 = vcombine.high %v849_v39, %v856_v59  ;;  %v1097_v14 = vcombine.low %v865_v62, %v872_v3  ;;  %v4909_v4 = vcombine.high %v865_v62, %v872_v3 }
 0x355   :  { %v1537_v42 = vrot.slane %v1529_v8, %v6210_v1  ;;  %v1544_v49 = vrot.slane %v1530_v13, %v6210_v1  ;;  %v1553_v18 = vrot.slane %v1545_v47, %v6210_v1  ;;  %v1560_v30 = vrot.slane %v1546_v55, %v6210_v1 }
 0x356   :  { %v6366_v27 = vrot.slane %v1081_v48, %v6199_v58  ;;  %v6369_v26 = vrot.slane %v4908_v9, %v6199_v58  ;;  %v6372_v31 = vrot.slane %v1097_v14, %v6199_v58  ;;  %v892_v56 = vrot.slane %v878_v32, %v6199_v58 }
 0x357   :  { %v1715_v39 = vcombine.low %v1537_v42, %v1544_v49  ;;  %v4920_v59 = vcombine.high %v1537_v42, %v1544_v49  ;;  %v1731_v62 = vcombine.low %v1553_v18, %v1560_v30  ;;  %v4921_v3 = vcombine.high %v1553_v18, %v1560_v30 }
 0x358   :  { %v6376_v8 = vrot.slane %v4909_v4, %v6199_v58  ;;  %v893_v13 = vcombine.low %v6291_v50, %v734_v60  ;;  %v894_v47 = vcombine.high %v6291_v50, %v734_v60  ;;  %v1605_v55 = vcombine.low %v6263_v2, %v6267_v11  ;;  %v736_v4 = vpop.permute.xlu1 %735 }
 0x359   :  { %v6383_v48 = vrot.slane %v1715_v39, %v6199_v58  ;;  %v6386_v32 = vrot.slane %v4920_v59, %v6199_v58  ;;  %v6389_v9 = vrot.slane %v1731_v62, %v6199_v58  ;;  %v1604_v14 = vrot.slane %v1597_v7, %v6210_v1 }
 0x35a   :  { %v901_v60 = vrot.slane %v893_v13, %v6199_v58  ;;  %v908_v50 = vrot.slane %v894_v47, %v6199_v58  ;;  %v1612_v2 = vrot.slane %v1605_v55, %v6210_v1  ;;  %v1647_v11 = vcombine.low %v6283_v35, %v6286_v37 }
 0x35b   :  { %v6401_v42 = vrot.slane %v4921_v3, %v6199_v58  ;;  %v1655_v49 = vcombine.low %v6289_v44, %v6306_v21  ;;  %v945_v18 = vcombine.low %v6188_v52, %v724_v0  ;;  %v946_v53 = vcombine.high %v6188_v52, %v724_v0 }
 0x35c   :  { %v909_v54 = vcombine.low %v885_v33, %v901_v60  ;;  %v910_v7 = vcombine.high %v885_v33, %v901_v60  ;;  %v925_v30 = vcombine.low %v892_v56, %v908_v50  ;;  %v926_v39 = vcombine.high %v892_v56, %v908_v50 }
 0x35d   :  { %v1613_v59 = vcombine.low %v1604_v14, %v1612_v2  ;;  %v1654_v62 = vrot.slane %v1647_v11, %v6210_v1  ;;  %v1662_v35 = vrot.slane %v1655_v49, %v6210_v1  ;;  %v961_v37 = vcombine.low %v6335_v43, %v736_v4 }
 0x35e   :  { %v917_v3 = vrot.slane %v909_v54, %v6210_v1  ;;  %v924_v13 = vrot.slane %v910_v7, %v6210_v1  ;;  %v933_v44 = vrot.slane %v925_v30, %v6210_v1  ;;  %v940_v21 = vrot.slane %v926_v39, %v6210_v1 }
 0x35f   :  { %v1663_v0 = vcombine.low %v1654_v62, %v1662_v35  ;;  %v1614_v52 = vcombine.high %v1604_v14, %v1612_v2  ;;  %v1664_v33 = vcombine.high %v1654_v62, %v1662_v35  ;;  %v953_v56 = vrot.slane %v945_v18, %v6199_v58 }
 0x360   :  { %v1149_v47 = vcombine.low %v917_v3, %v924_v13  ;;  %v4910_v55 = vcombine.high %v917_v3, %v924_v13  ;;  %v1165_v60 = vcombine.low %v933_v44, %v940_v21  ;;  %v960_v50 = vrot.slane %v946_v53, %v6199_v58 }
 0x361   :  { %v2261_v11 = vpack.c.bf16 %v1663_v0, %v1613_v59  ;;  %v2262_v49 = vpack.c.bf16 %v1664_v33, %v1614_v52  ;;  %v962_v54 = vcombine.high %v6335_v43, %v736_v4  ;;  %v969_v7 = vrot.slane %v961_v37, %v6199_v58 }
 0x362   :  { %v6419_v30 = vrot.slane %v1149_v47, %v6199_v58  ;;  %v6422_v39 = vrot.slane %v4910_v55, %v6199_v58  ;;  %v6425_v14 = vrot.slane %v1165_v60, %v6199_v58  ;;  %v4911_v2 = vcombine.high %v933_v44, %v940_v21 }
 0x363   :  { %5272 = vmatprep.subr.msk.bf16.mxu0 %vm2265_vm0, %v2261_v11  ;;  %5273 = vmatprep.subr.msk.bf16.mxu1 %vm2265_vm0, %v2262_v49  ;;  %v2273_v18 = vsel %vm2265_vm0, %v2261_v11, 0  ;;  %v2331_v43 = vsel %vm2265_vm0, %v2262_v49, 0  ;;  %v976_v4 = vrot.slane %v962_v54, %v6199_v58  ;;  %v977_v53 = vcombine.low %v953_v56, %v969_v7 }
 0x364   :  { %5185 = vmatpush3.bf16.xpose.msra.mxu0 %v2273_v18  ;;  %5191 = vmatpush3.bf16.xpose.msra.mxu1 %v2331_v43  ;;  %v978_v59 = vcombine.high %v953_v56, %v969_v7  ;;  %v1045_v62 = vcombine.low %v6309_v24, %v6312_v22  ;;  %v1061_v35 = vcombine.low %v6315_v28, %v6322_v45 }
 0x365   :  { %v985_v37 = vrot.slane %v977_v53, %v6210_v1  ;;  %v993_v3 = vcombine.low %v960_v50, %v976_v4  ;;  %v994_v13 = vcombine.high %v960_v50, %v976_v4  ;;  %v1113_v44 = vcombine.low %v6366_v27, %v6369_v26 }
 0x366   :  { %v992_v21 = vrot.slane %v978_v59, %v6210_v1  ;;  %v1053_v0 = vrot.slane %v1045_v62, %v6210_v1  ;;  %v1069_v52 = vrot.slane %v1061_v35, %v6210_v1  ;;  %v1129_v33 = vcombine.low %v6372_v31, %v6376_v8 }
 0x367   :  { %v1001_v56 = vrot.slane %v993_v3, %v6210_v1  ;;  %v1008_v47 = vrot.slane %v994_v13, %v6210_v1  ;;  %v1121_v55 = vrot.slane %v1113_v44, %v6210_v1  ;;  %v1046_v60 = vcombine.high %v6309_v24, %v6312_v22 }
 0x368   :  { %v6450_v50 = vrot.slane %v4911_v2, %v6199_v58  ;;  %v1217_v11 = vcombine.low %v985_v37, %v992_v21  ;;  %v4912_v49 = vcombine.high %v985_v37, %v992_v21  ;;  %v1077_v54 = vcombine.low %v1053_v0, %v1069_v52 }
 0x369   :  { %v1233_v7 = vcombine.low %v1001_v56, %v1008_v47  ;;  %v4913_v18 = vcombine.high %v1001_v56, %v1008_v47  ;;  %v1078_v43 = vcombine.high %v1053_v0, %v1069_v52  ;;  %v1137_v4 = vrot.slane %v1129_v33, %v6210_v1 }
 0x36a   :  { %v1224_v53 = vrot.slane %v1217_v11, %v6199_v58  ;;  %v1060_v59 = vrot.slane %v1046_v60, %v6210_v1  ;;  %v1062_v62 = vcombine.high %v6315_v28, %v6322_v45  ;;  %v1114_v24 = vcombine.high %v6366_v27, %v6369_v26 }
 0x36b   :  { %v1232_v22 = vrot.slane %v4912_v49, %v6199_v58  ;;  %v1240_v2 = vrot.slane %v1233_v7, %v6199_v58  ;;  %v1145_v35 = vcombine.low %v1121_v55, %v1137_v4  ;;  %v1146_v37 = vcombine.high %v1121_v55, %v1137_v4 }
 0x36c   :  { %v1076_v3 = vrot.slane %v1062_v62, %v6210_v1  ;;  %v1128_v13 = vrot.slane %v1114_v24, %v6210_v1  ;;  %v1130_v44 = vcombine.high %v6372_v31, %v6376_v8  ;;  %v1697_v21 = vcombine.low %v6328_v41, %v6338_v16 }
 0x36d   :  { %v2253_v28 = vpack.c.bf16 %v1145_v35, %v1077_v54  ;;  %v2254_v45 = vpack.c.bf16 %v1146_v37, %v1078_v43  ;;  %v1705_v27 = vcombine.low %v6341_v57, %v6344_v61  ;;  %v1747_v26 = vcombine.low %v6383_v48, %v6386_v32 }
 0x36e   :  { %v1248_v0 = vrot.slane %v4913_v18, %v6199_v58  ;;  %v1079_v52 = vcombine.low %v1060_v59, %v1076_v3  ;;  %v1080_v33 = vcombine.high %v1060_v59, %v1076_v3  ;;  %v1144_v56 = vrot.slane %v1130_v44, %v6210_v1 }
 0x36f   :  { %5186 = vmatprep.mubr.msk.bf16.mxu0 %vm2265_vm0, %v2253_v28  ;;  %v1704_v31 = vrot.slane %v1697_v21, %v6210_v1  ;;  %v1712_v41 = vrot.slane %v1705_v27, %v6210_v1  ;;  %v1755_v16 = vcombine.low %v6389_v9, %v6401_v42  ;;  %v1181_v57 = vcombine.low %v6419_v30, %v6422_v39 }
 0x370   :  { %v1147_v61 = vcombine.low %v1128_v13, %v1144_v56  ;;  %v1148_v8 = vcombine.high %v1128_v13, %v1144_v56  ;;  %5187 = vmatmul.mubr.msk.bf16.vlgmr.msra.gmra.mrb[16].mxu0 %vm2265_vm0, %v2254_v45  ;;  %v1197_v48 = vcombine.low %v6425_v14, %v6450_v50  ;;  %v1249_v32 = vcombine.low %v1224_v53, %v1232_v22 }
 0x371   :  { %v1713_v47 = vcombine.low %v1704_v31, %v1712_v41  ;;  %v1754_v55 = vrot.slane %v1747_v26, %v6210_v1  ;;  %v1762_v60 = vrot.slane %v1755_v16, %v6210_v1  ;;  %v1189_v9 = vrot.slane %v1181_v57, %v6210_v1 }
 0x372   :  { %v2255_v11 = vpack.c.bf16 %v1147_v61, %v1079_v52  ;;  %v2256_v49 = vpack.c.bf16 %v1148_v8, %v1080_v33  ;;  %v1205_v42 = vrot.slane %v1197_v48, %v6210_v1  ;;  %v1257_v18 = vrot.slane %v1249_v32, %v6210_v1 }
 0x373   :  { %v1763_v54 = vcombine.low %v1754_v55, %v1762_v60  ;;  %v1764_v7 = vcombine.high %v1754_v55, %v1762_v60  ;;  %v1265_v43 = vcombine.low %v1240_v2, %v1248_v0  ;;  %v1182_v4 = vcombine.high %v6419_v30, %v6422_v39 }
 0x374   :  { %5192 = vmatprep.mubr.msk.bf16.mxu1 %vm2265_vm0, %v2255_v11  ;;  %v1198_v59 = vcombine.high %v6425_v14, %v6450_v50  ;;  %v1250_v62 = vcombine.high %v1224_v53, %v1232_v22  ;;  %v1714_v35 = vcombine.high %v1704_v31, %v1712_v41  ;;  %v1213_v3 = vcombine.low %v1189_v9, %v1205_v42 }
 0x375   :  { %5193 = vmatmul.mubr.msk.bf16.vlgmr.msra.gmra.mrb[4].mxu1 %vm2265_vm0, %v2256_v49  ;;  %v2263_v24 = vpack.c.bf16 %v1763_v54, %v1713_v47  ;;  %v1273_v37 = vrot.slane %v1265_v43, %v6210_v1  ;;  %v1266_v44 = vcombine.high %v1240_v2, %v1248_v0  ;;  %v1196_v14 = vrot.slane %v1182_v4, %v6210_v1 }
 0x376   :  { %v1264_v13 = vrot.slane %v1250_v62, %v6210_v1  ;;  %v2264_v28 = vpack.c.bf16 %v1764_v7, %v1714_v35  ;;  %v1212_v50 = vrot.slane %v1198_v59, %v6210_v1  ;;  %v1214_v22 = vcombine.high %v1189_v9, %v1205_v42 }
 0x377   :  { %5274 = vmatprep.subr.msk.bf16.mxu1 %vm2265_vm0, %v2263_v24  ;;  %v2389_v21 = vsel %vm2265_vm0, %v2263_v24, 0  ;;  %v1281_v30 = vcombine.low %v1257_v18, %v1273_v37  ;;  %v1282_v39 = vcombine.high %v1257_v18, %v1273_v37  ;;  %v1280_v53 = vrot.slane %v1266_v44, %v6210_v1 }
 0x378   :  { %5197 = vmatpush3.bf16.xpose.msra.mxu1 %v2389_v21  ;;  %v1215_v26 = vcombine.low %v1196_v14, %v1212_v50  ;;  %v2447_v52 = vsel %vm2265_vm0, %v2264_v28, 0  ;;  %v1216_v56 = vcombine.high %v1196_v14, %v1212_v50 }
 0x379   :  { %5275 = vmatprep.subr.msk.bf16.mxu1 %vm2265_vm0, %v2264_v28  ;;  %v2257_v45 = vpack.c.bf16 %v1281_v30, %v1213_v3  ;;  %v1283_v27 = vcombine.low %v1264_v13, %v1280_v53  ;;  %v2258_v2 = vpack.c.bf16 %v1282_v39, %v1214_v22  ;;  %v1284_v33 = vcombine.high %v1264_v13, %v1280_v53 }
 0x37b   :  { %5198 = vmatprep.mubr.msk.bf16.mxu1 %vm2265_vm0, %v2257_v45  ;;  %v2259_v0 = vpack.c.bf16 %v1283_v27, %v1215_v26  ;;  %v2260_v31 = vpack.c.bf16 %v1284_v33, %v1216_v56 }
 0x37f   :  { %5199 = vmatmul.mubr.msk.bf16.vlgmr.msra.gmra.mrb[8].mxu1 %vm2265_vm0, %v2258_v2 }
 0x380   :  { %5203 = vmatpush3.bf16.xpose.msra.mxu1 %v2447_v52  ;;  %5204 = vmatprep.mubr.msk.bf16.mxu1 %vm2265_vm0, %v2259_v0 }
 0x387   :  { %5205 = vmatmul.mubr.msk.bf16.vlgmr.msra.gmra.mrb[12].mxu1 %vm2265_vm0, %v2260_v31 }
 0x443   :  { %v5188_v41 = vpop.f32.mrb[16].mxu0 }
 0x444   :  { %v6507_v16 = vpop.f32.mrb[17].mxu0  ;;  %v2505_v57 = vsel %vm2498_vm1, %v5188_v41, -inf }
 0x445   :  { %2506 = vmax.xlane.f32.xlu0 %v2505_v57  ;;  %v5189_v61 = vpop.f32.mrb[18].mxu0  ;;  %v2499_v9 = vsel %vm2498_vm1, %v6507_v16, -inf }
 0x446   :  { %v6510_v8 = vpop.f32.mrb[19].mxu0  ;;  %v2508_v48 = vsel %vm2498_vm1, %v5189_v61, -inf }
 0x447   :  { %2509 = vmax.xlane.f32.xlu1 %v2508_v48  ;;  %v2502_v42 = vsel %vm2498_vm1, %v6510_v8, -inf }
 0x448   :  { %v5194_v32 = vpop.f32.mrb[4].mxu1 }
 0x449   :  { %v6513_v47 = vpop.f32.mrb[5].mxu1  ;;  %v2517_v55 = vsel %vm2498_vm1, %v5194_v32, -inf }
 0x44a   :  { %v5195_v60 = vpop.f32.mrb[6].mxu1  ;;  %2518 = vmax.xlane.f32.xlu0 %v2517_v55  ;;  %v2511_v54 = vsel %vm2498_vm1, %v6513_v47, -inf }
 0x44b   :  { %v6516_v11 = vpop.f32.mrb[7].mxu1  ;;  %v2520_v49 = vsel %vm2498_vm1, %v5195_v60, -inf }
 0x44c   :  { %2521 = vmax.xlane.f32.xlu1 %v2520_v49  ;;  %v2514_v4 = vsel %vm2498_vm1, %v6516_v11, -inf }
 0x44e   :  { %2500 = vmax.xlane.f32.xlu0 %v2499_v9 }
 0x450   :  { %2503 = vmax.xlane.f32.xlu1 %v2502_v42 }
 0x452   :  { %2512 = vmax.xlane.f32.xlu0 %v2511_v54  ;;  %v6525_v7 = vpop.f32.mrb[8].mxu1 }
 0x453   :  { %v6527_v18 = vpop.f32.mrb[9].mxu1  ;;  %v2529_v24 = vsel %vm2498_vm1, %v6525_v7, -inf }
 0x454   :  { %v6529_v43 = vpop.f32.mrb[10].mxu1  ;;  %v2523_v44 = vsel %vm2498_vm1, %v6527_v18, -inf }
 0x455   :  { %v6533_v59 = vpop.f32.mrb[11].mxu1  ;;  %v2532_v62 = vsel %vm2498_vm1, %v6529_v43, -inf }
 0x456   :  { %2515 = vmax.xlane.f32.xlu0 %v2514_v4  ;;  %2533 = vmax.xlane.f32.xlu1 %v2532_v62  ;;  %v2526_v35 = vsel %vm2498_vm1, %v6533_v59, -inf }
 0x45a   :  { %2530 = vmax.xlane.f32.xlu0 %v2529_v24  ;;  %2527 = vmax.xlane.f32.xlu1 %v2526_v35  ;;  %v6541_v37 = vpop.f32.mrb[12].mxu1 }
 0x45b   :  { %v6543_v3 = vpop.f32.mrb[13].mxu1  ;;  %v2541_v28 = vsel %vm2498_vm1, %v6541_v37, -inf }
 0x45c   :  { %v6545_v13 = vpop.f32.mrb[14].mxu1  ;;  %v2535_v30 = vsel %vm2498_vm1, %v6543_v3, -inf }
 0x45d   :  { %v6549_v21 = vpop.f32.mrb[15].mxu1  ;;  %v2544_v39 = vsel %vm2498_vm1, %v6545_v13, -inf }
 0x45e   :  { %2524 = vmax.xlane.f32.xlu0 %v2523_v44  ;;  %v2538_v14 = vsel %vm2498_vm1, %v6549_v21, -inf }
 0x462   :  { %2542 = vmax.xlane.f32.xlu0 %v2541_v28 }
 0x466   :  { %2536 = vmax.xlane.f32.xlu0 %v2535_v30 }
 0x46b   :  { %1767 = vrot.lane.b32.xlu1 %v6158_v34, %s7154_s27 }
 0x46f   :  { %1773 = vrot.lane.b32.xlu1 %v6207_v63, %s7154_s27 }
 0x47c   :  { %1765 = vrot.lane.b32.xlu0 %v6150_v17, %s7154_s27 }
 0x493   :  { %2545 = vmax.xlane.f32.xlu1 %v2544_v39 }
 0x497   :  { %2539 = vmax.xlane.f32.xlu1 %v2538_v14 }
 0x4a8   :  { %1775 = vrot.lane.b32.xlu1 %v6238_v12, %s7154_s27 }
 0x4d2   :  { %v2507_v50 = vpop.xlane.xlu0 %2506 }
 0x4d3   :  { %v2549_v53 = vsub.f32 %v5188_v41, %v2507_v50 }
 0x4d4   :  { %v2510_v34 = vpop.xlane.xlu1 %2509 }
 0x4d5   :  { %v2567_v22 = vmul.f32 1.442695, %v2549_v53  ;;  %v2550_v45 = vsub.f32 %v5189_v61, %v2510_v34 }
 0x4d7   :  { %5513 = vpow2.f32 %v2567_v22  ;;  %v2569_v63 = vmul.f32 1.442695, %v2550_v45  ;;  %v2519_v27 = vpop.xlane.xlu0 %2518 }
 0x4d8   :  { %v2553_v17 = vsub.f32 %v5194_v32, %v2519_v27 }
 0x4d9   :  { %5515 = vpow2.f32 %v2569_v63  ;;  %v2522_v2 = vpop.xlane.xlu1 %2521 }
 0x4da   :  { %v2575_v26 = vmul.f32 1.442695, %v2553_v17  ;;  %v2554_v0 = vsub.f32 %v5195_v60, %v2522_v2 }
 0x4db   :  { %v2501_v52 = vpop.xlane.xlu0 %2500 }
 0x4dc   :  { %5517 = vpow2.f32 %v2575_v26  ;;  %v2577_v33 = vmul.f32 1.442695, %v2554_v0  ;;  %v2547_v56 = vsub.f32 %v6507_v16, %v2501_v52 }
 0x4dd   :  { %v2504_v31 = vpop.xlane.xlu1 %2503 }
 0x4de   :  { %5519 = vpow2.f32 %v2577_v33  ;;  %v2563_v12 = vmul.f32 1.442695, %v2547_v56  ;;  %v2548_v41 = vsub.f32 %v6510_v8, %v2504_v31 }
 0x4df   :  { %v2513_v57 = vpop.xlane.xlu0 %2512 }
 0x4e0   :  { %5521 = vpow2.f32 %v2563_v12  ;;  %v2565_v61 = vmul.f32 1.442695, %v2548_v41  ;;  %v2551_v48 = vsub.f32 %v6513_v47, %v2513_v57 }
 0x4e1   :  { %v6570_v32 = vpop.eup %5513 }
 0x4e2   :  { %5523 = vpow2.f32 %v2565_v61  ;;  %v2571_v55 = vmul.f32 1.442695, %v2551_v48  ;;  %v2601_v60 = vsel %vm2498_vm1, %v6570_v32, 0.0 }
 0x4e3   :  { %v6574_v49 = vpop.eup %5515  ;;  %v2516_v16 = vpop.xlane.xlu0 %2515  ;;  %2602 = vadd.xlane.f32.xlu0 %v2601_v60 }
 0x4e4   :  { %v2534_v9 = vpop.xlane.xlu1 %2533  ;;  %5525 = vpow2.f32 %v2571_v55  ;;  %v2552_v8 = vsub.f32 %v6516_v11, %v2516_v16  ;;  %v2604_v47 = vsel %vm2498_vm1, %v6574_v49, 0.0 }
 0x4e5   :  { %v2558_v42 = vsub.f32 %v6529_v43, %v2534_v9  ;;  %2605 = vadd.xlane.f32.xlu1 %v2604_v47 }
 0x4e6   :  { %v6580_v54 = vpop.eup %5517  ;;  %v2573_v4 = vmul.f32 1.442695, %v2552_v8 }
 0x4e7   :  { %v2585_v62 = vmul.f32 1.442695, %v2558_v42  ;;  %v2531_v24 = vpop.xlane.xlu0 %2530  ;;  %v2613_v35 = vsel %vm2498_vm1, %v6580_v54, 0.0 }
 0x4e8   :  { %v2528_v44 = vpop.xlane.xlu1 %2527  ;;  %v6584_v28 = vpop.eup %5519  ;;  %5527 = vpow2.f32 %v2573_v4  ;;  %v2557_v11 = vsub.f32 %v6525_v7, %v2531_v24  ;;  %2614 = vadd.xlane.f32.xlu0 %v2613_v35  ;;  %v7155_v4 = vmov 0.0  }
 0x4e9   :  { %v2556_v43 = vsub.f32 %v6533_v59, %v2528_v44  ;;  %v2616_v30 = vsel %vm2498_vm1, %v6584_v28, 0.0  ;;  %5529 = vpow2.f32 %v2585_v62 }
 0x4ea   :  { %v6590_v39 = vpop.eup %5521  ;;  %v2583_v14 = vmul.f32 1.442695, %v2557_v11  ;;  %2617 = vadd.xlane.f32.xlu1 %v2616_v30 }
 0x4eb   :  { %v2581_v50 = vmul.f32 1.442695, %v2556_v43  ;;  %v2525_v53 = vpop.xlane.xlu0 %2524  ;;  %v2595_v34 = vsel %vm2498_vm1, %v6590_v39, 0.0 }
 0x4ec   :  { %v6594_v22 = vpop.eup %5523  ;;  %5531 = vpow2.f32 %v2583_v14  ;;  %v2555_v7 = vsub.f32 %v6527_v18, %v2525_v53  ;;  %2596 = vadd.xlane.f32.xlu0 %v2595_v34  ;;  %v1768_v8 = vpop.permute.xlu1 %1767 }
 0x4ed   :  { %v2598_v59 = vsel %vm2498_vm1, %v6594_v22, 0.0  ;;  %5533 = vpow2.f32 %v2581_v50 }
 0x4ee   :  { %v6599_v45 = vpop.eup %5525  ;;  %v2579_v63 = vmul.f32 1.442695, %v2555_v7  ;;  %2599 = vadd.xlane.f32.xlu1 %v2598_v59 }
 0x4ef   :  { %v2543_v27 = vpop.xlane.xlu0 %2542  ;;  %v2607_v17 = vsel %vm2498_vm1, %v6599_v45, 0.0 }
 0x4f0   :  { %5535 = vpow2.f32 %v2579_v63  ;;  %v2561_v2 = vsub.f32 %v6541_v37, %v2543_v27  ;;  %2608 = vadd.xlane.f32.xlu0 %v2607_v17  ;;  %v1774_v47 = vpop.permute.xlu1 %1773 }
 0x4f1   :  { %v1804_v24 = vcombine.high %v1774_v47, %v7155_v4  ;;  %v1811_v43 = vrot.slane %v1774_v47, %v6199_v58 }
 0x4f2   :  { %v6604_v26 = vpop.eup %5527  ;;  %v2591_v18 = vmul.f32 1.442695, %v2561_v2 }
 0x4f3   :  { %v2537_v0 = vpop.xlane.xlu0 %2536  ;;  %v2610_v52 = vsel %vm2498_vm1, %v6604_v26, 0.0  ;;  %v6608_v33 = vpop.eup %5529  ;;  %v1818_v44 = vrot.slane %v1804_v24, %v6199_v58 }
 0x4f4   :  { %5537 = vpow2.f32 %v2591_v18  ;;  %v2559_v56 = vsub.f32 %v6543_v3, %v2537_v0  ;;  %2611 = vadd.xlane.f32.xlu1 %v2610_v52  ;;  %v2628_v37 = vsel %vm2498_vm1, %v6608_v33, 0.0  ;;  %v1855_v52 = vcombine.high %v1768_v8, %v7155_v4 }
 0x4f6   :  { %v6611_v31 = vpop.eup %5531  ;;  %v2587_v12 = vmul.f32 1.442695, %v2559_v56 }
 0x4f7   :  { %v2625_v41 = vsel %vm2498_vm1, %v6611_v31, 0.0  ;;  %v6617_v57 = vpop.eup %5533  ;;  %v1766_v42 = vpop.permute.xlu0 %1765 }
 0x4f8   :  { %5539 = vpow2.f32 %v2587_v12  ;;  %2629 = vadd.xlane.f32.xlu1 %v2628_v37  ;;  %2626 = vadd.xlane.f32.xlu0 %v2625_v41  ;;  %v2622_v3 = vsel %vm2498_vm1, %v6617_v57, 0.0  ;;  %v1789_v62 = vcombine.high %v1766_v42, %v7155_v4  ;;  %v1796_v11 = vrot.slane %v1766_v42, %v6199_v58 }
 0x4f9   :  { %v1862_v41 = vrot.slane %v1768_v8, %v6199_v58 }
 0x4fa   :  { %v6619_v61 = vpop.eup %5535  ;;  %v1803_v35 = vrot.slane %v1789_v62, %v6199_v58  ;;  %v1819_v34 = vcombine.low %v1796_v11, %v1811_v43  ;;  %v1820_v7 = vcombine.high %v1796_v11, %v1811_v43 }
 0x4fb   :  { %v2619_v48 = vsel %vm2498_vm1, %v6619_v61, 0.0 }
 0x4fc   :  { %2623 = vadd.xlane.f32.xlu1 %v2622_v3  ;;  %2620 = vadd.xlane.f32.xlu0 %v2619_v48  ;;  %v1835_v30 = vcombine.low %v1803_v35, %v1818_v44  ;;  %v1836_v14 = vcombine.high %v1803_v35, %v1818_v44  ;;  %v1827_v18 = vrot.slane %v1819_v34, %v6210_v1 }
 0x4fd   :  { %v1834_v0 = vrot.slane %v1820_v7, %v6210_v1 }
 0x4fe   :  { %v6625_v55 = vpop.eup %5537  ;;  %v1843_v63 = vrot.slane %v1835_v30, %v6210_v1  ;;  %v1850_v27 = vrot.slane %v1836_v14, %v6210_v1 }
 0x4ff   :  { %v2637_v60 = vsel %vm2498_vm1, %v6625_v55, 0.0 }
 0x500   :  { %2638 = vadd.xlane.f32.xlu0 %v2637_v60  ;;  %v2069_v12 = vcombine.low %v1843_v63, %v1850_v27  ;;  %v2053_v60 = vcombine.low %v1827_v18, %v1834_v0 }
 0x502   :  { %v6629_v16 = vpop.eup %5539  ;;  %v2076_v24 = vrot.slane %v2069_v12, %v6199_v58  ;;  %v2060_v30 = vrot.slane %v2053_v60, %v6199_v58 }
 0x503   :  { %v2631_v9 = vsel %vm2498_vm1, %v6629_v16, 0.0 }
 0x504   :  { %2632 = vadd.xlane.f32.xlu0 %v2631_v9  ;;  %v4922_v9 = vcombine.high %v1827_v18, %v1834_v0 }
 0x506   :  { %v2068_v14 = vrot.slane %v4922_v9, %v6199_v58 }
 0x520   :  { %v2546_v50 = vpop.xlane.xlu1 %2545 }
 0x521   :  { %v2562_v53 = vsub.f32 %v6545_v13, %v2546_v50  ;;  %v4923_v13 = vcombine.high %v1843_v63, %v1850_v27 }
 0x523   :  { %v2593_v59 = vmul.f32 1.442695, %v2562_v53  ;;  %v2084_v35 = vrot.slane %v4923_v13, %v6199_v58  ;;  %v2085_v13 = vcombine.low %v2060_v30, %v2068_v14 }
 0x524   :  { %v2540_v17 = vpop.xlane.xlu1 %2539 }
 0x525   :  { %5541 = vpow2.f32 %v2593_v59  ;;  %v2560_v2 = vsub.f32 %v6549_v21, %v2540_v17  ;;  %v1869_v21 = vrot.slane %v1855_v52, %v6199_v58  ;;  %v2093_v27 = vcombine.low %v2076_v24, %v2084_v35 }
 0x526   :  { %v2092_v60 = vrot.slane %v2085_v13, %v6210_v1 }
 0x527   :  { %v2589_v56 = vmul.f32 1.442695, %v2560_v2 }
 0x528   :  { %v1776_v37 = vpop.permute.xlu1 %1775 }
 0x529   :  { %5543 = vpow2.f32 %v2589_v56  ;;  %v1870_v3 = vcombine.high %v1776_v37, %v7155_v4  ;;  %v1877_v48 = vrot.slane %v1776_v37, %v6199_v58 }
 0x52b   :  { %v1884_v42 = vrot.slane %v1870_v3, %v6199_v58  ;;  %v1885_v47 = vcombine.low %v1862_v41, %v1877_v48  ;;  %v1886_v62 = vcombine.high %v1862_v41, %v1877_v48  ;;  %v2100_v3 = vrot.slane %v2093_v27, %v6210_v1 }
 0x52d   :  { %v1893_v44 = vrot.slane %v1885_v47, %v6210_v1  ;;  %v1900_v8 = vrot.slane %v1886_v62, %v6210_v1  ;;  %v1901_v11 = vcombine.low %v1869_v21, %v1884_v42  ;;  %v1902_v43 = vcombine.high %v1869_v21, %v1884_v42 }
 0x52e   :  { %v2101_v42 = vcombine.low %v2092_v60, %v2100_v3  ;;  %v2102_v62 = vcombine.high %v2092_v60, %v2100_v3 }
 0x52f   :  { %v6657_v50 = vpop.eup %5541  ;;  %v1909_v53 = vrot.slane %v1901_v11, %v6210_v1  ;;  %v1916_v34 = vrot.slane %v1902_v43, %v6210_v1  ;;  %v2103_v7 = vcombine.low %v1893_v44, %v1900_v8  ;;  %v4924_v59 = vcombine.high %v1893_v44, %v1900_v8 }
 0x530   :  { %v2640_v63 = vsel %vm2498_vm1, %v6657_v50, 0.0 }
 0x531   :  { %v2110_v17 = vrot.slane %v2103_v7, %v6199_v58  ;;  %v2118_v2 = vrot.slane %v4924_v59, %v6199_v58  ;;  %v2119_v18 = vcombine.low %v1909_v53, %v1916_v34  ;;  %v4925_v0 = vcombine.high %v1909_v53, %v1916_v34  ;;  %2641 = vadd.xlane.f32.xlu1 %v2640_v63 }
 0x533   :  { %v6665_v52 = vpop.eup %5543  ;;  %v2126_v56 = vrot.slane %v2119_v18, %v6199_v58  ;;  %v2134_v12 = vrot.slane %v4925_v0, %v6199_v58  ;;  %v2135_v37 = vcombine.low %v2110_v17, %v2118_v2 }
 0x534   :  { %v2634_v41 = vsel %vm2498_vm1, %v6665_v52, 0.0 }
 0x535   :  { %2635 = vadd.xlane.f32.xlu0 %v2634_v41  ;;  %v2143_v48 = vcombine.low %v2126_v56, %v2134_v12  ;;  %v2142_v9 = vrot.slane %v2135_v37, %v6210_v1 }
 0x537   :  { %v2150_v21 = vrot.slane %v2143_v48, %v6210_v1 }
 0x539   :  { %v2151_v47 = vcombine.low %v2142_v9, %v2150_v21  ;;  %v2152_v24 = vcombine.high %v2142_v9, %v2150_v21 }
 0x53b   :  { %v2683_v35 = vpack.c.bf16 %v2151_v47, %v2101_v42  ;;  %v2684_v44 = vpack.c.bf16 %v2152_v24, %v2102_v62 }
 0x53d   :  { %5208 = vmatprep.subr.bf16.mxu1 %v2683_v35  ;;  %5214 = vmatprep.subr.bf16.mxu0 %v2684_v44 }
 0x53e   :  { %5209 = vmatpush3.bf16.msra.mxu1 %v2683_v35  ;;  %5215 = vmatpush3.bf16.msra.mxu0 %v2684_v44 }
 0x542   :  { %1771 = vrot.lane.b32.xlu1 %v6182_v51, %s7154_s27 }
 0x546   :  { %1777 = vrot.lane.b32.xlu1 %v6272_v19, %s7154_s27 }
 0x54a   :  { %1779 = vrot.lane.b32.xlu1 %v6317_v29, %s7154_s27 }
 0x54b   :  { %1769 = vrot.lane.b32.xlu0 %v6170_v46, %s7154_s27 }
 0x570   :  { %v2603_v8 = vpop.xlane.xlu0 %2602 }
 0x572   :  { %v2606_v11 = vpop.xlane.xlu1 %2605 }
 0x573   :  { %5545 = vrcp.f32 %v2606_v11 }
 0x575   :  { %v2615_v43 = vpop.xlane.xlu0 %2614 }
 0x577   :  { %v2618_v30 = vpop.xlane.xlu1 %2617 }
 0x579   :  { %v2597_v14 = vpop.xlane.xlu0 %2596 }
 0x57a   :  { %5547 = vrcp.f32 %v2597_v14 }
 0x57b   :  { %5549 = vrcp.f32 %v2603_v8  ;;  %v2600_v53 = vpop.xlane.xlu1 %2599 }
 0x57c   :  { %5551 = vrcp.f32 %v2600_v53 }
 0x57d   :  { %v2609_v51 = vpop.xlane.xlu0 %2608  ;;  %5553 = vrcp.f32 %v2618_v30  ;;  %v5546_v29 = vpop.eup %5545 }
 0x57e   :  { %5555 = vrcp.f32 %v2609_v51  ;;  %v2662_v27 = vmul.f32 %v5546_v29, %v6574_v49 }
 0x57f   :  { %5557 = vrcp.f32 %v2615_v43 }
 0x581   :  { %v2612_v19 = vpop.xlane.xlu1 %2611 }
 0x582   :  { %5559 = vrcp.f32 %v2612_v19 }
 0x584   :  { %v5548_v34 = vpop.eup %5547 }
 0x585   :  { %v5550_v7 = vpop.eup %5549  ;;  %v2630_v46 = vpop.xlane.xlu1 %2629  ;;  %v2659_v17 = vmul.f32 %v5548_v34, %v6590_v39 }
 0x586   :  { %v2627_v59 = vpop.xlane.xlu0 %2626  ;;  %v5552_v63 = vpop.eup %5551  ;;  %5561 = vrcp.f32 %v2630_v46  ;;  %v2661_v18 = vmul.f32 %v5550_v7, %v6570_v32 }
 0x587   :  { %5563 = vrcp.f32 %v2627_v59  ;;  %v2660_v2 = vmul.f32 %v5552_v63, %v6594_v22  ;;  %v5554_v0 = vpop.eup %5553 }
 0x588   :  { %v5556_v13 = vpop.eup %5555  ;;  %v2676_v41 = vpack.c.bf16 %v2662_v27, %v2661_v18  ;;  %v2666_v48 = vmul.f32 %v5554_v0, %v6584_v28 }
 0x589   :  { %v2624_v56 = vpop.xlane.xlu1 %2623  ;;  %v2675_v12 = vpack.c.bf16 %v2660_v2, %v2659_v17  ;;  %v5558_v3 = vpop.eup %5557  ;;  %v2663_v39 = vmul.f32 %v5556_v13, %v6599_v45 }
 0x58a   :  { %5565 = vrcp.f32 %v2624_v56  ;;  %v2621_v37 = vpop.xlane.xlu0 %2620  ;;  %v2665_v22 = vmul.f32 %v5558_v3, %v6580_v54 }
 0x58b   :  { %5567 = vrcp.f32 %v2621_v37  ;;  %5210 = vmatprep.mubr.msk.bf16.mxu1 %vm2498_vm1, %v2675_v12 }
 0x58c   :  { %v5560_v49 = vpop.eup %5559  ;;  %5211 = vmatmul.mubr.msk.bf16.vlgmr.msra.gmra.mrb[16].mxu1 %vm2498_vm1, %v2676_v41  ;;  %v2678_v21 = vpack.c.bf16 %v2666_v48, %v2665_v22 }
 0x58d   :  { %v2664_v32 = vmul.f32 %v5560_v49, %v6604_v26 }
 0x58f   :  { %v2677_v60 = vpack.c.bf16 %v2664_v32, %v2663_v39 }
 0x590   :  { %v5562_v9 = vpop.eup %5561 }
 0x591   :  { %v5564_v42 = vpop.eup %5563  ;;  %v6694_v47 = vmul.f32 %v5562_v9, %v6608_v33  ;;  %5216 = vmatprep.mubr.msk.bf16.mxu0 %vm2498_vm1, %v2677_v60  ;;  %v2639_v33 = vpop.xlane.xlu0 %2638 }
 0x592   :  { %v6698_v62 = vmul.f32 %v5564_v42, %v6611_v31  ;;  %5217 = vmatmul.mubr.msk.bf16.vlgmr.msra.gmra.mrb[20].mxu0 %vm2498_vm1, %v2678_v21 }
 0x594   :  { %v5566_v28 = vpop.eup %5565  ;;  %v2680_v45 = vpack.c.bf16 %v6694_v47, %v6698_v62 }
 0x595   :  { %v5568_v26 = vpop.eup %5567  ;;  %v2668_v54 = vmul.f32 %v5566_v28, %v6617_v57  ;;  %v2633_v44 = vpop.xlane.xlu0 %2632 }
 0x596   :  { %v2667_v24 = vmul.f32 %v5568_v26, %v6619_v61  ;;  %5569 = vrcp.f32 %v2633_v44 }
 0x598   :  { %v2679_v35 = vpack.c.bf16 %v2668_v54, %v2667_v24 }
 0x59a   :  { %5222 = vmatprep.mubr.msk.bf16.mxu1 %vm2498_vm1, %v2679_v35 }
 0x5a0   :  { %v5570_v14 = vpop.eup %5569 }
 0x5a1   :  { %v2671_v63 = vmul.f32 %v5570_v14, %v6629_v16 }
 0x5be   :  { %v2642_v8 = vpop.xlane.xlu1 %2641 }
 0x5c2   :  { %v1772_v31 = vpop.permute.xlu1 %1771  ;;  %v2636_v11 = vpop.xlane.xlu0 %2635 }
 0x5c3   :  { %5571 = vrcp.f32 %v2636_v11  ;;  %v1987_v19 = vcombine.high %v1772_v31, %v7155_v4  ;;  %v1994_v0 = vrot.slane %v1772_v31, %v6199_v58 }
 0x5c4   :  { %5573 = vrcp.f32 %v2642_v8 }
 0x5c5   :  { %v2001_v56 = vrot.slane %v1987_v19, %v6199_v58  ;;  %5575 = vrcp.f32 %v2639_v33 }
 0x5c6   :  { %v1778_v43 = vpop.permute.xlu1 %1777  ;;  %v1770_v30 = vpop.permute.xlu0 %1769 }
 0x5c7   :  { %v1936_v53 = vcombine.high %v1778_v43, %v7155_v4  ;;  %v1943_v51 = vrot.slane %v1778_v43, %v6199_v58  ;;  %v1921_v57 = vcombine.high %v1770_v30, %v7155_v4  ;;  %v1928_v61 = vrot.slane %v1770_v30, %v6199_v58 }
 0x5c9   :  { %v1950_v29 = vrot.slane %v1936_v53, %v6199_v58  ;;  %v1935_v34 = vrot.slane %v1921_v57, %v6199_v58  ;;  %v1951_v7 = vcombine.low %v1928_v61, %v1943_v51  ;;  %v1952_v46 = vcombine.high %v1928_v61, %v1943_v51 }
 0x5ca   :  { %v1780_v59 = vpop.permute.xlu1 %1779 }
 0x5cb   :  { %v1959_v27 = vrot.slane %v1951_v7, %v6210_v1  ;;  %v1966_v17 = vrot.slane %v1952_v46, %v6210_v1  ;;  %v1967_v2 = vcombine.low %v1935_v34, %v1950_v29  ;;  %v1968_v18 = vcombine.high %v1935_v34, %v1950_v29 }
 0x5cc   :  { %v2002_v12 = vcombine.high %v1780_v59, %v7155_v4  ;;  %v2009_v13 = vrot.slane %v1780_v59, %v6199_v58 }
 0x5cd   :  { %v5572_v37 = vpop.eup %5571  ;;  %v1975_v41 = vrot.slane %v1967_v2, %v6210_v1  ;;  %v1982_v3 = vrot.slane %v1968_v18, %v6210_v1  ;;  %v2153_v16 = vcombine.low %v1959_v27, %v1966_v17  ;;  %v4926_v49 = vcombine.high %v1959_v27, %v1966_v17 }
 0x5ce   :  { %v2016_v48 = vrot.slane %v2002_v12, %v6199_v58  ;;  %v2017_v39 = vcombine.low %v1994_v0, %v2009_v13  ;;  %v2018_v32 = vcombine.high %v1994_v0, %v2009_v13  ;;  %v2672_v22 = vmul.f32 %v5572_v37, %v6665_v52  ;;  %v5574_v46 = vpop.eup %5573 }
 0x5cf   :  { %v2160_v60 = vrot.slane %v2153_v16, %v6199_v58  ;;  %v2169_v9 = vcombine.low %v1975_v41, %v1982_v3  ;;  %v4927_v4 = vcombine.high %v1975_v41, %v1982_v3  ;;  %v2168_v54 = vrot.slane %v4926_v49, %v6199_v58  ;;  %v5576_v0 = vpop.eup %5575 }
 0x5d0   :  { %v2025_v21 = vrot.slane %v2017_v39, %v6210_v1  ;;  %v2032_v42 = vrot.slane %v2018_v32, %v6210_v1  ;;  %v2033_v28 = vcombine.low %v2001_v56, %v2016_v48  ;;  %v2034_v26 = vcombine.high %v2001_v56, %v2016_v48 }
 0x5d1   :  { %v2176_v24 = vrot.slane %v2169_v9, %v6199_v58  ;;  %v2184_v35 = vrot.slane %v4927_v4, %v6199_v58  ;;  %v2681_v44 = vpack.c.bf16 %v2672_v22, %v2671_v63  ;;  %v2185_v19 = vcombine.low %v2160_v60, %v2168_v54 }
 0x5d2   :  { %v2041_v52 = vrot.slane %v2033_v28, %v6210_v1  ;;  %v2048_v8 = vrot.slane %v2034_v26, %v6210_v1  ;;  %v2203_v31 = vcombine.low %v2025_v21, %v2032_v42  ;;  %v4928_v11 = vcombine.high %v2025_v21, %v2032_v42 }
 0x5d3   :  { %5228 = vmatprep.mubr.msk.bf16.mxu0 %vm2498_vm1, %v2681_v44  ;;  %v2193_v43 = vcombine.low %v2176_v24, %v2184_v35  ;;  %v2192_v33 = vrot.slane %v2185_v19, %v6210_v1  ;;  %v2674_v56 = vmul.f32 %v5574_v46, %v6657_v50  ;;  %v2673_v37 = vmul.f32 %v5576_v0, %v6625_v55 }
 0x5d4   :  { %v2210_v30 = vrot.slane %v2203_v31, %v6199_v58  ;;  %v2218_v14 = vrot.slane %v4928_v11, %v6199_v58  ;;  %v2219_v53 = vcombine.low %v2041_v52, %v2048_v8  ;;  %v4929_v51 = vcombine.high %v2041_v52, %v2048_v8 }
 0x5d5   :  { %v2200_v34 = vrot.slane %v2193_v43, %v6210_v1  ;;  %v2682_v41 = vpack.c.bf16 %v2674_v56, %v2673_v37  ;;  %v7156_v3 = vmov 0  }
 0x5d6   :  { %v2226_v57 = vrot.slane %v2219_v53, %v6199_v58  ;;  %v2234_v61 = vrot.slane %v4929_v51, %v6199_v58  ;;  %v2235_v29 = vcombine.low %v2210_v30, %v2218_v14 }
 0x5d7   :  { %v2201_v27 = vcombine.low %v2192_v33, %v2200_v34  ;;  %v2202_v2 = vcombine.high %v2192_v33, %v2200_v34 }
 0x5d8   :  { %v2243_v7 = vcombine.low %v2226_v57, %v2234_v61  ;;  %v2242_v59 = vrot.slane %v2235_v29, %v6210_v1 }
 0x5da   :  { %v2250_v63 = vrot.slane %v2243_v7, %v6210_v1 }
 0x5dc   :  { %v2251_v17 = vcombine.low %v2242_v59, %v2250_v63  ;;  %v2252_v18 = vcombine.high %v2242_v59, %v2250_v63 }
 0x5de   :  { %v2685_v12 = vpack.c.bf16 %v2251_v17, %v2201_v27  ;;  %v2686_v13 = vpack.c.bf16 %v2252_v18, %v2202_v2 }
 0x5e0   :  { %5220 = vmatprep.subr.bf16.mxu1 %v2685_v12  ;;  %5226 = vmatprep.subr.bf16.mxu0 %v2686_v13 }
 0x5e1   :  { %5221 = vmatpush3.bf16.msra.mxu1 %v2685_v12  ;;  %5227 = vmatpush3.bf16.msra.mxu0 %v2686_v13 }
 0x5e4   :  { %5223 = vmatmul.mubr.msk.bf16.vlgmr.msra.gmra.mrb[20].mxu1 %vm2498_vm1, %v2680_v45  ;;  %5229 = vmatmul.mubr.msk.bf16.vlgmr.msra.gmra.mrb[24].mxu0 %vm2498_vm1, %v2682_v41 }
 0x5e5   :  { %3852 = vmatprep.mubr.bf16.mxu0 %v7156_v3 }
 0x65f   :  { %v5212_v16 = vpop.f32.mrb[16].mxu1 }
 0x660   :  { %v2727_v50 = vpop.f32.mrb[17].mxu1 }
 0x661   :  { %v5213_v49 = vpop.f32.mrb[18].mxu1 }
 0x662   :  { %v2730_v48 = vpop.f32.mrb[19].mxu1 }
 0x665   :  { %v5218_v39 = vpop.f32.mrb[20].mxu0 }
 0x666   :  { %v2923_v55 = vcombine.low %v5212_v16, %v5218_v39  ;;  %v2924_v32 = vcombine.high %v5212_v16, %v5218_v39  ;;  %v2782_v22 = vpop.f32.mrb[21].mxu0 }
 0x667   :  { %v2907_v60 = vcombine.low %v2727_v50, %v2782_v22  ;;  %v2908_v9 = vcombine.high %v2727_v50, %v2782_v22  ;;  %v5219_v4 = vpop.f32.mrb[22].mxu0 }
 0x668   :  { %v2931_v21 = vrot.slane %v2923_v55, %v6199_v58  ;;  %v2938_v47 = vrot.slane %v2924_v32, %v6199_v58  ;;  %v2991_v62 = vcombine.low %v5213_v49, %v5219_v4  ;;  %v2992_v45 = vcombine.high %v5213_v49, %v5219_v4  ;;  %v2785_v42 = vpop.f32.mrb[23].mxu0 }
 0x669   :  { %v2915_v28 = vrot.slane %v2907_v60, %v6199_v58  ;;  %v2922_v26 = vrot.slane %v2908_v9, %v6199_v58  ;;  %v2975_v54 = vcombine.low %v2730_v48, %v2785_v42  ;;  %v2976_v24 = vcombine.high %v2730_v48, %v2785_v42 }
 0x66a   :  { %v2999_v35 = vrot.slane %v2991_v62, %v6199_v58  ;;  %v3006_v44 = vrot.slane %v2992_v45, %v6199_v58 }
 0x66b   :  { %v2939_v52 = vcombine.low %v2915_v28, %v2931_v21  ;;  %v2940_v8 = vcombine.high %v2915_v28, %v2931_v21  ;;  %v2955_v31 = vcombine.low %v2922_v26, %v2938_v47  ;;  %v2956_v11 = vcombine.high %v2922_v26, %v2938_v47 }
 0x66c   :  { %v2983_v43 = vrot.slane %v2975_v54, %v6199_v58  ;;  %v2990_v30 = vrot.slane %v2976_v24, %v6199_v58 }
 0x66d   :  { %v2947_v14 = vrot.slane %v2939_v52, %v6210_v1  ;;  %v2954_v53 = vrot.slane %v2940_v8, %v6210_v1  ;;  %v2963_v51 = vrot.slane %v2955_v31, %v6210_v1  ;;  %v2970_v57 = vrot.slane %v2956_v11, %v6210_v1 }
 0x66e   :  { %v3007_v61 = vcombine.low %v2983_v43, %v2999_v35  ;;  %v3008_v19 = vcombine.high %v2983_v43, %v2999_v35  ;;  %v3023_v29 = vcombine.low %v2990_v30, %v3006_v44  ;;  %v3024_v34 = vcombine.high %v2990_v30, %v3006_v44 }
 0x66f   :  { %v3179_v7 = vcombine.low %v2947_v14, %v2954_v53  ;;  %v4946_v46 = vcombine.high %v2947_v14, %v2954_v53  ;;  %v3195_v33 = vcombine.low %v2963_v51, %v2970_v57  ;;  %v4947_v59 = vcombine.high %v2963_v51, %v2970_v57 }
 0x670   :  { %v3015_v63 = vrot.slane %v3007_v61, %v6210_v1  ;;  %v3022_v27 = vrot.slane %v3008_v19, %v6210_v1  ;;  %v3031_v17 = vrot.slane %v3023_v29, %v6210_v1  ;;  %v3038_v2 = vrot.slane %v3024_v34, %v6210_v1  ;;  %v5385_v61 = vld [vmem:[#allocation11] sm:$0xff]   ;;  %v5386_v19 = vld [vmem:[#allocation11 + $0x8] sm:$0xff]   ;;  %v5387_v29 = vld [vmem:[#allocation11 + $0x10] sm:$0xff]  }
 0x671   :  { %v3186_v18 = vrot.slane %v3179_v7, %v6199_v58  ;;  %v3194_v0 = vrot.slane %v4946_v46, %v6199_v58  ;;  %v3202_v56 = vrot.slane %v3195_v33, %v6199_v58  ;;  %v3210_v12 = vrot.slane %v4947_v59, %v6199_v58  ;;  %5232 = vmatprep.subr.bf16.mxu1 %v5385_v61  ;;  %v5388_v34 = vld [vmem:[#allocation11 + $0x18] sm:$0xff]   ;;  %v5389_v7 = vld [vmem:[#allocation11 + $0x20] sm:$0xff]  }
 0x672   :  { %v3247_v13 = vcombine.low %v3015_v63, %v3022_v27  ;;  %v4948_v37 = vcombine.high %v3015_v63, %v3022_v27  ;;  %v3263_v41 = vcombine.low %v3031_v17, %v3038_v2  ;;  %v4949_v16 = vcombine.high %v3031_v17, %v3038_v2  ;;  %5233 = vmatpush3.bf16.msra.mxu1 %v5385_v61 }
 0x673   :  { %v3211_v50 = vcombine.low %v3186_v18, %v3194_v0  ;;  %v3227_v49 = vcombine.low %v3202_v56, %v3210_v12  ;;  %v3212_v48 = vcombine.high %v3186_v18, %v3194_v0  ;;  %v3228_v39 = vcombine.high %v3202_v56, %v3210_v12  ;;  %5234 = vmatprep.subr.bf16.mxu1 %v5386_v19 }
 0x674   :  { %v3254_v55 = vrot.slane %v3247_v13, %v6199_v58  ;;  %v3262_v32 = vrot.slane %v4948_v37, %v6199_v58  ;;  %v3270_v22 = vrot.slane %v3263_v41, %v6199_v58  ;;  %v3278_v60 = vrot.slane %v4949_v16, %v6199_v58 }
 0x675   :  { %v6774_v9 = vrot.slane %v3211_v50, %v6210_v1  ;;  %v6777_v4 = vrot.slane %v3227_v49, %v6210_v1  ;;  %v3226_v21 = vrot.slane %v3212_v48, %v6210_v1  ;;  %v3242_v47 = vrot.slane %v3228_v39, %v6210_v1 }
 0x676   :  { %v3279_v62 = vcombine.low %v3254_v55, %v3262_v32  ;;  %v3295_v45 = vcombine.low %v3270_v22, %v3278_v60  ;;  %v3280_v42 = vcombine.high %v3254_v55, %v3262_v32  ;;  %v3296_v28 = vcombine.high %v3270_v22, %v3278_v60  ;;  %5235 = vmatpush3.bf16.msra.mxu1 %v5386_v19 }
 0x677   :  { %v3243_v26 = vcombine.low %v6774_v9, %v6777_v4  ;;  %v3244_v54 = vcombine.high %v6774_v9, %v6777_v4  ;;  %v3245_v24 = vcombine.low %v3226_v21, %v3242_v47  ;;  %v3246_v35 = vcombine.high %v3226_v21, %v3242_v47  ;;  %5236 = vmatprep.subr.bf16.mxu1 %v5387_v29 }
 0x678   :  { %v6786_v44 = vrot.slane %v3279_v62, %v6210_v1  ;;  %v6789_v52 = vrot.slane %v3295_v45, %v6210_v1  ;;  %v3294_v8 = vrot.slane %v3280_v42, %v6210_v1  ;;  %v3310_v31 = vrot.slane %v3296_v28, %v6210_v1 }
 0x67a   :  { %v3312_v11 = vcombine.high %v6786_v44, %v6789_v52  ;;  %v3311_v43 = vcombine.low %v6786_v44, %v6789_v52  ;;  %v3313_v30 = vcombine.low %v3294_v8, %v3310_v31  ;;  %v3314_v14 = vcombine.high %v3294_v8, %v3310_v31  ;;  %5237 = vmatpush3.bf16.msra.mxu1 %v5387_v29 }
 0x67b   :  { %5238 = vmatprep.subr.bf16.mxu1 %v5388_v34 }
 0x67c   :  { %v5299_v53 = vpack.i.bf16 %v3312_v11, %v3244_v54  ;;  %v5304_v51 = vpack.i.bf16 %v3313_v30, %v3245_v24  ;;  %v5309_v57 = vpack.i.bf16 %v3314_v14, %v3246_v35 }
 0x67e   :  { %5300 = vrot.lane.b32.xlu0 %v5299_v53, %s5849_s11  ;;  %5239 = vmatpush3.bf16.msra.mxu1 %v5388_v34 }
 0x67f   :  { %5240 = vmatprep.subr.bf16.mxu1 %v5389_v7 }
 0x682   :  { %5305 = vrot.lane.b32.xlu0 %v5304_v51, %s7154_s27  ;;  %5241 = vmatpush3.bf16.msra.mxu1 %v5389_v7 }
 0x686   :  { %5310 = vrot.lane.b32.xlu0 %v5309_v57, %s5848_s20 }
 0x6b7   :  { %v5224_v46 = vpop.f32.mrb[20].mxu1  ;;  %v5230_v33 = vpop.f32.mrb[24].mxu0 }
 0x6b8   :  { %v3059_v59 = vcombine.low %v5224_v46, %v5230_v33  ;;  %v3060_v63 = vcombine.high %v5224_v46, %v5230_v33  ;;  %v2837_v27 = vpop.f32.mrb[21].mxu1  ;;  %v2892_v17 = vpop.f32.mrb[25].mxu0 }
 0x6b9   :  { %v3043_v2 = vcombine.low %v2837_v27, %v2892_v17  ;;  %v3044_v18 = vcombine.high %v2837_v27, %v2892_v17  ;;  %v5225_v0 = vpop.f32.mrb[22].mxu1  ;;  %v5231_v56 = vpop.f32.mrb[26].mxu0 }
 0x6ba   :  { %v3067_v12 = vrot.slane %v3059_v59, %v6199_v58  ;;  %v3074_v13 = vrot.slane %v3060_v63, %v6199_v58  ;;  %v3127_v37 = vcombine.low %v5225_v0, %v5231_v56  ;;  %v3128_v41 = vcombine.high %v5225_v0, %v5231_v56  ;;  %v2840_v16 = vpop.f32.mrb[23].mxu1  ;;  %v2895_v50 = vpop.f32.mrb[27].mxu0 }
 0x6bb   :  { %v3051_v49 = vrot.slane %v3043_v2, %v6199_v58  ;;  %v3058_v48 = vrot.slane %v3044_v18, %v6199_v58  ;;  %v3111_v39 = vcombine.low %v2840_v16, %v2895_v50  ;;  %v3112_v55 = vcombine.high %v2840_v16, %v2895_v50 }
 0x6bc   :  { %v3135_v32 = vrot.slane %v3127_v37, %v6199_v58  ;;  %v3142_v22 = vrot.slane %v3128_v41, %v6199_v58 }
 0x6bd   :  { %v3075_v60 = vcombine.low %v3051_v49, %v3067_v12  ;;  %v3076_v21 = vcombine.high %v3051_v49, %v3067_v12  ;;  %v3091_v47 = vcombine.low %v3058_v48, %v3074_v13  ;;  %v3092_v62 = vcombine.high %v3058_v48, %v3074_v13  ;;  %v5390_v13 = vld [vmem:[#allocation11 + $0x28] sm:$0xff]  }
 0x6be   :  { %v3119_v45 = vrot.slane %v3111_v39, %v6199_v58  ;;  %v3126_v42 = vrot.slane %v3112_v55, %v6199_v58  ;;  %5242 = vmatprep.subr.bf16.mxu1 %v5390_v13 }
 0x6bf   :  { %v3083_v28 = vrot.slane %v3075_v60, %v6210_v1  ;;  %v3090_v54 = vrot.slane %v3076_v21, %v6210_v1  ;;  %v3099_v24 = vrot.slane %v3091_v47, %v6210_v1  ;;  %v3106_v35 = vrot.slane %v3092_v62, %v6210_v1  ;;  %5243 = vmatpush3.bf16.msra.mxu1 %v5390_v13 }
 0x6c0   :  { %v3143_v8 = vcombine.low %v3119_v45, %v3135_v32  ;;  %v3144_v31 = vcombine.high %v3119_v45, %v3135_v32  ;;  %v3159_v11 = vcombine.low %v3126_v42, %v3142_v22  ;;  %v3160_v30 = vcombine.high %v3126_v42, %v3142_v22 }
 0x6c1   :  { %v3315_v14 = vcombine.low %v3083_v28, %v3090_v54  ;;  %v4950_v53 = vcombine.high %v3083_v28, %v3090_v54  ;;  %v3331_v51 = vcombine.low %v3099_v24, %v3106_v35  ;;  %v4951_v57 = vcombine.high %v3099_v24, %v3106_v35  ;;  %v5391_v28 = vld [vmem:[#allocation11 + $0x30] sm:$0xff]  }
 0x6c2   :  { %v3151_v61 = vrot.slane %v3143_v8, %v6210_v1  ;;  %v3158_v19 = vrot.slane %v3144_v31, %v6210_v1  ;;  %v3167_v29 = vrot.slane %v3159_v11, %v6210_v1  ;;  %v3174_v34 = vrot.slane %v3160_v30, %v6210_v1  ;;  %5244 = vmatprep.subr.bf16.mxu1 %v5391_v28 }
 0x6c3   :  { %v3322_v7 = vrot.slane %v3315_v14, %v6199_v58  ;;  %v3330_v46 = vrot.slane %v4950_v53, %v6199_v58  ;;  %v3338_v33 = vrot.slane %v3331_v51, %v6199_v58  ;;  %v3346_v59 = vrot.slane %v4951_v57, %v6199_v58  ;;  %5245 = vmatpush3.bf16.msra.mxu1 %v5391_v28  ;;  %v5392_v57 = vld [vmem:[#allocation11 + $0x38] sm:$0xff]  }
 0x6c4   :  { %v3383_v63 = vcombine.low %v3151_v61, %v3158_v19  ;;  %v4952_v27 = vcombine.high %v3151_v61, %v3158_v19  ;;  %v3399_v17 = vcombine.low %v3167_v29, %v3174_v34  ;;  %v4953_v2 = vcombine.high %v3167_v29, %v3174_v34  ;;  %5246 = vmatprep.subr.bf16.mxu1 %v5392_v57  ;;  %v5400_v28 = vld [vmem:[#allocation8 + $0x30] ss:$12 sps:$4 sm:$0xff]  }
 0x6c5   :  { %v3347_v18 = vcombine.low %v3322_v7, %v3330_v46  ;;  %v3363_v0 = vcombine.low %v3338_v33, %v3346_v59  ;;  %v3348_v56 = vcombine.high %v3322_v7, %v3330_v46  ;;  %v3364_v12 = vcombine.high %v3338_v33, %v3346_v59 }
 0x6c6   :  { %v3390_v37 = vrot.slane %v3383_v63, %v6199_v58  ;;  %v3398_v41 = vrot.slane %v4952_v27, %v6199_v58  ;;  %v3406_v16 = vrot.slane %v3399_v17, %v6199_v58  ;;  %v3414_v50 = vrot.slane %v4953_v2, %v6199_v58 }
 0x6c7   :  { %v3355_v49 = vrot.slane %v3347_v18, %v6210_v1  ;;  %v3371_v48 = vrot.slane %v3363_v0, %v6210_v1  ;;  %v3362_v39 = vrot.slane %v3348_v56, %v6210_v1  ;;  %v3378_v55 = vrot.slane %v3364_v12, %v6210_v1  ;;  %5247 = vmatpush3.bf16.msra.mxu1 %v5392_v57  ;;  %v5416_v57 = vld [vmem:[#allocation8 + $0x90] ss:$12 sps:$4 sm:$0xff]  }
 0x6c8   :  { %v3415_v32 = vcombine.low %v3390_v37, %v3398_v41  ;;  %v3431_v22 = vcombine.low %v3406_v16, %v3414_v50  ;;  %v3416_v60 = vcombine.high %v3390_v37, %v3398_v41  ;;  %v3432_v21 = vcombine.high %v3406_v16, %v3414_v50 }
 0x6c9   :  { %v3379_v47 = vcombine.low %v3355_v49, %v3371_v48  ;;  %v3380_v62 = vcombine.high %v3355_v49, %v3371_v48  ;;  %v3381_v45 = vcombine.low %v3362_v39, %v3378_v55  ;;  %v3382_v42 = vcombine.high %v3362_v39, %v3378_v55 }
 0x6ca   :  { %v3423_v58 = vrot.slane %v3415_v32, %v6210_v1  ;;  %v3439_v54 = vrot.slane %v3431_v22, %v6210_v1  ;;  %v3430_v24 = vrot.slane %v3416_v60, %v6210_v1  ;;  %v3446_v35 = vrot.slane %v3432_v21, %v6210_v1  ;;  %v5393_v32 = vld [vmem:[#allocation8] ss:$12 sps:$4 sm:$0xff]   ;;  %v5395_v22 = vld [vmem:[#allocation8 + $0x4] ss:$12 sps:$4 sm:$0xff]   ;;  %v5398_v60 = vld [vmem:[#allocation8 + $0x1c] ss:$12 sps:$4 sm:$0xff]  }
 0x6cb   :  { %v5399_v21 = vld [vmem:[#allocation8 + $0x8] ss:$12 sps:$4 sm:$0xff]   ;;  %3820 = vmatprep.subr.bf16.mxu0 %v5395_v22 }
 0x6cc   :  { %v3448_v8 = vcombine.high %v3423_v58, %v3439_v54  ;;  %v3447_v31 = vcombine.low %v3423_v58, %v3439_v54  ;;  %v3449_v11 = vcombine.low %v3430_v24, %v3446_v35  ;;  %v3450_v30 = vcombine.high %v3430_v24, %v3446_v35  ;;  %3821 = vmatpush1.bf16.msra.mxu0 %v5393_v32  ;;  %v5406_v58 = vld [vmem:[#allocation8 + $0x4c] ss:$12 sps:$4 sm:$0xff]   ;;  %v5411_v54 = vld [vmem:[#allocation8 + $0x50] ss:$12 sps:$4 sm:$0xff]   ;;  %v5404_v24 = vld [vmem:[#allocation8 + $0x48] ss:$12 sps:$4 sm:$0xff]  }
 0x6cd   :  { %5252 = vmatprep.subr.bf16.mxu1 %v5399_v21  ;;  %3822 = vmatprep.subr.bf16.mxu0 %v5398_v60  ;;  %v5410_v35 = vld [vmem:[#allocation8 + $0x64] ss:$12 sps:$4 sm:$0xff]  }
 0x6ce   :  { %v5314_v14 = vpack.i.bf16 %v3448_v8, %v3380_v62  ;;  %v5319_v53 = vpack.i.bf16 %v3449_v11, %v3381_v45  ;;  %v5324_v51 = vpack.i.bf16 %v3450_v30, %v3382_v42  ;;  %v5396_v62 = vld [vmem:[#allocation8 + $0x18] ss:$12 sps:$4 sm:$0xff]   ;;  %v5402_v45 = vld [vmem:[#allocation8 + $0x34] ss:$12 sps:$4 sm:$0xff]   ;;  %v5414_v11 = vld [vmem:[#allocation8 + $0x7c] ss:$12 sps:$4 sm:$0xff]  }
 0x6cf   :  { %v5407_v42 = vld [vmem:[#allocation8 + $0x38] ss:$12 sps:$4 sm:$0xff]   ;;  %v5415_v8 = vld [vmem:[#allocation8 + $0x68] ss:$12 sps:$4 sm:$0xff]   ;;  %v5419_v30 = vld [vmem:[#allocation8 + $0x80] ss:$12 sps:$4 sm:$0xff]  }
 0x6d0   :  { %5315 = vrot.lane.b32.xlu1 %v5314_v14, %s5849_s11  ;;  %3823 = vmatpush1.bf16.msra.mxu0 %v5396_v62  ;;  %v5412_v14 = vld [vmem:[#allocation8 + $0x78] ss:$12 sps:$4 sm:$0xff]  }
 0x6d1   :  { %3824 = vmatprep.subr.bf16.mxu0 %v5402_v45  ;;  %v5431_v45 = vld [vmem:[#allocation13 + $0x20] ss:$16 sps:$4 sm:$0xff]  }
 0x6d4   :  { %5320 = vrot.lane.b32.xlu1 %v5319_v53, %s7154_s27  ;;  %3825 = vmatpush1.bf16.msra.mxu0 %v5400_v28  ;;  %v5418_v53 = vld [vmem:[#allocation8 + $0x94] ss:$12 sps:$4 sm:$0xff]   ;;  %v5434_v28 = vld [vmem:[#allocation13 + $0x28] ss:$16 sps:$4 sm:$0xff]  }
 0x6d5   :  { %3826 = vmatprep.subr.bf16.mxu0 %v5406_v58  ;;  %v5436_v58 = vld [vmem:[#allocation13 + $0x2c] ss:$16 sps:$4 sm:$0xff]  }
 0x6d8   :  { %5325 = vrot.lane.b32.xlu1 %v5324_v51, %s5848_s20  ;;  %3827 = vmatpush1.bf16.msra.mxu0 %v5404_v24  ;;  %v5423_v51 = vld [vmem:[#allocation8 + $0x98] ss:$12 sps:$4 sm:$0xff]  }
 0x6d9   :  { %3828 = vmatprep.subr.bf16.mxu0 %v5410_v35  ;;  %v5439_v24 = vld [vmem:[#allocation13 + $0x44] ss:$16 sps:$4 sm:$0xff]   ;;  %v5440_v35 = vld [vmem:[#allocation13 + $0x48] ss:$16 sps:$4 sm:$0xff]  }
 0x6f0   :  { %v5301_v61 = vpop.permute.xlu0 %5300 }
 0x6f1   :  { %v5303_v19 = vunpack.i.h.bf16 %v5301_v61  ;;  %v5302_v29 = vunpack.i.l.bf16 %v5301_v61  ;;  %v5422_v61 = vld [vmem:[#allocation8 + $0xac] ss:$12 sps:$4 sm:$0xff]  }
 0x6f3   :  { %v3500_v33 = vsel %vm2265_vm0, %v3311_v43, %v5303_v19  ;;  %v3499_v59 = vsel %vm2265_vm0, %v3243_v26, %v5302_v29  ;;  %v5420_v19 = vld [vmem:[#allocation8 + $0xa8] ss:$12 sps:$4 sm:$0xff]   ;;  %v4954_v29 = vld [vmem:[%s7121_s13] ss:$0 sm:$0xff] }
 0x6f4   :  { %v5306_v1 = vpop.permute.xlu0 %5305 }
 0x6f5   :  { %v5308_v34 = vunpack.i.h.bf16 %v5306_v1  ;;  %v5307_v7 = vunpack.i.l.bf16 %v5306_v1  ;;  %v5424_v1 = vld [vmem:[#allocation8 + $0xb0] ss:$12 sps:$4 sm:$0xff]  }
 0x6f7   :  { %v3504_v17 = vsel %vm3503_vm2, %v3499_v59, %v5307_v7  ;;  %v3505_v2 = vsel %vm3503_vm2, %v3500_v33, %v5308_v34 }
 0x6f8   :  { %v5311_v46 = vpop.permute.xlu0 %5310 }
 0x6f9   :  { %v5313_v63 = vunpack.i.h.bf16 %v5311_v46  ;;  %v5312_v27 = vunpack.i.l.bf16 %v5311_v46 }
 0x6fb   :  { %v3509_v18 = vsel %vm3508_vm3, %v3504_v17, %v5312_v27  ;;  %v3510_v0 = vsel %vm3508_vm3, %v3505_v2, %v5313_v63 }
 0x6fc   :  { %v3513_v56 = vpack.c.bf16 %v3510_v0, %v3509_v18  ;;  %v5617_v0 = vld [vmem:[#allocation2] sm:$0xff] }
 0x6fe   :  { %5248 = vmatprep.mubr.bf16.mxu1 %v3513_v56 }
 0x742   :  { %v5316_v44 = vpop.permute.xlu1 %5315 }
 0x743   :  { %v5318_v43 = vunpack.i.h.bf16 %v5316_v44  ;;  %v5317_v12 = vunpack.i.l.bf16 %v5316_v44  ;;  %v5618_v44 = vld [vmem:[#allocation2 + $0x8] sm:$0xff] }
 0x745   :  { %v3501_v26 = vsel %vm2265_vm0, %v3379_v47, %v5317_v12  ;;  %v3502_v37 = vsel %vm2265_vm0, %v3447_v31, %v5318_v43  ;;  %v5403_v47 = vld [vmem:[#allocation8 + $0x20] ss:$12 sps:$4 sm:$0xff]  }
 0x746   :  { %v5321_v52 = vpop.permute.xlu1 %5320  ;;  %v5408_v31 = vld [vmem:[#allocation8 + $0x60] ss:$12 sps:$4 sm:$0xff]  }
 0x747   :  { %v5323_v13 = vunpack.i.h.bf16 %v5321_v52  ;;  %v5322_v9 = vunpack.i.l.bf16 %v5321_v52  ;;  %3829 = vmatpush1.bf16.msra.mxu0 %v5408_v31  ;;  %v5443_v31 = vld [vmem:[#allocation13 + $0x60] ss:$16 sps:$4 sm:$0xff]  }
 0x748   :  { %3830 = vmatprep.subr.bf16.mxu0 %v5414_v11  ;;  %v5445_v11 = vld [vmem:[#allocation13 + $0x64] ss:$16 sps:$4 sm:$0xff]  }
 0x749   :  { %v3506_v50 = vsel %vm3503_vm2, %v3501_v26, %v5322_v9  ;;  %v3507_v49 = vsel %vm3503_vm2, %v3502_v37, %v5323_v13  ;;  %v5428_v13 = vld [vmem:[#allocation13 + $0x8] ss:$16 sps:$4 sm:$0xff]   ;;  %v5430_v9 = vld [vmem:[#allocation13 + $0xc] ss:$16 sps:$4 sm:$0xff]  }
 0x74a   :  { %v5326_v4 = vpop.permute.xlu1 %5325 }
 0x74b   :  { %v5328_v41 = vunpack.i.h.bf16 %v5326_v4  ;;  %v5327_v16 = vunpack.i.l.bf16 %v5326_v4  ;;  %3831 = vmatpush1.bf16.msra.mxu0 %v5412_v14  ;;  %v5448_v14 = vld [vmem:[#allocation13 + $0x6c] ss:$16 sps:$4 sm:$0xff]  }
 0x74c   :  { %3832 = vmatprep.subr.bf16.mxu0 %v5418_v53  ;;  %v5451_v53 = vld [vmem:[#allocation13 + $0x84] ss:$16 sps:$4 sm:$0xff]  }
 0x74d   :  { %v3511_v48 = vsel %vm3508_vm3, %v3506_v50, %v5327_v16  ;;  %v3512_v39 = vsel %vm3508_vm3, %v3507_v49, %v5328_v41 }
 0x74e   :  { %v3514_v55 = vpack.c.bf16 %v3512_v39, %v3511_v48 }
 0x74f   :  { %3833 = vmatpush1.bf16.msra.mxu0 %v5416_v57  ;;  %v6902_v57 = vld [vmem:[%s7113_s5] sm:$0x7] }
 0x750   :  { %5249 = vmatmul.mubr.bf16.vlgmr.msra.gmra.mrb[24].mxu1 %v3514_v55  ;;  %3834 = vmatprep.subr.bf16.mxu0 %v5422_v61  ;;  %v5449_v61 = vld [vmem:[#allocation13 + $0x80] ss:$16 sps:$4 sm:$0xff]  }
 0x751   :  { %5268 = vmatprep.mubr.bf16.mxu1 %v6079_v25  ;;  %5253 = vmatpush3.bf16.msra.mxu1 %v5399_v21 }
 0x752   :  { %5254 = vmatprep.subr.bf16.mxu1 %v5403_v47 }
 0x753   :  { %3835 = vmatpush1.bf16.msra.mxu0 %v5420_v19 }
 0x755   :  { %5255 = vmatpush3.bf16.msra.mxu1 %v5403_v47 }
 0x756   :  { %5256 = vmatprep.subr.bf16.mxu1 %v5407_v42  ;;  %3853 = vmatmul.mubr.bf16.vlgmr.msra.gmra.mrb[28].mxu0 %v6079_v25 }
 0x757   :  { %3862 = vmatprep.mubr.bf16.mxu0 %v7156_v3 }
 0x759   :  { %5257 = vmatpush3.bf16.msra.mxu1 %v5407_v42  ;;  %v5433_v42 = vld [vmem:[#allocation13 + $0x24] ss:$16 sps:$4 sm:$0xff]  }
 0x75a   :  { %5258 = vmatprep.subr.bf16.mxu1 %v5411_v54 }
 0x75d   :  { %5259 = vmatpush3.bf16.msra.mxu1 %v5411_v54  ;;  %v5437_v54 = vld [vmem:[#allocation13 + $0x40] ss:$16 sps:$4 sm:$0xff]  }
 0x75e   :  { %5260 = vmatprep.subr.bf16.mxu1 %v5415_v8  ;;  %3863 = vmatmul.mubr.bf16.gmra.mrb[32].mxu0 %v6082_v36 }
 0x75f   :  { %4244 = vmatprep.mubr.bf16.mxu0 %v7156_v3 }
 0x761   :  { %5261 = vmatpush3.bf16.msra.mxu1 %v5415_v8  ;;  %v5442_v8 = vld [vmem:[#allocation13 + $0x4c] ss:$16 sps:$4 sm:$0xff]  }
 0x762   :  { %5262 = vmatprep.subr.bf16.mxu1 %v5419_v30 }
 0x765   :  { %5263 = vmatpush3.bf16.msra.mxu1 %v5419_v30  ;;  %v5446_v30 = vld [vmem:[#allocation13 + $0x68] ss:$16 sps:$4 sm:$0xff]  }
 0x766   :  { %5264 = vmatprep.subr.bf16.mxu1 %v5423_v51 }
 0x769   :  { %5265 = vmatpush3.bf16.msra.mxu1 %v5423_v51  ;;  %v5454_v51 = vld [vmem:[#allocation13 + $0x8c] ss:$16 sps:$4 sm:$0xff]  }
 0x76a   :  { %5266 = vmatprep.subr.bf16.mxu1 %v5424_v1 }
 0x76d   :  { %5267 = vmatpush3.bf16.msra.mxu1 %v5424_v1  ;;  %v3680_v1 = vrot.slane %v6902_v57, %v6112_v6 }
 0x76e   :  { %4265 = vmatprep.subr.bf16.mxu1 %v5430_v9 }
 0x770   :  { %5269 = vmatmul.mubr.bf16.vlgmr.msra.gmra.mrb[28].mxu1 %v6082_v36 }
 0x771   :  { %4297 = vmatprep.mubr.bf16.mxu1 %v7156_v3  ;;  %4266 = vmatpush1.bf16.msra.mxu1 %v5428_v13 }
 0x772   :  { %4267 = vmatprep.subr.bf16.mxu1 %v5436_v58 }
 0x775   :  { %4268 = vmatpush1.bf16.msra.mxu1 %v5434_v28 }
 0x776   :  { %4269 = vmatprep.subr.bf16.mxu1 %v5442_v8  ;;  %v3684_v8 = vrot.slane %v6902_v57, %v6127_v38 }
 0x779   :  { %4270 = vmatpush1.bf16.msra.mxu1 %v5440_v35 }
 0x77a   :  { %4271 = vmatprep.subr.bf16.mxu1 %v5448_v14  ;;  %v3688_v14 = vrot.slane %v6902_v57, %v6130_v40 }
 0x77d   :  { %4272 = vmatpush1.bf16.msra.mxu1 %v5446_v30 }
 0x77e   :  { %4273 = vmatprep.subr.bf16.mxu1 %v5454_v51  ;;  %v4988_v51 = vld [vmem:[%s7117_s9] ss:$0 sm:$0xff] }
 0x823   :  { %v5250_v34 = vpop.f32.mrb[24].mxu1 }
 0x824   :  { %v3629_v7 = vadd.f32 %v5250_v34, %v4954_v29  ;;  %v3620_v46 = vpop.f32.mrb[25].mxu1  ;;  %v5457_v34 = vld [vmem:[#allocation13 + $0xa4] ss:$16 sps:$4 sm:$0xff]  }
 0x825   :  { %v3621_v33 = vadd.f32 %v4954_v29, %v3620_v46  ;;  %v5251_v59 = vpop.f32.mrb[26].mxu1 }
 0x826   :  { %v3637_v25 = vmul.f32 %v3629_v7, %v6122_v20  ;;  %v3632_v63 = vadd.f32 %v5251_v59, %v4954_v29  ;;  %v3623_v27 = vpop.f32.mrb[27].mxu1  ;;  %v5619_v20 = vld [vmem:[#allocation2 + $0x10] sm:$0xff] }
 0x827   :  { %v3635_v17 = vmul.f32 %v3621_v33, %v6118_v10  ;;  %v3624_v2 = vadd.f32 %v4954_v29, %v3623_v27  ;;  %v5620_v10 = vld [vmem:[#allocation2 + $0x18] sm:$0xff]  ;;  %v5455_v59 = vld [vmem:[#allocation13 + $0xa0] ss:$16 sps:$4 sm:$0xff]  }
 0x828   :  { %v3638_v36 = vmul.f32 %v3632_v63, %v6124_v23  ;;  %v6873_v43 = vadd.f32 %v5619_v20, %v3637_v25  ;;  %v5427_v23 = vld [vmem:[#allocation13 + $0x4] ss:$16 sps:$4 sm:$0xff]   ;;  %v5452_v29 = vld [vmem:[#allocation13 + $0x88] ss:$16 sps:$4 sm:$0xff]   ;;  %v5460_v33 = vld [vmem:[#allocation13 + $0xac] ss:$16 sps:$4 sm:$0xff]  }
 0x829   :  { %v3636_v18 = vmul.f32 %v3624_v2, %v6120_v15  ;;  %v6867_v56 = vadd.f32 %v5617_v0, %v3635_v17  ;;  %v5425_v15 = vld [vmem:[#allocation13] ss:$16 sps:$4 sm:$0xff]   ;;  %4212 = vmatprep.subr.bf16.mxu0 %v5427_v23  ;;  %v3854_v19 = vpop.f32.mrb[28].mxu0  ;;  %4274 = vmatpush1.bf16.msra.mxu1 %v5452_v29  ;;  %v5458_v25 = vld [vmem:[#allocation13 + $0xa8] ss:$16 sps:$4 sm:$0xff]  }
 0x82a   :  { %v6876_v12 = vadd.f32 %v5620_v10, %v3638_v36  ;;  %4213 = vmatpush1.bf16.msra.mxu0 %v5425_v15  ;;  %v6906_v7 = vpop.f32.mrb[29].mxu0  ;;  %v6908_v46 = vadd.f32 %v3854_v19, %v3680_v1  ;;  %4275 = vmatprep.subr.bf16.mxu1 %v5460_v33  ;;  %v5461_v0 = vld [vmem:[#allocation13 + $0xc0] ss:$16 sps:$4 sm:$0xff]   ;;  %v5464_v15 = vld [vmem:[#allocation13 + $0xc8] ss:$16 sps:$4 sm:$0xff]  }
 0x82b   :  { %3924 = vadd.xlane.f32.xlu0 %v6867_v56  ;;  %v6870_v52 = vadd.f32 %v5618_v44, %v3636_v18  ;;  %4214 = vmatprep.subr.bf16.mxu0 %v5433_v42  ;;  %v3858_v63 = vpop.f32.mrb[30].mxu0  ;;  %v5463_v44 = vld [vmem:[#allocation13 + $0xc4] ss:$16 sps:$4 sm:$0xff]   ;;  %v5466_v23 = vld [vmem:[#allocation13 + $0xcc] ss:$16 sps:$4 sm:$0xff]  }
 0x82c   :  { %v6912_v17 = vadd.f32 %v3858_v63, %v3680_v1  ;;  %v3860_v2 = vpop.f32.mrb[31].mxu0 }
 0x82d   :  { %3926 = vadd.xlane.f32.xlu1 %v6870_v52  ;;  %4276 = vmatpush1.bf16.msra.mxu1 %v5458_v25 }
 0x82e   :  { %4215 = vmatpush1.bf16.msra.mxu0 %v5431_v45  ;;  %4277 = vmatprep.subr.bf16.mxu1 %v5466_v23 }
 0x82f   :  { %3928 = vadd.xlane.f32.xlu0 %v6873_v43  ;;  %4216 = vmatprep.subr.bf16.mxu0 %v5439_v24 }
 0x831   :  { %v3864_v18 = vpop.f32.mrb[32].mxu0  ;;  %4278 = vmatpush1.bf16.msra.mxu1 %v5464_v15 }
 0x832   :  { %4217 = vmatpush1.bf16.msra.mxu0 %v5437_v54  ;;  %v6914_v20 = vadd.f32 %v3864_v18, %v3680_v1  ;;  %v3866_v13 = vpop.f32.mrb[33].mxu0 }
 0x833   :  { %3930 = vadd.xlane.f32.xlu0 %v6876_v12  ;;  %4218 = vmatprep.subr.bf16.mxu0 %v5445_v11  ;;  %v4987_v11 = vld [vmem:[%s7116_s8] ss:$0 sm:$0xff]  ;;  %v3867_v57 = vadd.f32 %v3866_v13, %v3684_v8 }
 0x836   :  { %4219 = vmatpush1.bf16.msra.mxu0 %v5443_v31 }
 0x837   :  { %4220 = vmatprep.subr.bf16.mxu0 %v5451_v53 }
 0x83a   :  { %4221 = vmatpush1.bf16.msra.mxu0 %v5449_v61  ;;  %v3857_v61 = vadd.f32 %v6906_v7, %v3684_v8 }
 0x83b   :  { %4222 = vmatprep.subr.bf16.mxu0 %v5457_v34 }
 0x83e   :  { %4223 = vmatpush1.bf16.msra.mxu0 %v5455_v59 }
 0x83f   :  { %4224 = vmatprep.subr.bf16.mxu0 %v5463_v44 }
 0x842   :  { %4225 = vmatpush1.bf16.msra.mxu0 %v5461_v0 }
 0x843   :  { %v6910_v27 = vpop.f32.mrb[28].mxu1 }
 0x844   :  { %v3907_v36 = vpop.f32.mrb[29].mxu1 }
 0x845   :  { %v6916_v10 = vpop.f32.mrb[30].mxu1  ;;  %v3908_v59 = vadd.f32 %v3907_v36, %v3688_v14 }
 0x846   :  { %v3910_v9 = vpop.f32.mrb[31].mxu1 }
 0x847   :  { %v3911_v15 = vadd.f32 %v3910_v9, %v3688_v14 }
 0x8b8   :  { %v3925_v4 = vpop.xlane.xlu0 %3924 }
 0x8b9   :  { %v3932_v26 = vmul.f32 0.0078125, %v3925_v4  ;;  %v3868_v4 = vpop.f32.mrb[34].mxu0 }
 0x8ba   :  { %v3927_v37 = vpop.xlane.xlu1 %3926 }
 0x8bb   :  { %v6880_v41 = vsub.f32 %v6867_v56, %v3932_v26  ;;  %v3933_v16 = vmul.f32 0.0078125, %v3927_v37  ;;  %v5467_v26 = vld [vmem:[#allocation13 + $0xe0] ss:$16 sps:$4 sm:$0xff]   ;;  %v5469_v37 = vld [vmem:[#allocation13 + $0xe4] ss:$16 sps:$4 sm:$0xff]  }
 0x8bc   :  { %v3929_v50 = vpop.xlane.xlu0 %3928  ;;  %4226 = vmatprep.subr.bf16.mxu0 %v5469_v37 }
 0x8bd   :  { %v6883_v49 = vsub.f32 %v6870_v52, %v3933_v16  ;;  %v3934_v48 = vmul.f32 0.0078125, %v3929_v50  ;;  %v3940_v39 = vmul.f32 %v6880_v41, %v6880_v41  ;;  %v6918_v16 = vadd.f32 %v3868_v4, %v3680_v1  ;;  %v5470_v50 = vld [vmem:[#allocation13 + $0xe8] ss:$16 sps:$4 sm:$0xff]   ;;  %4227 = vmatpush1.bf16.msra.mxu0 %v5467_v26 }
 0x8bf   :  { %v6888_v55 = vsub.f32 %v6873_v43, %v3934_v48  ;;  %3944 = vadd.xlane.f32.xlu0 %v3940_v39  ;;  %v3941_v32 = vmul.f32 %v6883_v49, %v6883_v49  ;;  %v5472_v48 = vld [vmem:[#allocation13 + $0xec] ss:$16 sps:$4 sm:$0xff]   ;;  %v3870_v39 = vpop.f32.mrb[35].mxu0 }
 0x8c0   :  { %v3931_v22 = vpop.xlane.xlu0 %3930  ;;  %4279 = vmatprep.subr.bf16.mxu1 %v5472_v48  ;;  %v3871_v48 = vadd.f32 %v3870_v39, %v3684_v8  ;;  %v5475_v39 = vld [vmem:[#allocation14] sm:$0xff]  }
 0x8c1   :  { %v3935_v60 = vmul.f32 0.0078125, %v3931_v22  ;;  %3946 = vadd.xlane.f32.xlu1 %v3941_v32  ;;  %v3942_v21 = vmul.f32 %v6888_v55, %v6888_v55  ;;  %4280 = vmatpush1.bf16.msra.mxu1 %v5470_v50 }
 0x8c3   :  { %v6895_v47 = vsub.f32 %v6876_v12, %v3935_v60  ;;  %3948 = vadd.xlane.f32.xlu0 %v3942_v21 }
 0x8c5   :  { %v3943_v62 = vmul.f32 %v6895_v47, %v6895_v47 }
 0x8c7   :  { %3950 = vadd.xlane.f32.xlu1 %v3943_v62 }
 0x94c   :  { %v3945_v32 = vpop.xlane.xlu0 %3944 }
 0x94d   :  { %v3952_v22 = vmul.f32 0.0078125, %v3945_v32 }
 0x94e   :  { %v3947_v60 = vpop.xlane.xlu1 %3946 }
 0x94f   :  { %v3956_v21 = vadd.f32 1e-05, %v3952_v22  ;;  %v3953_v62 = vmul.f32 0.0078125, %v3947_v60  ;;  %v3919_v22 = vadd.f32 %v6916_v10, %v3688_v14  ;;  %v5474_v60 = vld [vmem:[#allocation14 + $0xc0] sm:$0xff]   ;;  %v5477_v10 = vld [vmem:[#allocation14 + $0x48] sm:$0xff]  }
 0x950   :  { %v3949_v45 = vpop.xlane.xlu0 %3948  ;;  %5136 = vmatprep.subr.bf16.mxu1 %v5474_v60 }
 0x951   :  { %5577 = vrsqrt.f32 %v3956_v21  ;;  %v3957_v42 = vadd.f32 1e-05, %v3953_v62  ;;  %v3954_v28 = vmul.f32 0.0078125, %v3949_v45  ;;  %v5476_v21 = vld [vmem:[#allocation14 + $0x80] sm:$0xff]   ;;  %v5478_v62 = vld [vmem:[#allocation14 + $0xc8] sm:$0xff]  }
 0x952   :  { %v5479_v45 = vld [vmem:[#allocation14 + $0x8] sm:$0xff]  }
 0x953   :  { %5579 = vrsqrt.f32 %v3957_v42  ;;  %v3958_v58 = vadd.f32 1e-05, %v3954_v28  ;;  %v5480_v42 = vld [vmem:[#allocation14 + $0x88] sm:$0xff]   ;;  %v5482_v28 = vld [vmem:[#allocation14 + $0xd0] sm:$0xff]  }
 0x954   :  { %v3951_v54 = vpop.xlane.xlu1 %3950 }
 0x955   :  { %5581 = vrsqrt.f32 %v3958_v58  ;;  %v3955_v24 = vmul.f32 0.0078125, %v3951_v54  ;;  %v5483_v58 = vld [vmem:[#allocation14 + $0x10] sm:$0xff]  }
 0x956   :  { %v5484_v54 = vld [vmem:[#allocation14 + $0x90] sm:$0xff]  }
 0x957   :  { %v3959_v35 = vadd.f32 1e-05, %v3955_v24  ;;  %v5485_v24 = vld [vmem:[#allocation14 + $0x58] sm:$0xff]  }
 0x959   :  { %5583 = vrsqrt.f32 %v3959_v35  ;;  %v5486_v35 = vld [vmem:[#allocation14 + $0xd8] sm:$0xff]  }
 0x95b   :  { %v5578_v31 = vpop.eup %5577 }
 0x95c   :  { %v3964_v30 = vmul.f32 %v5578_v31, %v6880_v41  ;;  %v3861_v41 = vadd.f32 %v3860_v2, %v3684_v8  ;;  %v5487_v8 = vld [vmem:[#allocation14 + $0x18] sm:$0xff]  }
 0x95d   :  { %v5580_v53 = vpop.eup %5579  ;;  %v5488_v31 = vld [vmem:[#allocation14 + $0x98] sm:$0xff]  }
 0x95e   :  { %v3974_v1 = vmul.f32 %v4987_v11, %v3964_v30  ;;  %v3965_v19 = vmul.f32 %v5580_v53, %v6883_v49  ;;  %v3916_v49 = vadd.f32 %v6910_v27, %v3688_v14  ;;  %v5473_v27 = vld [vmem:[#allocation14 + $0x40] sm:$0xff]  }
 0x95f   :  { %v5582_v29 = vpop.eup %5581  ;;  %5108 = vmatprep.subr.bf16.mxu0 %v5473_v27  ;;  %v5490_v30 = vld [vmem:[#allocation14 + $0xe0] sm:$0xff]  }
 0x960   :  { %v3984_v34 = vadd.f32 %v4988_v51, %v3974_v1  ;;  %v3975_v33 = vmul.f32 %v4987_v11, %v3965_v19  ;;  %v3966_v25 = vmul.f32 %v5582_v29, %v6888_v55  ;;  %v5491_v14 = vld [vmem:[#allocation14 + $0x20] sm:$0xff]   ;;  %v5495_v1 = vld [vmem:[#allocation14 + $0x28] sm:$0xff]   ;;  %v5497_v29 = vld [vmem:[#allocation14 + $0x70] sm:$0xff]  }
 0x961   :  { %v5492_v53 = vld [vmem:[#allocation14 + $0xa0] sm:$0xff]   ;;  %v5496_v19 = vld [vmem:[#allocation14 + $0xa8] sm:$0xff]  }
 0x962   :  { %v3988_v63 = vmul.f32 %v3984_v34, %v3857_v61  ;;  %v3985_v18 = vadd.f32 %v4988_v51, %v3975_v33  ;;  %v3976_v0 = vmul.f32 %v4987_v11, %v3966_v25  ;;  %v5494_v61 = vld [vmem:[#allocation14 + $0xe8] sm:$0xff]   ;;  %v5498_v34 = vld [vmem:[#allocation14 + $0xf0] sm:$0xff]   ;;  %v5501_v25 = vld [vmem:[#allocation14 + $0x78] sm:$0xff]  }
 0x963   :  { %v5584_v44 = vpop.eup %5583  ;;  %v5499_v33 = vld [vmem:[#allocation14 + $0x30] sm:$0xff]  }
 0x964   :  { %v3989_v23 = vmul.f32 %v3985_v18, %v3861_v41  ;;  %v3992_v4 = vadd.f32 %v3988_v63, %v3908_v59  ;;  %v3986_v26 = vadd.f32 %v4988_v51, %v3976_v0  ;;  %v3967_v7 = vmul.f32 %v5584_v44, %v6895_v47  ;;  %v5500_v59 = vld [vmem:[#allocation14 + $0xb0] sm:$0xff]   ;;  %v5502_v41 = vld [vmem:[#allocation14 + $0xf8] sm:$0xff]  }
 0x965   :  { %v5503_v63 = vld [vmem:[#allocation14 + $0x38] sm:$0xff]   ;;  %v4046_v0 = vsub.s32 3, %v6109_v5 }
 0x966   :  { %v3990_v37 = vmul.f32 %v3986_v26, %v3867_v57  ;;  %v3993_v50 = vadd.f32 %v3989_v23, %v3911_v15  ;;  %v3977_v36 = vmul.f32 %v4987_v11, %v3967_v7  ;;  %v5489_v11 = vld [vmem:[#allocation14 + $0x60] sm:$0xff]   ;;  %v5504_v18 = vld [vmem:[#allocation14 + $0xb8] sm:$0xff]  }
 0x967   :  { %v4030_v57 = vld [vmem:[%s7123_s15] sm:$0xf] }
 0x968   :  { %v3994_v32 = vadd.f32 %v3990_v37, %v3916_v49  ;;  %v3996_v55 = vpack.c.bf16 %v3993_v50, %v3992_v4  ;;  %v3987_v2 = vadd.f32 %v4988_v51, %v3977_v36  ;;  %v5493_v51 = vld [vmem:[#allocation14 + $0x68] sm:$0xff]   ;;  %v6944_v44 = vrot.slane %v4030_v57, %v6112_v6 }
 0x969   :  { %v6947_v15 = vrot.slane %v4030_v57, %v6130_v40  ;;  %v6950_v23 = vrot.slane %v4030_v57, %v6127_v38  ;;  %v6952_v4 = vrot.slane %v4030_v57, %v4046_v0 }
 0x96a   :  { %v3991_v13 = vmul.f32 %v3987_v2, %v3871_v48  ;;  %4245 = vmatmul.mubr.bf16.vlgmr.msra.gmra.mrb[36].mxu0 %v3996_v55  ;;  %4298 = vmatmul.mubr.bf16.vlgmr.msra.gmra.mrb[32].mxu1 %v3996_v55 }
 0x96b   :  { %4254 = vmatprep.mubr.bf16.mxu0 %v7156_v3  ;;  %4307 = vmatprep.mubr.bf16.mxu1 %v7156_v3  ;;  %v5481_v3 = vld [vmem:[#allocation14 + $0x50] sm:$0xff]  }
 0x96c   :  { %v3995_v9 = vadd.f32 %v3991_v13, %v3919_v22  ;;  %5109 = vmatpush3.bf16.msra.mxu0 %v5475_v39  ;;  %5137 = vmatpush3.bf16.msra.mxu1 %v5476_v21 }
 0x96d   :  { %5110 = vmatprep.subr.bf16.mxu0 %v5477_v10  ;;  %5138 = vmatprep.subr.bf16.mxu1 %v5478_v62 }
 0x96e   :  { %v3997_v47 = vpack.c.bf16 %v3995_v9, %v3994_v32 }
 0x970   :  { %5111 = vmatpush3.bf16.msra.mxu0 %v5479_v45  ;;  %5139 = vmatpush3.bf16.msra.mxu1 %v5480_v42 }
 0x971   :  { %5112 = vmatprep.subr.bf16.mxu0 %v5481_v3  ;;  %5140 = vmatprep.subr.bf16.mxu1 %v5482_v28 }
 0x972   :  { %4255 = vmatmul.mubr.bf16.gmra.mrb[40].mxu0 %v3997_v47  ;;  %4308 = vmatmul.mubr.bf16.gmra.mrb[36].mxu1 %v3997_v47 }
 0x974   :  { %5113 = vmatpush3.bf16.msra.mxu0 %v5483_v58  ;;  %5141 = vmatpush3.bf16.msra.mxu1 %v5484_v54 }
 0x975   :  { %5114 = vmatprep.subr.bf16.mxu0 %v5485_v24  ;;  %5142 = vmatprep.subr.bf16.mxu1 %v5486_v35 }
 0x978   :  { %5115 = vmatpush3.bf16.msra.mxu0 %v5487_v8  ;;  %5143 = vmatpush3.bf16.msra.mxu1 %v5488_v31 }
 0x979   :  { %5116 = vmatprep.subr.bf16.mxu0 %v5489_v11  ;;  %5144 = vmatprep.subr.bf16.mxu1 %v5490_v30 }
 0x97c   :  { %5117 = vmatpush3.bf16.msra.mxu0 %v5491_v14  ;;  %5145 = vmatpush3.bf16.msra.mxu1 %v5492_v53 }
 0x97d   :  { %5118 = vmatprep.subr.bf16.mxu0 %v5493_v51  ;;  %5146 = vmatprep.subr.bf16.mxu1 %v5494_v61 }
 0x980   :  { %5119 = vmatpush3.bf16.msra.mxu0 %v5495_v1  ;;  %5147 = vmatpush3.bf16.msra.mxu1 %v5496_v19 }
 0x981   :  { %5120 = vmatprep.subr.bf16.mxu0 %v5497_v29  ;;  %5148 = vmatprep.subr.bf16.mxu1 %v5498_v34 }
 0x984   :  { %5121 = vmatpush3.bf16.msra.mxu0 %v5499_v33  ;;  %5149 = vmatpush3.bf16.msra.mxu1 %v5500_v59 }
 0x985   :  { %5122 = vmatprep.subr.bf16.mxu0 %v5501_v25  ;;  %5150 = vmatprep.subr.bf16.mxu1 %v5502_v41 }
 0x988   :  { %5123 = vmatpush3.bf16.msra.mxu0 %v5503_v63  ;;  %5151 = vmatpush3.bf16.msra.mxu1 %v5504_v18 }
 0xa3d   :  { %v4246_v26 = vpop.f32.mrb[36].mxu0  ;;  %v4299_v7 = vpop.f32.mrb[32].mxu1 }
 0xa3e   :  { %v6955_v49 = vadd.f32 %v4246_v26, %v6944_v44  ;;  %v6958_v37 = vadd.f32 %v4299_v7, %v6947_v15  ;;  %v4248_v5 = vpop.f32.mrb[37].mxu0  ;;  %v4301_v50 = vpop.f32.mrb[33].mxu1 }
 0xa3f   :  { %v6961_v6 = vadd.f32 %v4248_v5, %v6950_v23  ;;  %v6964_v40 = vadd.f32 %v4301_v50, %v6952_v4  ;;  %v4250_v38 = vpop.f32.mrb[38].mxu0  ;;  %v4303_v48 = vpop.f32.mrb[34].mxu1 }
 0xa40   :  { %v4318_v36 = vmul.f32 %v6955_v49, %v6955_v49  ;;  %v4320_v32 = vmul.f32 %v6958_v37, %v6958_v37  ;;  %v6971_v55 = vadd.f32 %v4250_v38, %v6944_v44  ;;  %v6974_v2 = vadd.f32 %v4303_v48, %v6947_v15  ;;  %v4252_v22 = vpop.f32.mrb[39].mxu0  ;;  %v4305_v13 = vpop.f32.mrb[35].mxu1 }
 0xa41   :  { %v4319_v9 = vmul.f32 %v6961_v6, %v6961_v6  ;;  %v4321_v47 = vmul.f32 %v6964_v40, %v6964_v40  ;;  %v6981_v27 = vadd.f32 %v4252_v22, %v6950_v23  ;;  %v6984_v60 = vadd.f32 %v4305_v13, %v6952_v4 }
 0xa42   :  { %v4334_v39 = vmul.f32 %v4318_v36, %v6955_v49  ;;  %v4336_v21 = vmul.f32 %v4320_v32, %v6958_v37  ;;  %v4322_v10 = vmul.f32 %v6971_v55, %v6971_v55  ;;  %v4324_v62 = vmul.f32 %v6974_v2, %v6974_v2 }
 0xa43   :  { %v4335_v45 = vmul.f32 %v4319_v9, %v6961_v6  ;;  %v4337_v42 = vmul.f32 %v4321_v47, %v6964_v40  ;;  %v4323_v3 = vmul.f32 %v6981_v27, %v6981_v27  ;;  %v4325_v28 = vmul.f32 %v6984_v60, %v6984_v60 }
 0xa44   :  { %v4350_v58 = vmul.f32 0.044715, %v4334_v39  ;;  %v4352_v54 = vmul.f32 0.044715, %v4336_v21  ;;  %v4338_v24 = vmul.f32 %v4322_v10, %v6971_v55  ;;  %v4340_v35 = vmul.f32 %v4324_v62, %v6974_v2 }
 0xa45   :  { %v4351_v8 = vmul.f32 0.044715, %v4335_v45  ;;  %v4353_v31 = vmul.f32 0.044715, %v4337_v42  ;;  %v4339_v11 = vmul.f32 %v4323_v3, %v6981_v27  ;;  %v4341_v30 = vmul.f32 %v4325_v28, %v6984_v60  ;;  %v4256_v14 = vpop.f32.mrb[40].mxu0  ;;  %v4309_v53 = vpop.f32.mrb[36].mxu1 }
 0xa46   :  { %v4366_v51 = vadd.f32 %v4350_v58, %v6955_v49  ;;  %v4368_v61 = vadd.f32 %v4352_v54, %v6958_v37  ;;  %v4354_v1 = vmul.f32 0.044715, %v4338_v24  ;;  %v4356_v19 = vmul.f32 0.044715, %v4340_v35  ;;  %v4258_v29 = vpop.f32.mrb[41].mxu0  ;;  %v4311_v34 = vpop.f32.mrb[37].mxu1 }
 0xa47   :  { %v4367_v33 = vadd.f32 %v4351_v8, %v6961_v6  ;;  %v4369_v59 = vadd.f32 %v4353_v31, %v6964_v40  ;;  %v4355_v25 = vmul.f32 0.044715, %v4339_v11  ;;  %v4357_v41 = vmul.f32 0.044715, %v4341_v30  ;;  %v4260_v63 = vpop.f32.mrb[42].mxu0  ;;  %v4313_v18 = vpop.f32.mrb[38].mxu1 }
 0xa48   :  { %v4382_v57 = vmul.f32 0.7978846, %v4366_v51  ;;  %v4384_v0 = vmul.f32 0.7978846, %v4368_v61  ;;  %v4370_v26 = vadd.f32 %v4354_v1, %v6971_v55  ;;  %v4372_v7 = vadd.f32 %v4356_v19, %v6974_v2  ;;  %v4262_v5 = vpop.f32.mrb[43].mxu0  ;;  %v4315_v50 = vpop.f32.mrb[39].mxu1 }
 0xa49   :  { %v4383_v38 = vmul.f32 0.7978846, %v4367_v33  ;;  %v4385_v48 = vmul.f32 0.7978846, %v4369_v59  ;;  %v4371_v36 = vadd.f32 %v4355_v25, %v6981_v27  ;;  %v4373_v32 = vadd.f32 %v4357_v41, %v6984_v60 }
 0xa4a   :  { %5585 = vtanh.f32 %v4382_v57  ;;  %v4386_v22 = vmul.f32 0.7978846, %v4370_v26  ;;  %v4388_v13 = vmul.f32 0.7978846, %v4372_v7  ;;  %v7011_v9 = vadd.f32 %v4256_v14, %v6944_v44 }
 0xa4b   :  { %5587 = vtanh.f32 %v4384_v0  ;;  %v4387_v47 = vmul.f32 0.7978846, %v4371_v36  ;;  %v4389_v39 = vmul.f32 0.7978846, %v4373_v32  ;;  %v7014_v21 = vadd.f32 %v4309_v53, %v6947_v15 }
 0xa4c   :  { %5589 = vtanh.f32 %v4383_v38  ;;  %v4326_v10 = vmul.f32 %v7011_v9, %v7011_v9  ;;  %v7019_v62 = vadd.f32 %v4258_v29, %v6950_v23  ;;  %v7022_v45 = vadd.f32 %v4311_v34, %v6952_v4 }
 0xa4d   :  { %5591 = vtanh.f32 %v4385_v48  ;;  %v4328_v42 = vmul.f32 %v7014_v21, %v7014_v21  ;;  %v7027_v3 = vadd.f32 %v4260_v63, %v6944_v44  ;;  %v7030_v28 = vadd.f32 %v4313_v18, %v6947_v15 }
 0xa4e   :  { %5593 = vtanh.f32 %v4386_v22  ;;  %v4342_v58 = vmul.f32 %v4326_v10, %v7011_v9  ;;  %v4327_v54 = vmul.f32 %v7019_v62, %v7019_v62  ;;  %v4329_v24 = vmul.f32 %v7022_v45, %v7022_v45 }
 0xa4f   :  { %5595 = vtanh.f32 %v4388_v13  ;;  %v4344_v35 = vmul.f32 %v4328_v42, %v7014_v21  ;;  %v4330_v8 = vmul.f32 %v7027_v3, %v7027_v3  ;;  %v4332_v44 = vmul.f32 %v7030_v28, %v7030_v28 }
 0xa50   :  { %5597 = vtanh.f32 %v4387_v47  ;;  %v4358_v15 = vmul.f32 0.044715, %v4342_v58  ;;  %v4343_v31 = vmul.f32 %v4327_v54, %v7019_v62  ;;  %v4345_v11 = vmul.f32 %v4329_v24, %v7022_v45 }
 0xa51   :  { %5599 = vtanh.f32 %v4389_v39  ;;  %v4360_v30 = vmul.f32 0.044715, %v4344_v35  ;;  %v4346_v14 = vmul.f32 %v4330_v8, %v7027_v3  ;;  %v4348_v53 = vmul.f32 %v4332_v44, %v7030_v28 }
 0xa52   :  { %v4374_v51 = vadd.f32 %v4358_v15, %v7011_v9  ;;  %v4359_v61 = vmul.f32 0.044715, %v4343_v31  ;;  %v4361_v1 = vmul.f32 0.044715, %v4345_v11  ;;  %v7048_v19 = vadd.f32 %v4262_v5, %v6950_v23 }
 0xa53   :  { %v4376_v29 = vadd.f32 %v4360_v30, %v7014_v21  ;;  %v4362_v34 = vmul.f32 0.044715, %v4346_v14  ;;  %v4364_v33 = vmul.f32 0.044715, %v4348_v53  ;;  %v7052_v59 = vadd.f32 %v4315_v50, %v6952_v4 }
 0xa54   :  { %v5586_v25 = vpop.eup %5585  ;;  %v4390_v41 = vmul.f32 0.7978846, %v4374_v51  ;;  %v4375_v63 = vadd.f32 %v4359_v61, %v7019_v62  ;;  %v4377_v18 = vadd.f32 %v4361_v1, %v7022_v45  ;;  %v4331_v57 = vmul.f32 %v7048_v19, %v7048_v19 }
 0xa55   :  { %v5588_v0 = vpop.eup %5587  ;;  %v4414_v26 = vadd.f32 1.0, %v5586_v25  ;;  %v4392_v23 = vmul.f32 0.7978846, %v4376_v29  ;;  %v4378_v7 = vadd.f32 %v4362_v34, %v7027_v3  ;;  %v4380_v5 = vadd.f32 %v4364_v33, %v7030_v28 }
 0xa56   :  { %v5590_v38 = vpop.eup %5589  ;;  %v4416_v48 = vadd.f32 1.0, %v5588_v0  ;;  %5601 = vtanh.f32 %v4390_v41  ;;  %v4391_v4 = vmul.f32 0.7978846, %v4375_v63  ;;  %v4393_v50 = vmul.f32 0.7978846, %v4377_v18 }
 0xa57   :  { %v5592_v36 = vpop.eup %5591  ;;  %v4430_v32 = vmul.f32 0.5, %v4414_v26  ;;  %5603 = vtanh.f32 %v4392_v23  ;;  %v4394_v22 = vmul.f32 0.7978846, %v4378_v7  ;;  %v4396_v13 = vmul.f32 0.7978846, %v4380_v5 }
 0xa58   :  { %v5594_v47 = vpop.eup %5593  ;;  %v4432_v39 = vmul.f32 0.5, %v4416_v48  ;;  %5605 = vtanh.f32 %v4391_v4  ;;  %v4347_v10 = vmul.f32 %v4331_v57, %v7048_v19  ;;  %v4333_v42 = vmul.f32 %v7052_v59, %v7052_v59 }
 0xa59   :  { %v5596_v58 = vpop.eup %5595  ;;  %v4446_v54 = vmul.f32 %v4430_v32, %v6955_v49  ;;  %v4418_v24 = vadd.f32 1.0, %v5594_v47  ;;  %5607 = vtanh.f32 %v4393_v50  ;;  %v4415_v35 = vadd.f32 1.0, %v5590_v38 }
 0xa5a   :  { %v5598_v8 = vpop.eup %5597  ;;  %v4448_v44 = vmul.f32 %v4432_v39, %v6958_v37  ;;  %v4420_v15 = vadd.f32 1.0, %v5596_v58  ;;  %5609 = vtanh.f32 %v4394_v22  ;;  %v4363_v31 = vmul.f32 0.044715, %v4347_v10 }
 0xa5b   :  { %v5600_v11 = vpop.eup %5599  ;;  %v4434_v30 = vmul.f32 0.5, %v4418_v24  ;;  %5611 = vtanh.f32 %v4396_v13  ;;  %v4349_v14 = vmul.f32 %v4333_v42, %v7052_v59  ;;  %v4419_v53 = vadd.f32 1.0, %v5598_v8 }
 0xa5c   :  { %v4436_v51 = vmul.f32 0.5, %v4420_v15  ;;  %v4379_v61 = vadd.f32 %v4363_v31, %v7048_v19  ;;  %v4431_v1 = vmul.f32 0.5, %v4415_v35  ;;  %v4417_v49 = vadd.f32 1.0, %v5592_v36 }
 0xa5d   :  { %v4450_v29 = vmul.f32 %v4434_v30, %v6971_v55  ;;  %v4365_v34 = vmul.f32 0.044715, %v4349_v14  ;;  %v4435_v33 = vmul.f32 0.5, %v4419_v53  ;;  %v4421_v25 = vadd.f32 1.0, %v5600_v11 }
 0xa5e   :  { %v4452_v37 = vmul.f32 %v4436_v51, %v6974_v2  ;;  %v4395_v41 = vmul.f32 0.7978846, %v4379_v61  ;;  %v4447_v63 = vmul.f32 %v4431_v1, %v6961_v6  ;;  %v4433_v18 = vmul.f32 0.5, %v4417_v49 }
 0xa5f   :  { %v4462_v57 = vpack.c.bf16 %v4450_v29, %v4446_v54  ;;  %v4381_v0 = vadd.f32 %v4365_v34, %v7052_v59  ;;  %v4451_v26 = vmul.f32 %v4435_v33, %v6981_v27  ;;  %v4437_v23 = vmul.f32 0.5, %v4421_v25  ;;  %v5021_v25 = vld [vmem:[%s7157_s29] ss:$0 sm:$0xff] }
 0xa60   :  { %v5602_v7 = vpop.eup %5601  ;;  %v4464_v5 = vpack.c.bf16 %v4452_v37, %v4448_v44  ;;  %5613 = vtanh.f32 %v4395_v41  ;;  %v4449_v55 = vmul.f32 %v4433_v18, %v6964_v40 }
 0xa61   :  { %v5604_v38 = vpop.eup %5603  ;;  %v4397_v48 = vmul.f32 0.7978846, %v4381_v0  ;;  %v4463_v4 = vpack.c.bf16 %v4451_v26, %v4447_v63  ;;  %v4453_v2 = vmul.f32 %v4437_v23, %v6984_v60  ;;  %v4422_v50 = vadd.f32 1.0, %v5602_v7 }
 0xa62   :  { %v5606_v36 = vpop.eup %5605  ;;  %v4424_v6 = vadd.f32 1.0, %v5604_v38 }
 0xa63   :  { %v5608_v32 = vpop.eup %5607  ;;  %5615 = vtanh.f32 %v4397_v48  ;;  %4765 = vmatprep.mubr.bf16.mxu0 %v4463_v4  ;;  %v4465_v22 = vpack.c.bf16 %v4453_v2, %v4449_v55  ;;  %v4438_v39 = vmul.f32 0.5, %v4422_v50  ;;  %v4423_v42 = vadd.f32 1.0, %v5606_v36 }
 0xa64   :  { %v5610_v13 = vpop.eup %5609  ;;  %4766 = vmatmul.mubr.bf16.vlgmr.msra.gmra.mrb[44].mxu0 %v4462_v57  ;;  %v4440_v10 = vmul.f32 0.5, %v4424_v6  ;;  %v4425_v8 = vadd.f32 1.0, %v5608_v32 }
 0xa65   :  { %v5612_v27 = vpop.eup %5611  ;;  %4814 = vmatprep.mubr.bf16.mxu1 %v4465_v22  ;;  %v4426_v47 = vadd.f32 1.0, %v5610_v13  ;;  %v4454_v60 = vmul.f32 %v4438_v39, %v7011_v9  ;;  %v4439_v11 = vmul.f32 0.5, %v4423_v42 }
 0xa66   :  { %4815 = vmatmul.mubr.bf16.vlgmr.msra.gmra.mrb[40].mxu1 %v4464_v5  ;;  %v4428_v40 = vadd.f32 1.0, %v5612_v27  ;;  %v4456_v44 = vmul.f32 %v4440_v10, %v7014_v21  ;;  %v4441_v1 = vmul.f32 0.5, %v4425_v8 }
 0xa67   :  { %v4442_v58 = vmul.f32 0.5, %v4426_v47  ;;  %v4455_v49 = vmul.f32 %v4439_v11, %v7019_v62 }
 0xa68   :  { %v4444_v54 = vmul.f32 0.5, %v4428_v40  ;;  %v4457_v34 = vmul.f32 %v4441_v1, %v7022_v45 }
 0xa69   :  { %v4458_v24 = vmul.f32 %v4442_v58, %v7027_v3 }
 0xa6a   :  { %v5614_v35 = vpop.eup %5613  ;;  %v4460_v15 = vmul.f32 %v4444_v54, %v7030_v28 }
 0xa6b   :  { %v4427_v31 = vadd.f32 1.0, %v5614_v35  ;;  %v4466_v30 = vpack.c.bf16 %v4458_v24, %v4454_v60 }
 0xa6c   :  { %v4468_v14 = vpack.c.bf16 %v4460_v15, %v4456_v44 }
 0xa6d   :  { %v5616_v53 = vpop.eup %5615  ;;  %v4443_v51 = vmul.f32 0.5, %v4427_v31 }
 0xa6e   :  { %v4429_v61 = vadd.f32 1.0, %v5616_v53 }
 0xa6f   :  { %v4459_v9 = vmul.f32 %v4443_v51, %v7048_v19 }
 0xa70   :  { %v4445_v29 = vmul.f32 0.5, %v4429_v61 }
 0xa71   :  { %v4467_v3 = vpack.c.bf16 %v4459_v9, %v4455_v49 }
 0xa72   :  { %v4461_v21 = vmul.f32 %v4445_v29, %v7052_v59 }
 0xa73   :  { %4773 = vmatprep.mubr.bf16.mxu0 %v4467_v3 }
 0xa74   :  { %v4469_v28 = vpack.c.bf16 %v4461_v21, %v4457_v34  ;;  %4774 = vmatmul.mubr.bf16.gmra.mrb[48].mxu0 %v4466_v30 }
 0xa76   :  { %4822 = vmatprep.mubr.bf16.mxu1 %v4469_v28 }
 0xa77   :  { %4823 = vmatmul.mubr.bf16.gmra.mrb[44].mxu1 %v4468_v14 }
 0xb37   :  { %v5124_v33 = vpop.f32.mrb[44].mxu0 }
 0xb38   :  { %v5125_v37 = vpop.f32.mrb[45].mxu0 }
 0xb39   :  { %v5152_v62 = vpop.f32.mrb[40].mxu1  ;;  %v5126_v41 = vadd.f32 %v5125_v37, %v5124_v33  ;;  %v5127_v19 = vpop.f32.mrb[46].mxu0 }
 0xb3a   :  { %v5153_v63 = vpop.f32.mrb[41].mxu1  ;;  %v5128_v18 = vpop.f32.mrb[47].mxu0 }
 0xb3b   :  { %v4768_v57 = vadd.f32 %v5126_v41, %v5021_v25  ;;  %v5154_v45 = vadd.f32 %v5153_v63, %v5152_v62  ;;  %v5155_v0 = vpop.f32.mrb[42].mxu1  ;;  %v5129_v59 = vadd.f32 %v5128_v18, %v5127_v19 }
 0xb3c   :  { %v5156_v26 = vpop.f32.mrb[43].mxu1 }
 0xb3d   :  { %v4817_v23 = vadd.f32 %v5154_v45, %v4768_v57  ;;  %v4771_v7 = vadd.f32 %v5129_v59, %v5021_v25  ;;  %v5157_v5 = vadd.f32 %v5156_v26, %v5155_v0 }
 0xb3f   :  { %v4831_v55 = vmul.f32 %v4817_v23, %v6908_v46  ;;  %v4820_v38 = vadd.f32 %v5157_v5, %v4771_v7 }
 0xb41   :  { %v4835_v48 = vadd.f32 %v4831_v55, %v6867_v56  ;;  %v4832_v4 = vmul.f32 %v4820_v38, %v6912_v17 }
 0xb43   :  { %4839 = vst [vmem:[#allocation16] sm:$0xff] %v4835_v48  ;;  %v4836_v2 = vadd.f32 %v4832_v4, %v6870_v52 }
 0xb45   :  { %4840 = vst [vmem:[#allocation16 + $0x8] sm:$0xff] %v4836_v2 }
 0xb47   :  { %v5130_v50 = vpop.f32.mrb[48].mxu0 }
 0xb48   :  { %v5131_v36 = vpop.f32.mrb[49].mxu0 }
 0xb49   :  { %v5132_v6 = vadd.f32 %v5131_v36, %v5130_v50  ;;  %v5133_v32 = vpop.f32.mrb[50].mxu0 }
 0xb4a   :  { %v5158_v22 = vpop.f32.mrb[44].mxu1  ;;  %v5134_v13 = vpop.f32.mrb[51].mxu0 }
 0xb4b   :  { %v4776_v27 = vadd.f32 %v5132_v6, %v5021_v25  ;;  %v5159_v47 = vpop.f32.mrb[45].mxu1  ;;  %v5135_v39 = vadd.f32 %v5134_v13, %v5133_v32 }
 0xb4c   :  { %v5160_v40 = vadd.f32 %v5159_v47, %v5158_v22  ;;  %v5161_v46 = vpop.f32.mrb[46].mxu1 }
 0xb4d   :  { %v4779_v10 = vadd.f32 %v5135_v39, %v5021_v25  ;;  %v5162_v42 = vpop.f32.mrb[47].mxu1 }
 0xb4e   :  { %v4825_v56 = vadd.f32 %v5160_v40, %v4776_v27  ;;  %v5163_v58 = vadd.f32 %v5162_v42, %v5161_v46 }
 0xb50   :  { %v4833_v17 = vmul.f32 %v4825_v56, %v6914_v20  ;;  %v4828_v54 = vadd.f32 %v5163_v58, %v4779_v10 }
 0xb52   :  { %v4837_v52 = vadd.f32 %v4833_v17, %v6873_v43  ;;  %v4834_v60 = vmul.f32 %v4828_v54, %v6918_v16 }
 0xb54   :  { %4841 = vst [vmem:[#allocation16 + $0x10] sm:$0xff] %v4837_v52  ;;  %v4838_v24 = vadd.f32 %v4834_v60, %v6876_v12 }
 0xb56   :  { %4842 = vst [vmem:[#allocation16 + $0x18] sm:$0xff] %v4838_v24 }
 0xb57   :  { %5808 = shalt.err (!%p5805_p12)
}
 0xb58   :  { %s7158_s23 = sld [smem:[#allocation27_spill]] }
 0xb5e   :  { %s5809_s16 = scalar_lea.hbm %s7158_s23, 512 }
 0xb5f   :  { %p5810_p13 = scmp.ne.s32.totalorder %s7158_s23, %s5809_s16  ;;  %p5813_p0 = scmp.lt.u32.totalorder %s5809_s16, %s7158_s23 }
 0xb61   :  { %p5815_p1 = pnand %p5813_p0, %p5810_p13 }
 0xb63   :  { %5818 = shalt.err (!%p5815_p1)
}
 0xb64   :  { %4854 = dma.vmem_to_hbm [thread:$0]  %s4849_s28, 512, %s7158_s23, [#allocation4], %s7149_s19, %s7149_s19, %s5833_s24  }
 0xb65   :  { %5829 = dma.done.wait [#allocation4], 512  }
 0xb66   :  { %5830 = vsyncadd [#allocation4], 4294966784 }
 0xb67   :  { %4858 = vsyncpa [#allocation3], 1 }
 0xb68   :  { %4859 = vsyncpa [#allocation6], 1 }
 0xb69   :  { %4860 = vsyncpa [#allocation9], 1 }
 0xb6a   :  { %4861 = vsyncpa [#allocation12], 1 }
 0xb6b   :  { %4862 = vsyncpa [#allocation15], 1 }
 0xb6c   :  { %4863 = vsyncpa [#allocation4], 1 }

</bundles_post_ra>
